<compile_context>
chip_gen: v7x
topology: tpu7x:2x2x1
jax: 0.10.0
libtpu: 0.0.40
codegen_flags: <defaults>
</compile_context>

<pallas_src>
import functools

import jax
import jax.numpy as jnp
from jax.experimental import pallas as pl
from jax.experimental.pallas import tpu as pltpu

C1, C2, C3 = 32, 64, 128   # channel widths fixed by the module
_PH = 7                    # physical column of logical padded column 0 (interior store lands at 8 -> aligned)


def _round8(n):
    return ((n + 7) // 8) * 8


def _fused_kernel(p1_ref, w1_ref, b1_ref, w2_ref, b2_ref, w3_ref, b3_ref,
                  o_ref, xp2_sc, xp3_sc, rp1_sc, rp2_sc, rp3_sc, *, H, W):
    """Fused conv1+pool1 -> conv2+pool2 -> conv3+pool3 for one batch element.

    p1_ref : (1, H*W, 9)        im2col patches of the (zero-padded) input image
    w1_ref : (9, 32)            conv1 weights, (dy*3+dx, cout)
    w2_ref : (3, 96, 64)        conv2 weights, (dy, dx*Cin+cin, cout)
    w3_ref : (3, 192, 128)      conv3 weights, (dy, dx*Cin+cin, cout)
    b*_ref : (1, Cout)          biases
    o_ref  : (1, H/8, W/8, 128) pooled conv3 output (NHWC)
    xp2_sc / xp3_sc : zero-padded NHWC inputs of layers 2/3 (W axis left-offset by _PH)
    rp*_sc : row-pooled temporaries used for the stride-2 column pool
    """
    H2, W2 = H // 2, W // 2
    H4, W4 = H2 // 2, W2 // 2
    H8, W8 = H4 // 2, W4 // 2

    # ---------------- layer 1: im2col matmul + bias + ReLU + row-pool ----------
    strip = 8                                          # conv rows per strip (keeps vreg pressure low)
    for s in range(H // strip):
        a = jnp.dot(p1_ref[0, s * strip * W:(s + 1) * strip * W, :], w1_ref[...],
                    preferred_element_type=jnp.float32)              # (strip*W, C1)
        a = jnp.maximum(a + b1_ref[...], 0.0)
        ar = a.reshape(strip // 2, 2, W, C1)
        rp1_sc[s * (strip // 2):(s + 1) * (strip // 2), :, :] = jnp.maximum(ar[:, 0], ar[:, 1])

    # column pool (stride-2 sublane reads) -> write interior of zero-padded layer-2 input
    xp2_sc[...] = jnp.zeros_like(xp2_sc)
    pooled1 = jnp.maximum(rp1_sc[:, pl.ds(0, W2, 2), :],
                          rp1_sc[:, pl.ds(1, W2, 2), :])             # (H2, W2, C1)
    xp2_sc[1:H2 + 1, _PH + 1:_PH + 1 + W2, :] = pooled1              # aligned store (offset 8)

    # ---------------- layer 2: dx-concat im2col, K = 3*C1 ----------------------
    xc2 = jnp.concatenate(
        [xp2_sc[:, _PH + dx:_PH + dx + W2, :] for dx in range(3)], axis=-1)   # (H2+2, W2, 3*C1)
    acc2 = jnp.dot(xc2[0:H2].reshape(H2 * W2, 3 * C1), w2_ref[0],
                   preferred_element_type=jnp.float32)
    for dy in (1, 2):
        acc2 = acc2 + jnp.dot(xc2[dy:dy + H2].reshape(H2 * W2, 3 * C1), w2_ref[dy],
                              preferred_element_type=jnp.float32)
    y2 = jnp.maximum(acc2 + b2_ref[...], 0.0)                        # (H2*W2, C2)
    yr2 = y2.reshape(H4, 2, W2, C2)
    rp2_sc[...] = jnp.maximum(yr2[:, 0], yr2[:, 1])
    xp3_sc[...] = jnp.zeros_like(xp3_sc)
    pooled2 = jnp.maximum(rp2_sc[:, pl.ds(0, W4, 2), :],
                          rp2_sc[:, pl.ds(1, W4, 2), :])             # (H4, W4, C2)
    xp3_sc[1:H4 + 1, _PH + 1:_PH + 1 + W4, :] = pooled2

    # ---------------- layer 3: dx-concat im2col, K = 3*C2 ----------------------
    xc3 = jnp.concatenate(
        [xp3_sc[:, _PH + dx:_PH + dx + W4, :] for dx in range(3)], axis=-1)   # (H4+2, W4, 3*C2)
    acc3 = jnp.dot(xc3[0:H4].reshape(H4 * W4, 3 * C2), w3_ref[0],
                   preferred_element_type=jnp.float32)
    for dy in (1, 2):
        acc3 = acc3 + jnp.dot(xc3[dy:dy + H4].reshape(H4 * W4, 3 * C2), w3_ref[dy],
                              preferred_element_type=jnp.float32)
    y3 = jnp.maximum(acc3 + b3_ref[...], 0.0)                        # (H4*W4, C3)
    yr3 = y3.reshape(H8, 2, W4, C3)
    rp3_sc[...] = jnp.maximum(yr3[:, 0], yr3[:, 1])
    o_ref[0] = jnp.maximum(rp3_sc[:, pl.ds(0, W8, 2), :],
                           rp3_sc[:, pl.ds(1, W8, 2), :])            # (H8, W8, C3) lane-dense store


def _fused_forward(p1, w1r, b1, w2r, b2, w3r, b3, *, H, W):
    B = p1.shape[0]
    H2, W2 = H // 2, W // 2
    H4, W4 = H2 // 2, W2 // 2
    H8, W8 = H4 // 2, W4 // 2
    assert H % 8 == 0 and W % 32 == 0, "kernel assumes pooled widths stay multiples of 8"

    kernel = functools.partial(_fused_kernel, H=H, W=W)
    return pl.pallas_call(
        kernel,
        out_shape=jax.ShapeDtypeStruct((B, H8, W8, C3), jnp.float32),
        grid_spec=pltpu.PrefetchScalarGridSpec(
            num_scalar_prefetch=0,
            grid=(B,),
            in_specs=[
                pl.BlockSpec((1, H * W, 9), lambda b: (b, 0, 0)),
                pl.BlockSpec((9, C1), lambda b: (0, 0)),
                pl.BlockSpec((1, C1), lambda b: (0, 0)),
                pl.BlockSpec((3, 3 * C1, C2), lambda b: (0, 0, 0)),
                pl.BlockSpec((1, C2), lambda b: (0, 0)),
                pl.BlockSpec((3, 3 * C2, C3), lambda b: (0, 0, 0)),
                pl.BlockSpec((1, C3), lambda b: (0, 0)),
            ],
            out_specs=pl.BlockSpec((1, H8, W8, C3), lambda b: (b, 0, 0, 0)),
            scratch_shapes=[
                pltpu.VMEM((H2 + 2, _round8(_PH + 2 + W2), C1), jnp.float32),  # padded layer-2 input
                pltpu.VMEM((H4 + 2, _round8(_PH + 2 + W4), C2), jnp.float32),  # padded layer-3 input
                pltpu.VMEM((H2, W, C1), jnp.float32),                          # row-pooled layer 1
                pltpu.VMEM((H4, W2, C2), jnp.float32),                         # row-pooled layer 2
                pltpu.VMEM((H8, W4, C3), jnp.float32),                         # row-pooled layer 3
            ],
        ),
        compiler_params=pltpu.CompilerParams(dimension_semantics=("parallel",)),
    )(p1, w1r, b1, w2r, b2, w3r, b3)


def _im2col3x3(x):
    """x: (B, H, W) -> (B, H*W, 9) patches of the zero-padded input, taps ordered (dy, dx)."""
    B, H, W = x.shape
    xp = jnp.pad(x, ((0, 0), (1, 1), (1, 1)))
    cols = [xp[:, dy:dy + H, dx:dx + W] for dy in range(3) for dx in range(3)]
    return jnp.stack(cols, axis=-1).reshape(B, H * W, 9)


@jax.jit
def cnn_backbone(x_nchw, params):
    """Forward pass matching CNNBackbone. x_nchw: (B, 1, H, W) float32 -> (B, H*W/64, 128)."""
    (w1, b1), (w2, b2), (w3, b3) = params
    B, _, H, W = x_nchw.shape
    p1 = _im2col3x3(x_nchw[:, 0])                                   # tiny prep fusion (input is ~8 KiB)
    y = _fused_forward(
        p1,
        w1.reshape(9, C1), b1.reshape(1, C1),
        w2.reshape(3, 3 * C1, C2), b2.reshape(1, C2),
        w3.reshape(3, 3 * C2, C3), b3.reshape(1, C3),
        H=H, W=W)
    # NHWC -> NCHW (contiguous like torch), then the PyTorch `.view(B, -1, 128)`
    y = jnp.transpose(y, (0, 3, 1, 2))
    return y.reshape(B, -1, 128)


def _reference(x_nchw, params):
    """Plain-JAX/XLA reference for numerical validation."""
    x = jnp.transpose(x_nchw, (0, 2, 3, 1))
    for w, b in params:
        x = jax.lax.conv_general_dilated(
            x, w, window_strides=(1, 1), padding=((1, 1), (1, 1)),
            dimension_numbers=("NHWC", "HWIO", "NHWC"))
        x = jax.nn.relu(x + b)
        x = jax.lax.reduce_window(x, -jnp.inf, jax.lax.max,
                                  (1, 2, 2, 1), (1, 2, 2, 1), "VALID")
    x = jnp.transpose(x, (0, 3, 1, 2))
    return x.reshape(x.shape[0], -1, 128)


def init_params(key):
    """Deterministic synthetic weights, PyTorch-default-style uniform init, HWIO layout."""
    params = []
    for cin, cout in [(1, C1), (C1, C2), (C2, C3)]:
        key, kw, kb = jax.random.split(key, 3)
        bound = 1.0 / float(cin * 3 * 3) ** 0.5
        w = jax.random.uniform(kw, (3, 3, cin, cout), jnp.float32, -bound, bound)
        b = jax.random.uniform(kb, (cout,), jnp.float32, -bound, bound)
        params.append((w, b))
    return tuple(params)


if __name__ == "__main__":
    key = jax.random.PRNGKey(0)
    kx, kp = jax.random.split(key)
    # NCHW input like PyTorch: batch=2, 1 channel, 32x32 spatial -> (2, 16, 128) output.
    x = jax.random.normal(kx, (2, 1, 32, 32), jnp.float32)
    params = init_params(kp)

    out = jax.block_until_ready(cnn_backbone(x, params))
    assert out.shape == (2, 16, 128), out.shape

    ref = _reference(x, params)
    err = float(jnp.max(jnp.abs(out - ref)))
    assert jnp.allclose(out, ref, atol=1e-3, rtol=1e-3), f"max abs err {err}"
    print("KERNEL_OK")
</pallas_src>

<mosaic_0001>
module attributes {stable_mosaic.version = 11 : i64} {
  func.func @_fused_kernel(%arg0: i32, %arg1: memref<1x1024x9xf32, #tpu.memory_space<vmem>>, %arg2: memref<9x32xf32, #tpu.memory_space<vmem>>, %arg3: memref<1x32xf32, #tpu.memory_space<vmem>>, %arg4: memref<3x96x64xf32, #tpu.memory_space<vmem>>, %arg5: memref<1x64xf32, #tpu.memory_space<vmem>>, %arg6: memref<3x192x128xf32, #tpu.memory_space<vmem>>, %arg7: memref<1x128xf32, #tpu.memory_space<vmem>>, %arg8: memref<1x4x4x128xf32, #tpu.memory_space<vmem>>, %arg9: memref<18x32x32xf32, #tpu.memory_space<vmem>>, %arg10: memref<10x24x64xf32, #tpu.memory_space<vmem>>, %arg11: memref<16x32x32xf32, #tpu.memory_space<vmem>>, %arg12: memref<8x16x64xf32, #tpu.memory_space<vmem>>, %arg13: memref<4x8x128xf32, #tpu.memory_space<vmem>>) attributes {dimension_semantics = [#tpu.dimension_semantics<parallel>], iteration_bounds = array<i64: 2>, scalar_prefetch = 0 : i64, scratch_operands = 5 : i64, tpu.core_type = #tpu.core_type<tc>, window_params = [{transform_indices = @transform_0, window_bounds = array<i64: 1, 1024, 9>}, {pipeline_mode = #tpu.pipeline_mode<synchronous>, transform_indices = @transform_1, window_bounds = array<i64: 9, 32>}, {pipeline_mode = #tpu.pipeline_mode<synchronous>, transform_indices = @transform_2, window_bounds = array<i64: 1, 32>}, {pipeline_mode = #tpu.pipeline_mode<synchronous>, transform_indices = @transform_3, window_bounds = array<i64: 3, 96, 64>}, {pipeline_mode = #tpu.pipeline_mode<synchronous>, transform_indices = @transform_4, window_bounds = array<i64: 1, 64>}, {pipeline_mode = #tpu.pipeline_mode<synchronous>, transform_indices = @transform_5, window_bounds = array<i64: 3, 192, 128>}, {pipeline_mode = #tpu.pipeline_mode<synchronous>, transform_indices = @transform_6, window_bounds = array<i64: 1, 128>}, {transform_indices = @transform_7, window_bounds = array<i64: 1, 4, 4, 128>}]} {
    %c0 = arith.constant 0 : index
    %c0_0 = arith.constant 0 : index
    %c0_1 = arith.constant 0 : index
    %0 = vector.load %arg1[%c0, %c0_0, %c0_1] : memref<1x1024x9xf32, #tpu.memory_space<vmem>>, vector<1x256x9xf32>
    %1 = vector.shape_cast %0 : vector<1x256x9xf32> to vector<256x9xf32>
    %c0_2 = arith.constant 0 : index
    %c0_3 = arith.constant 0 : index
    %2 = vector.load %arg2[%c0_2, %c0_3] : memref<9x32xf32, #tpu.memory_space<vmem>>, vector<9x32xf32>
    %cst = arith.constant dense<0.000000e+00> : vector<256x32xf32>
    %3 = tpu.matmul %1, %2, %cst {dimension_numbers = #tpu.dot_dimension_numbers<[1], [0], [0], [1], [0, 0, 1, 1], [], []>} : vector<256x9xf32>, vector<9x32xf32>, vector<256x32xf32> -> vector<256x32xf32>
    %c0_4 = arith.constant 0 : index
    %c0_5 = arith.constant 0 : index
    %4 = vector.load %arg3[%c0_4, %c0_5] : memref<1x32xf32, #tpu.memory_space<vmem>>, vector<1x32xf32>
    %5 = vector.broadcast %4 : vector<1x32xf32> to vector<256x32xf32>
    %6 = arith.addf %3, %5 : vector<256x32xf32>
    %cst_6 = arith.constant 0.000000e+00 : f32
    %7 = vector.broadcast %cst_6 : f32 to vector<256x32xf32>
    %8 = arith.maximumf %6, %7 : vector<256x32xf32>
    %9 = vector.shape_cast %8 : vector<256x32xf32> to vector<4x2x32x32xf32>
    %10 = vector.extract_strided_slice %9 {offsets = [0, 0, 0, 0], sizes = [4, 1, 32, 32], strides = [1, 1, 1, 1]} : vector<4x2x32x32xf32> to vector<4x1x32x32xf32>
    %11 = vector.shape_cast %10 : vector<4x1x32x32xf32> to vector<4x32x32xf32>
    %12 = vector.extract_strided_slice %9 {offsets = [0, 1, 0, 0], sizes = [4, 1, 32, 32], strides = [1, 1, 1, 1]} : vector<4x2x32x32xf32> to vector<4x1x32x32xf32>
    %13 = vector.shape_cast %12 : vector<4x1x32x32xf32> to vector<4x32x32xf32>
    %14 = arith.maximumf %11, %13 : vector<4x32x32xf32>
    %c0_7 = arith.constant 0 : index
    %c0_8 = arith.constant 0 : index
    %c0_9 = arith.constant 0 : index
    %15 = vector.load %arg11[%c0_7, %c0_8, %c0_9] : memref<16x32x32xf32, #tpu.memory_space<vmem>>, vector<4x32x32xf32>
    tpu.vector_store %arg11[%c0_7, %c0_8, %c0_9], %14 {strides = array<i32>} : memref<16x32x32xf32, #tpu.memory_space<vmem>>, vector<4x32x32xf32>,
    %c0_10 = arith.constant 0 : index
    %c256 = arith.constant 256 : index
    %c0_11 = arith.constant 0 : index
    %16 = vector.load %arg1[%c0_10, %c256, %c0_11] : memref<1x1024x9xf32, #tpu.memory_space<vmem>>, vector<1x256x9xf32>
    %17 = vector.shape_cast %16 : vector<1x256x9xf32> to vector<256x9xf32>
    %c0_12 = arith.constant 0 : index
    %c0_13 = arith.constant 0 : index
    %18 = vector.load %arg2[%c0_12, %c0_13] : memref<9x32xf32, #tpu.memory_space<vmem>>, vector<9x32xf32>
    %cst_14 = arith.constant dense<0.000000e+00> : vector<256x32xf32>
    %19 = tpu.matmul %17, %18, %cst_14 {dimension_numbers = #tpu.dot_dimension_numbers<[1], [0], [0], [1], [0, 0, 1, 1], [], []>} : vector<256x9xf32>, vector<9x32xf32>, vector<256x32xf32> -> vector<256x32xf32>
    %c0_15 = arith.constant 0 : index
    %c0_16 = arith.constant 0 : index
    %20 = vector.load %arg3[%c0_15, %c0_16] : memref<1x32xf32, #tpu.memory_space<vmem>>, vector<1x32xf32>
    %21 = vector.broadcast %20 : vector<1x32xf32> to vector<256x32xf32>
    %22 = arith.addf %19, %21 : vector<256x32xf32>
    %cst_17 = arith.constant 0.000000e+00 : f32
    %23 = vector.broadcast %cst_17 : f32 to vector<256x32xf32>
    %24 = arith.maximumf %22, %23 : vector<256x32xf32>
    %25 = vector.shape_cast %24 : vector<256x32xf32> to vector<4x2x32x32xf32>
    %26 = vector.extract_strided_slice %25 {offsets = [0, 0, 0, 0], sizes = [4, 1, 32, 32], strides = [1, 1, 1, 1]} : vector<4x2x32x32xf32> to vector<4x1x32x32xf32>
    %27 = vector.shape_cast %26 : vector<4x1x32x32xf32> to vector<4x32x32xf32>
    %28 = vector.extract_strided_slice %25 {offsets = [0, 1, 0, 0], sizes = [4, 1, 32, 32], strides = [1, 1, 1, 1]} : vector<4x2x32x32xf32> to vector<4x1x32x32xf32>
    %29 = vector.shape_cast %28 : vector<4x1x32x32xf32> to vector<4x32x32xf32>
    %30 = arith.maximumf %27, %29 : vector<4x32x32xf32>
    %c4 = arith.constant 4 : index
    %c0_18 = arith.constant 0 : index
    %c0_19 = arith.constant 0 : index
    %31 = vector.load %arg11[%c4, %c0_18, %c0_19] : memref<16x32x32xf32, #tpu.memory_space<vmem>>, vector<4x32x32xf32>
    tpu.vector_store %arg11[%c4, %c0_18, %c0_19], %30 {strides = array<i32>} : memref<16x32x32xf32, #tpu.memory_space<vmem>>, vector<4x32x32xf32>,
    %c0_20 = arith.constant 0 : index
    %c512 = arith.constant 512 : index
    %c0_21 = arith.constant 0 : index
    %32 = vector.load %arg1[%c0_20, %c512, %c0_21] : memref<1x1024x9xf32, #tpu.memory_space<vmem>>, vector<1x256x9xf32>
    %33 = vector.shape_cast %32 : vector<1x256x9xf32> to vector<256x9xf32>
    %c0_22 = arith.constant 0 : index
    %c0_23 = arith.constant 0 : index
    %34 = vector.load %arg2[%c0_22, %c0_23] : memref<9x32xf32, #tpu.memory_space<vmem>>, vector<9x32xf32>
    %cst_24 = arith.constant dense<0.000000e+00> : vector<256x32xf32>
    %35 = tpu.matmul %33, %34, %cst_24 {dimension_numbers = #tpu.dot_dimension_numbers<[1], [0], [0], [1], [0, 0, 1, 1], [], []>} : vector<256x9xf32>, vector<9x32xf32>, vector<256x32xf32> -> vector<256x32xf32>
    %c0_25 = arith.constant 0 : index
    %c0_26 = arith.constant 0 : index
    %36 = vector.load %arg3[%c0_25, %c0_26] : memref<1x32xf32, #tpu.memory_space<vmem>>, vector<1x32xf32>
    %37 = vector.broadcast %36 : vector<1x32xf32> to vector<256x32xf32>
    %38 = arith.addf %35, %37 : vector<256x32xf32>
    %cst_27 = arith.constant 0.000000e+00 : f32
    %39 = vector.broadcast %cst_27 : f32 to vector<256x32xf32>
    %40 = arith.maximumf %38, %39 : vector<256x32xf32>
    %41 = vector.shape_cast %40 : vector<256x32xf32> to vector<4x2x32x32xf32>
    %42 = vector.extract_strided_slice %41 {offsets = [0, 0, 0, 0], sizes = [4, 1, 32, 32], strides = [1, 1, 1, 1]} : vector<4x2x32x32xf32> to vector<4x1x32x32xf32>
    %43 = vector.shape_cast %42 : vector<4x1x32x32xf32> to vector<4x32x32xf32>
    %44 = vector.extract_strided_slice %41 {offsets = [0, 1, 0, 0], sizes = [4, 1, 32, 32], strides = [1, 1, 1, 1]} : vector<4x2x32x32xf32> to vector<4x1x32x32xf32>
    %45 = vector.shape_cast %44 : vector<4x1x32x32xf32> to vector<4x32x32xf32>
    %46 = arith.maximumf %43, %45 : vector<4x32x32xf32>
    %c8 = arith.constant 8 : index
    %c0_28 = arith.constant 0 : index
    %c0_29 = arith.constant 0 : index
    %47 = vector.load %arg11[%c8, %c0_28, %c0_29] : memref<16x32x32xf32, #tpu.memory_space<vmem>>, vector<4x32x32xf32>
    tpu.vector_store %arg11[%c8, %c0_28, %c0_29], %46 {strides = array<i32>} : memref<16x32x32xf32, #tpu.memory_space<vmem>>, vector<4x32x32xf32>,
    %c0_30 = arith.constant 0 : index
    %c768 = arith.constant 768 : index
    %c0_31 = arith.constant 0 : index
    %48 = vector.load %arg1[%c0_30, %c768, %c0_31] : memref<1x1024x9xf32, #tpu.memory_space<vmem>>, vector<1x256x9xf32>
    %49 = vector.shape_cast %48 : vector<1x256x9xf32> to vector<256x9xf32>
    %c0_32 = arith.constant 0 : index
    %c0_33 = arith.constant 0 : index
    %50 = vector.load %arg2[%c0_32, %c0_33] : memref<9x32xf32, #tpu.memory_space<vmem>>, vector<9x32xf32>
    %cst_34 = arith.constant dense<0.000000e+00> : vector<256x32xf32>
    %51 = tpu.matmul %49, %50, %cst_34 {dimension_numbers = #tpu.dot_dimension_numbers<[1], [0], [0], [1], [0, 0, 1, 1], [], []>} : vector<256x9xf32>, vector<9x32xf32>, vector<256x32xf32> -> vector<256x32xf32>
    %c0_35 = arith.constant 0 : index
    %c0_36 = arith.constant 0 : index
    %52 = vector.load %arg3[%c0_35, %c0_36] : memref<1x32xf32, #tpu.memory_space<vmem>>, vector<1x32xf32>
    %53 = vector.broadcast %52 : vector<1x32xf32> to vector<256x32xf32>
    %54 = arith.addf %51, %53 : vector<256x32xf32>
    %cst_37 = arith.constant 0.000000e+00 : f32
    %55 = vector.broadcast %cst_37 : f32 to vector<256x32xf32>
    %56 = arith.maximumf %54, %55 : vector<256x32xf32>
    %57 = vector.shape_cast %56 : vector<256x32xf32> to vector<4x2x32x32xf32>
    %58 = vector.extract_strided_slice %57 {offsets = [0, 0, 0, 0], sizes = [4, 1, 32, 32], strides = [1, 1, 1, 1]} : vector<4x2x32x32xf32> to vector<4x1x32x32xf32>
    %59 = vector.shape_cast %58 : vector<4x1x32x32xf32> to vector<4x32x32xf32>
    %60 = vector.extract_strided_slice %57 {offsets = [0, 1, 0, 0], sizes = [4, 1, 32, 32], strides = [1, 1, 1, 1]} : vector<4x2x32x32xf32> to vector<4x1x32x32xf32>
    %61 = vector.shape_cast %60 : vector<4x1x32x32xf32> to vector<4x32x32xf32>
    %62 = arith.maximumf %59, %61 : vector<4x32x32xf32>
    %c12 = arith.constant 12 : index
    %c0_38 = arith.constant 0 : index
    %c0_39 = arith.constant 0 : index
    %63 = vector.load %arg11[%c12, %c0_38, %c0_39] : memref<16x32x32xf32, #tpu.memory_space<vmem>>, vector<4x32x32xf32>
    tpu.vector_store %arg11[%c12, %c0_38, %c0_39], %62 {strides = array<i32>} : memref<16x32x32xf32, #tpu.memory_space<vmem>>, vector<4x32x32xf32>,
    %cst_40 = arith.constant 0.000000e+00 : f32
    %64 = vector.broadcast %cst_40 : f32 to vector<18x32x32xf32>
    %c0_41 = arith.constant 0 : index
    %c0_42 = arith.constant 0 : index
    %c0_43 = arith.constant 0 : index
    %65 = vector.load %arg9[%c0_41, %c0_42, %c0_43] : memref<18x32x32xf32, #tpu.memory_space<vmem>>, vector<18x32x32xf32>
    tpu.vector_store %arg9[%c0_41, %c0_42, %c0_43], %64 {strides = array<i32>} : memref<18x32x32xf32, #tpu.memory_space<vmem>>, vector<18x32x32xf32>,
    %c0_44 = arith.constant 0 : index
    %c0_45 = arith.constant 0 : index
    %c0_46 = arith.constant 0 : index
    %66 = tpu.strided_load %arg11[%c0_44, %c0_45, %c0_46] {strides = array<i32: 1, 2, 1>} : memref<16x32x32xf32, #tpu.memory_space<vmem>>, vector<16x16x32xf32>
    %c0_47 = arith.constant 0 : index
    %c1 = arith.constant 1 : index
    %c0_48 = arith.constant 0 : index
    %67 = tpu.strided_load %arg11[%c0_47, %c1, %c0_48] {strides = array<i32: 1, 2, 1>} : memref<16x32x32xf32, #tpu.memory_space<vmem>>, vector<16x16x32xf32>
    %68 = arith.maximumf %66, %67 : vector<16x16x32xf32>
    %c1_49 = arith.constant 1 : index
    %c8_50 = arith.constant 8 : index
    %c0_51 = arith.constant 0 : index
    %69 = vector.load %arg9[%c1_49, %c8_50, %c0_51] : memref<18x32x32xf32, #tpu.memory_space<vmem>>, vector<16x16x32xf32>
    tpu.vector_store %arg9[%c1_49, %c8_50, %c0_51], %68 {strides = array<i32>} : memref<18x32x32xf32, #tpu.memory_space<vmem>>, vector<16x16x32xf32>,
    %c0_52 = arith.constant 0 : index
    %c7 = arith.constant 7 : index
    %c0_53 = arith.constant 0 : index
    %70 = vector.load %arg9[%c0_52, %c7, %c0_53] : memref<18x32x32xf32, #tpu.memory_space<vmem>>, vector<18x16x32xf32>
    %c0_54 = arith.constant 0 : index
    %c8_55 = arith.constant 8 : index
    %c0_56 = arith.constant 0 : index
    %71 = vector.load %arg9[%c0_54, %c8_55, %c0_56] : memref<18x32x32xf32, #tpu.memory_space<vmem>>, vector<18x16x32xf32>
    %c0_57 = arith.constant 0 : index
    %c9 = arith.constant 9 : index
    %c0_58 = arith.constant 0 : index
    %72 = vector.load %arg9[%c0_57, %c9, %c0_58] : memref<18x32x32xf32, #tpu.memory_space<vmem>>, vector<18x16x32xf32>
    %73 = tpu.concatenate %70, %71, %72 in 2 : vector<18x16x32xf32>, vector<18x16x32xf32>, vector<18x16x32xf32> -> vector<18x16x96xf32>
    %74 = vector.extract_strided_slice %73 {offsets = [0, 0, 0], sizes = [16, 16, 96], strides = [1, 1, 1]} : vector<18x16x96xf32> to vector<16x16x96xf32>
    %75 = vector.shape_cast %74 : vector<16x16x96xf32> to vector<256x96xf32>
    %c0_59 = arith.constant 0 : index
    %c0_60 = arith.constant 0 : index
    %c0_61 = arith.constant 0 : index
    %76 = vector.load %arg4[%c0_59, %c0_60, %c0_61] : memref<3x96x64xf32, #tpu.memory_space<vmem>>, vector<1x96x64xf32>
    %77 = vector.shape_cast %76 : vector<1x96x64xf32> to vector<96x64xf32>
    %cst_62 = arith.constant dense<0.000000e+00> : vector<256x64xf32>
    %78 = tpu.matmul %75, %77, %cst_62 {dimension_numbers = #tpu.dot_dimension_numbers<[1], [0], [0], [1], [0, 0, 1, 1], [], []>} : vector<256x96xf32>, vector<96x64xf32>, vector<256x64xf32> -> vector<256x64xf32>
    %79 = vector.extract_strided_slice %73 {offsets = [1, 0, 0], sizes = [16, 16, 96], strides = [1, 1, 1]} : vector<18x16x96xf32> to vector<16x16x96xf32>
    %80 = vector.shape_cast %79 : vector<16x16x96xf32> to vector<256x96xf32>
    %c1_63 = arith.constant 1 : index
    %c0_64 = arith.constant 0 : index
    %c0_65 = arith.constant 0 : index
    %81 = vector.load %arg4[%c1_63, %c0_64, %c0_65] : memref<3x96x64xf32, #tpu.memory_space<vmem>>, vector<1x96x64xf32>
    %82 = vector.shape_cast %81 : vector<1x96x64xf32> to vector<96x64xf32>
    %cst_66 = arith.constant dense<0.000000e+00> : vector<256x64xf32>
    %83 = tpu.matmul %80, %82, %cst_66 {dimension_numbers = #tpu.dot_dimension_numbers<[1], [0], [0], [1], [0, 0, 1, 1], [], []>} : vector<256x96xf32>, vector<96x64xf32>, vector<256x64xf32> -> vector<256x64xf32>
    %84 = arith.addf %78, %83 : vector<256x64xf32>
    %85 = vector.extract_strided_slice %73 {offsets = [2, 0, 0], sizes = [16, 16, 96], strides = [1, 1, 1]} : vector<18x16x96xf32> to vector<16x16x96xf32>
    %86 = vector.shape_cast %85 : vector<16x16x96xf32> to vector<256x96xf32>
    %c2 = arith.constant 2 : index
    %c0_67 = arith.constant 0 : index
    %c0_68 = arith.constant 0 : index
    %87 = vector.load %arg4[%c2, %c0_67, %c0_68] : memref<3x96x64xf32, #tpu.memory_space<vmem>>, vector<1x96x64xf32>
    %88 = vector.shape_cast %87 : vector<1x96x64xf32> to vector<96x64xf32>
    %cst_69 = arith.constant dense<0.000000e+00> : vector<256x64xf32>
    %89 = tpu.matmul %86, %88, %cst_69 {dimension_numbers = #tpu.dot_dimension_numbers<[1], [0], [0], [1], [0, 0, 1, 1], [], []>} : vector<256x96xf32>, vector<96x64xf32>, vector<256x64xf32> -> vector<256x64xf32>
    %90 = arith.addf %84, %89 : vector<256x64xf32>
    %c0_70 = arith.constant 0 : index
    %c0_71 = arith.constant 0 : index
    %91 = vector.load %arg5[%c0_70, %c0_71] : memref<1x64xf32, #tpu.memory_space<vmem>>, vector<1x64xf32>
    %92 = vector.broadcast %91 : vector<1x64xf32> to vector<256x64xf32>
    %93 = arith.addf %90, %92 : vector<256x64xf32>
    %cst_72 = arith.constant 0.000000e+00 : f32
    %94 = vector.broadcast %cst_72 : f32 to vector<256x64xf32>
    %95 = arith.maximumf %93, %94 : vector<256x64xf32>
    %96 = vector.shape_cast %95 : vector<256x64xf32> to vector<8x2x16x64xf32>
    %97 = vector.extract_strided_slice %96 {offsets = [0, 0, 0, 0], sizes = [8, 1, 16, 64], strides = [1, 1, 1, 1]} : vector<8x2x16x64xf32> to vector<8x1x16x64xf32>
    %98 = vector.shape_cast %97 : vector<8x1x16x64xf32> to vector<8x16x64xf32>
    %99 = vector.extract_strided_slice %96 {offsets = [0, 1, 0, 0], sizes = [8, 1, 16, 64], strides = [1, 1, 1, 1]} : vector<8x2x16x64xf32> to vector<8x1x16x64xf32>
    %100 = vector.shape_cast %99 : vector<8x1x16x64xf32> to vector<8x16x64xf32>
    %101 = arith.maximumf %98, %100 : vector<8x16x64xf32>
    %c0_73 = arith.constant 0 : index
    %c0_74 = arith.constant 0 : index
    %c0_75 = arith.constant 0 : index
    %102 = vector.load %arg12[%c0_73, %c0_74, %c0_75] : memref<8x16x64xf32, #tpu.memory_space<vmem>>, vector<8x16x64xf32>
    tpu.vector_store %arg12[%c0_73, %c0_74, %c0_75], %101 {strides = array<i32>} : memref<8x16x64xf32, #tpu.memory_space<vmem>>, vector<8x16x64xf32>,
    %cst_76 = arith.constant 0.000000e+00 : f32
    %103 = vector.broadcast %cst_76 : f32 to vector<10x24x64xf32>
    %c0_77 = arith.constant 0 : index
    %c0_78 = arith.constant 0 : index
    %c0_79 = arith.constant 0 : index
    %104 = vector.load %arg10[%c0_77, %c0_78, %c0_79] : memref<10x24x64xf32, #tpu.memory_space<vmem>>, vector<10x24x64xf32>
    tpu.vector_store %arg10[%c0_77, %c0_78, %c0_79], %103 {strides = array<i32>} : memref<10x24x64xf32, #tpu.memory_space<vmem>>, vector<10x24x64xf32>,
    %c0_80 = arith.constant 0 : index
    %c0_81 = arith.constant 0 : index
    %c0_82 = arith.constant 0 : index
    %105 = tpu.strided_load %arg12[%c0_80, %c0_81, %c0_82] {strides = array<i32: 1, 2, 1>} : memref<8x16x64xf32, #tpu.memory_space<vmem>>, vector<8x8x64xf32>
    %c0_83 = arith.constant 0 : index
    %c1_84 = arith.constant 1 : index
    %c0_85 = arith.constant 0 : index
    %106 = tpu.strided_load %arg12[%c0_83, %c1_84, %c0_85] {strides = array<i32: 1, 2, 1>} : memref<8x16x64xf32, #tpu.memory_space<vmem>>, vector<8x8x64xf32>
    %107 = arith.maximumf %105, %106 : vector<8x8x64xf32>
    %c1_86 = arith.constant 1 : index
    %c8_87 = arith.constant 8 : index
    %c0_88 = arith.constant 0 : index
    %108 = vector.load %arg10[%c1_86, %c8_87, %c0_88] : memref<10x24x64xf32, #tpu.memory_space<vmem>>, vector<8x8x64xf32>
    tpu.vector_store %arg10[%c1_86, %c8_87, %c0_88], %107 {strides = array<i32>} : memref<10x24x64xf32, #tpu.memory_space<vmem>>, vector<8x8x64xf32>,
    %c0_89 = arith.constant 0 : index
    %c7_90 = arith.constant 7 : index
    %c0_91 = arith.constant 0 : index
    %109 = vector.load %arg10[%c0_89, %c7_90, %c0_91] : memref<10x24x64xf32, #tpu.memory_space<vmem>>, vector<10x8x64xf32>
    %c0_92 = arith.constant 0 : index
    %c8_93 = arith.constant 8 : index
    %c0_94 = arith.constant 0 : index
    %110 = vector.load %arg10[%c0_92, %c8_93, %c0_94] : memref<10x24x64xf32, #tpu.memory_space<vmem>>, vector<10x8x64xf32>
    %c0_95 = arith.constant 0 : index
    %c9_96 = arith.constant 9 : index
    %c0_97 = arith.constant 0 : index
    %111 = vector.load %arg10[%c0_95, %c9_96, %c0_97] : memref<10x24x64xf32, #tpu.memory_space<vmem>>, vector<10x8x64xf32>
    %112 = tpu.concatenate %109, %110, %111 in 2 : vector<10x8x64xf32>, vector<10x8x64xf32>, vector<10x8x64xf32> -> vector<10x8x192xf32>
    %113 = vector.extract_strided_slice %112 {offsets = [0, 0, 0], sizes = [8, 8, 192], strides = [1, 1, 1]} : vector<10x8x192xf32> to vector<8x8x192xf32>
    %114 = vector.shape_cast %113 : vector<8x8x192xf32> to vector<64x192xf32>
    %c0_98 = arith.constant 0 : index
    %c0_99 = arith.constant 0 : index
    %c0_100 = arith.constant 0 : index
    %115 = vector.load %arg6[%c0_98, %c0_99, %c0_100] : memref<3x192x128xf32, #tpu.memory_space<vmem>>, vector<1x192x128xf32>
    %116 = vector.shape_cast %115 : vector<1x192x128xf32> to vector<192x128xf32>
    %cst_101 = arith.constant dense<0.000000e+00> : vector<64x128xf32>
    %117 = tpu.matmul %114, %116, %cst_101 {dimension_numbers = #tpu.dot_dimension_numbers<[1], [0], [0], [1], [0, 0, 1, 1], [], []>} : vector<64x192xf32>, vector<192x128xf32>, vector<64x128xf32> -> vector<64x128xf32>
    %118 = vector.extract_strided_slice %112 {offsets = [1, 0, 0], sizes = [8, 8, 192], strides = [1, 1, 1]} : vector<10x8x192xf32> to vector<8x8x192xf32>
    %119 = vector.shape_cast %118 : vector<8x8x192xf32> to vector<64x192xf32>
    %c1_102 = arith.constant 1 : index
    %c0_103 = arith.constant 0 : index
    %c0_104 = arith.constant 0 : index
    %120 = vector.load %arg6[%c1_102, %c0_103, %c0_104] : memref<3x192x128xf32, #tpu.memory_space<vmem>>, vector<1x192x128xf32>
    %121 = vector.shape_cast %120 : vector<1x192x128xf32> to vector<192x128xf32>
    %cst_105 = arith.constant dense<0.000000e+00> : vector<64x128xf32>
    %122 = tpu.matmul %119, %121, %cst_105 {dimension_numbers = #tpu.dot_dimension_numbers<[1], [0], [0], [1], [0, 0, 1, 1], [], []>} : vector<64x192xf32>, vector<192x128xf32>, vector<64x128xf32> -> vector<64x128xf32>
    %123 = arith.addf %117, %122 : vector<64x128xf32>
    %124 = vector.extract_strided_slice %112 {offsets = [2, 0, 0], sizes = [8, 8, 192], strides = [1, 1, 1]} : vector<10x8x192xf32> to vector<8x8x192xf32>
    %125 = vector.shape_cast %124 : vector<8x8x192xf32> to vector<64x192xf32>
    %c2_106 = arith.constant 2 : index
    %c0_107 = arith.constant 0 : index
    %c0_108 = arith.constant 0 : index
    %126 = vector.load %arg6[%c2_106, %c0_107, %c0_108] : memref<3x192x128xf32, #tpu.memory_space<vmem>>, vector<1x192x128xf32>
    %127 = vector.shape_cast %126 : vector<1x192x128xf32> to vector<192x128xf32>
    %cst_109 = arith.constant dense<0.000000e+00> : vector<64x128xf32>
    %128 = tpu.matmul %125, %127, %cst_109 {dimension_numbers = #tpu.dot_dimension_numbers<[1], [0], [0], [1], [0, 0, 1, 1], [], []>} : vector<64x192xf32>, vector<192x128xf32>, vector<64x128xf32> -> vector<64x128xf32>
    %129 = arith.addf %123, %128 : vector<64x128xf32>
    %c0_110 = arith.constant 0 : index
    %c0_111 = arith.constant 0 : index
    %130 = vector.load %arg7[%c0_110, %c0_111] : memref<1x128xf32, #tpu.memory_space<vmem>>, vector<1x128xf32>
    %131 = vector.broadcast %130 : vector<1x128xf32> to vector<64x128xf32>
    %132 = arith.addf %129, %131 : vector<64x128xf32>
    %cst_112 = arith.constant 0.000000e+00 : f32
    %133 = vector.broadcast %cst_112 : f32 to vector<64x128xf32>
    %134 = arith.maximumf %132, %133 : vector<64x128xf32>
    %135 = vector.shape_cast %134 : vector<64x128xf32> to vector<4x2x8x128xf32>
    %136 = vector.extract_strided_slice %135 {offsets = [0, 0, 0, 0], sizes = [4, 1, 8, 128], strides = [1, 1, 1, 1]} : vector<4x2x8x128xf32> to vector<4x1x8x128xf32>
    %137 = vector.shape_cast %136 : vector<4x1x8x128xf32> to vector<4x8x128xf32>
    %138 = vector.extract_strided_slice %135 {offsets = [0, 1, 0, 0], sizes = [4, 1, 8, 128], strides = [1, 1, 1, 1]} : vector<4x2x8x128xf32> to vector<4x1x8x128xf32>
    %139 = vector.shape_cast %138 : vector<4x1x8x128xf32> to vector<4x8x128xf32>
    %140 = arith.maximumf %137, %139 : vector<4x8x128xf32>
    %c0_113 = arith.constant 0 : index
    %c0_114 = arith.constant 0 : index
    %c0_115 = arith.constant 0 : index
    %141 = vector.load %arg13[%c0_113, %c0_114, %c0_115] : memref<4x8x128xf32, #tpu.memory_space<vmem>>, vector<4x8x128xf32>
    tpu.vector_store %arg13[%c0_113, %c0_114, %c0_115], %140 {strides = array<i32>} : memref<4x8x128xf32, #tpu.memory_space<vmem>>, vector<4x8x128xf32>,
    %c0_116 = arith.constant 0 : index
    %c0_117 = arith.constant 0 : index
    %c0_118 = arith.constant 0 : index
    %142 = tpu.strided_load %arg13[%c0_116, %c0_117, %c0_118] {strides = array<i32: 1, 2, 1>} : memref<4x8x128xf32, #tpu.memory_space<vmem>>, vector<4x4x128xf32>
    %c0_119 = arith.constant 0 : index
    %c1_120 = arith.constant 1 : index
    %c0_121 = arith.constant 0 : index
    %143 = tpu.strided_load %arg13[%c0_119, %c1_120, %c0_121] {strides = array<i32: 1, 2, 1>} : memref<4x8x128xf32, #tpu.memory_space<vmem>>, vector<4x4x128xf32>
    %144 = arith.maximumf %142, %143 : vector<4x4x128xf32>
    %c0_122 = arith.constant 0 : index
    %c0_123 = arith.constant 0 : index
    %c0_124 = arith.constant 0 : index
    %c0_125 = arith.constant 0 : index
    %145 = vector.load %arg8[%c0_122, %c0_123, %c0_124, %c0_125] : memref<1x4x4x128xf32, #tpu.memory_space<vmem>>, vector<1x4x4x128xf32>
    %146 = vector.shape_cast %145 : vector<1x4x4x128xf32> to vector<4x4x128xf32>
    %147 = vector.shape_cast %144 : vector<4x4x128xf32> to vector<1x4x4x128xf32>
    tpu.vector_store %arg8[%c0_122, %c0_123, %c0_124, %c0_125], %147 {strides = array<i32>} : memref<1x4x4x128xf32, #tpu.memory_space<vmem>>, vector<1x4x4x128xf32>,
    return
  }
  func.func @transform_0(%arg0: i32) -> (i32, i32, i32) {
    %c0_i32 = arith.constant 0 : i32
    %c0_i32_0 = arith.constant 0 : i32
    %c0_i32_1 = arith.constant 0 : i32
    return %arg0, %c0_i32, %c0_i32_0 : i32, i32, i32
  }
  func.func @transform_1(%arg0: i32) -> (i32, i32) {
    %c0_i32 = arith.constant 0 : i32
    %c0_i32_0 = arith.constant 0 : i32
    %c0_i32_1 = arith.constant 0 : i32
    return %c0_i32, %c0_i32_0 : i32, i32
  }
  func.func @transform_2(%arg0: i32) -> (i32, i32) {
    %c0_i32 = arith.constant 0 : i32
    %c0_i32_0 = arith.constant 0 : i32
    %c0_i32_1 = arith.constant 0 : i32
    return %c0_i32, %c0_i32_0 : i32, i32
  }
  func.func @transform_3(%arg0: i32) -> (i32, i32, i32) {
    %c0_i32 = arith.constant 0 : i32
    %c0_i32_0 = arith.constant 0 : i32
    %c0_i32_1 = arith.constant 0 : i32
    %c0_i32_2 = arith.constant 0 : i32
    return %c0_i32, %c0_i32_0, %c0_i32_1 : i32, i32, i32
  }
  func.func @transform_4(%arg0: i32) -> (i32, i32) {
    %c0_i32 = arith.constant 0 : i32
    %c0_i32_0 = arith.constant 0 : i32
    %c0_i32_1 = arith.constant 0 : i32
    return %c0_i32, %c0_i32_0 : i32, i32
  }
  func.func @transform_5(%arg0: i32) -> (i32, i32, i32) {
    %c0_i32 = arith.constant 0 : i32
    %c0_i32_0 = arith.constant 0 : i32
    %c0_i32_1 = arith.constant 0 : i32
    %c0_i32_2 = arith.constant 0 : i32
    return %c0_i32, %c0_i32_0, %c0_i32_1 : i32, i32, i32
  }
  func.func @transform_6(%arg0: i32) -> (i32, i32) {
    %c0_i32 = arith.constant 0 : i32
    %c0_i32_0 = arith.constant 0 : i32
    %c0_i32_1 = arith.constant 0 : i32
    return %c0_i32, %c0_i32_0 : i32, i32
  }
  func.func @transform_7(%arg0: i32) -> (i32, i32, i32, i32) {
    %c0_i32 = arith.constant 0 : i32
    %c0_i32_0 = arith.constant 0 : i32
    %c0_i32_1 = arith.constant 0 : i32
    %c0_i32_2 = arith.constant 0 : i32
    return %arg0, %c0_i32, %c0_i32_0, %c0_i32_1 : i32, i32, i32, i32
  }
}

</mosaic_0001>

<bundles_post_ra>
// kernel: cnn_backbone.1
= control target key start
LH: loop header
LB: loop body
LE: loop exit
PB: predicated region body
PF: predicated region fallthrough
CT: control target
= control target key end

     0   :  { %s5757_s24 = smov 0   ;;  %s7579_s0 = inlined_call_operand.vmem [shape: f32[2,1024,9], index: 0, kind: input, shape index: {}]   ;;  %s7580_s1 = inlined_call_operand.vmem [shape: f32[9,32], index: 1, kind: input, shape index: {}]   ;;  %s7581_s2 = inlined_call_operand.vmem [shape: f32[1,32], index: 2, kind: input, shape index: {}]   ;;  %s7582_s3 = inlined_call_operand.vmem [shape: f32[3,96,64], index: 3, kind: input, shape index: {}]   ;;  %s7583_s4 = inlined_call_operand.vmem [shape: f32[1,64], index: 4, kind: input, shape index: {}]   ;;  %s7584_s5 = inlined_call_operand.vmem [shape: f32[3,192,128], index: 5, kind: input, shape index: {}]   ;;  %s7585_s6 = inlined_call_operand.vmem [shape: f32[1,128], index: 6, kind: input, shape index: {}]   ;;  %s7586_s7 = inlined_call_operand.vmem [shape: f32[2,4,4,128], index: 7, kind: output, shape index: {}]  }
   0x1 LB: > { %s4385_s25 = sadd.s32 4294967295, %s5710_s24   ;;  %p4389_p0 = scmp.ge.s32.totalorder %s5710_s24, 1  ;;  %s5710_s24 = sphi %s5757_s24, %s17_s24  }
   0x2   : > { %p237_p1 = scmp.lt.s32.totalorder %s5710_s24, 3 }
   0x4   : > { %p238_p2 = pnand %p4389_p0, %p237_p1 }
   0x5   : > { %v311_v0 = vld [vmem:[%s7580_s1] sm:$0xff] (!%p238_p2)  ;;  %v312_v1 = vld [vmem:[%s7580_s1 + $0x8] sm:$0x1] (!%p238_p2)  ;;  %vm417_vm0 = vcmask (!%p238_p2), 1040384   ;;  %p269_p3 = scmp.lt.s32.totalorder (!%p238_p2), %s4385_s25, 1  ;;  %vm5712_vm1 = vmmov (!%p238_p2), 1  }
   0x6   : > { %241 = sbr.rel (%p238_p2) target bundleno = 1325 (0x52d), region = 48  ;;  %v5420_v2 = vpack.c.bf16 (!%p238_p2), %v312_v1, %v311_v0  ;;  %vm5771_vm2 = vmpackc.low (!%p238_p2), %vm417_vm0, %vm5712_vm1  ;;  %v744_v4 = vld [vmem:[%s7580_s1 + $0x8] sm:$0x1] (!%p238_p2)  ;;  %vm320_vm3 = vcmask (!%p238_p2), 72704   ;;  %vm694_vm4 = vcmask (!%p238_p2), 261120   ;;  %s5714_s17 = smov (!%p238_p2), 32  }
   0x7   : > { %v1174_v5 = vld [vmem:[%s7580_s1 + $0x8] sm:$0x1] (!%p238_p2)  ;;  %v5426_v6 = vpack.c.bf16 (!%p238_p2), %v744_v4, %v311_v0  ;;  %vm2697_vm5 = vcmask (!%p238_p2), 523264   ;;  %s5715_s26 = smov (!%p238_p2), 64   ;;  %vm2759_vm6 = vcmask (!%p238_p2), 785408  }
   0x8   : > { %v5432_v7 = vpack.c.bf16 (!%p238_p2), %v1174_v5, %v311_v0  ;;  %5624 = vmatprep.subr.msk.bf16.mxu1 (!%p238_p2), %vm5771_vm2, %v5420_v2  ;;  %5422 = vmatprep.subr.msk.bf16.mxu0 (!%p238_p2), %vm5771_vm2, %v5420_v2  ;;  %v1604_v8 = vld [vmem:[%s7580_s1 + $0x8] sm:$0x1] (!%p238_p2) }
   0x9   : > { %5625 = vmatpush3.bf16.msk.msra.mxu1 (!%p238_p2), %vm5771_vm2, %v5420_v2  ;;  %5425 = vmatpush3.bf16.msk.msra.mxu0 (!%p238_p2), %vm5771_vm2, %v5420_v2  ;;  %v5812_v15 = vpack.c.bf16 (!%p238_p2), %v1604_v8, %v311_v0 }
   0xa   : > { %5428 = vmatprep.subr.msk.bf16.mxu1 (!%p238_p2), %vm5771_vm2, %v5426_v6  ;;  %5434 = vmatprep.subr.msk.bf16.mxu0 (!%p238_p2), %vm5771_vm2, %v5432_v7 }
   0xd   : > { %s7590_s25 = smov (!%p269_p3, %s4385_s25), 1 }
   0xe   : > { %s4726_s11 = sshll.u32 %s7590_s25, 10  ;;  %s4727_s20 = sshll.u32 %s7590_s25, 4 }
   0xf   : > { %s5798_s16 = scalar_lea.vmem %s7579_s0, %s4726_s11  ;;  %s7570_s23 = scalar_lea.vmem %s7586_s7, %s4727_s20 }
  0x10   : > { %v279_v9 = vld [vmem:[%s5798_s16] sm:$0xff]  ;;  %v280_v11 = vld [vmem:[%s5798_s16 + $0x8] sm:$0xff]  ;;  %v281_v13 = vld [vmem:[%s5798_s16 + $0x10] sm:$0xff] }
  0x11   : > { %v295_v10 = vld [vmem:[%s5798_s16 + $0x80] sm:$0xff]  ;;  %5000 = vmatprep.mubr.msk.f32.mxu0 %vm320_vm3, %v279_v9  ;;  %v296_v12 = vld [vmem:[%s5798_s16 + $0x88] sm:$0xff]  ;;  %v297_v14 = vld [vmem:[%s5798_s16 + $0x90] sm:$0xff] }
  0x12   : > { %5024 = vmatprep.mubr.msk.f32.mxu1 %vm320_vm3, %v295_v10  ;;  %5001 = vmatmul.mubr.msk.f32.vlgmr.msra.gmra.mrb[0].mxu0 %vm320_vm3, %v280_v11  ;;  %v282_v16 = vld [vmem:[%s5798_s16 + $0x18] sm:$0xff]  ;;  %v283_v18 = vld [vmem:[%s5798_s16 + $0x20] sm:$0xff]  ;;  %v284_v20 = vld [vmem:[%s5798_s16 + $0x28] sm:$0xff] }
  0x13   : > { %5025 = vmatmul.mubr.msk.f32.vlgmr.msra.gmra.mrb[0].mxu1 %vm320_vm3, %v296_v12  ;;  %5003 = vmatprep.mubr.msk.f32.mxu0 %vm320_vm3, %v281_v13  ;;  %v298_v17 = vld [vmem:[%s5798_s16 + $0x98] sm:$0xff]  ;;  %v299_v19 = vld [vmem:[%s5798_s16 + $0xa0] sm:$0xff]  ;;  %v300_v21 = vld [vmem:[%s5798_s16 + $0xa8] sm:$0xff] }
  0x14   : > { %5431 = vmatpush3.bf16.msk.msra.mxu1 %vm5771_vm2, %v5426_v6  ;;  %5027 = vmatprep.mubr.msk.f32.mxu1 %vm320_vm3, %v297_v14  ;;  %v285_v22 = vld [vmem:[%s5798_s16 + $0x30] sm:$0xff]  ;;  %v286_v24 = vld [vmem:[%s5798_s16 + $0x38] sm:$0xff]  ;;  %v287_v26 = vld [vmem:[%s5798_s16 + $0x40] sm:$0xff] }
  0x15   : > { %5437 = vmatpush3.bf16.msk.msra.mxu0 %vm5771_vm2, %v5432_v7  ;;  %5440 = vmatprep.subr.msk.bf16.mxu1 %vm5771_vm2, %v5812_v15  ;;  %v301_v23 = vld [vmem:[%s5798_s16 + $0xb0] sm:$0xff]  ;;  %v302_v25 = vld [vmem:[%s5798_s16 + $0xb8] sm:$0xff]  ;;  %v303_v27 = vld [vmem:[%s5798_s16 + $0xc0] sm:$0xff] }
  0x16   : > { %5004 = vmatmul.mubr.msk.f32.gmra.mrb[2].mxu0 %vm320_vm3, %v282_v16  ;;  %v288_v28 = vld [vmem:[%s5798_s16 + $0x48] sm:$0xff]  ;;  %v289_v30 = vld [vmem:[%s5798_s16 + $0x50] sm:$0xff]  ;;  %v290_v32 = vld [vmem:[%s5798_s16 + $0x58] sm:$0xff] }
  0x17   : > { %5028 = vmatmul.mubr.msk.f32.gmra.mrb[2].mxu1 %vm320_vm3, %v298_v17  ;;  %5006 = vmatprep.mubr.msk.f32.mxu0 %vm320_vm3, %v283_v18  ;;  %v304_v29 = vld [vmem:[%s5798_s16 + $0xc8] sm:$0xff]  ;;  %v305_v31 = vld [vmem:[%s5798_s16 + $0xd0] sm:$0xff]  ;;  %v306_v33 = vld [vmem:[%s5798_s16 + $0xd8] sm:$0xff] }
  0x18   : > { %5030 = vmatprep.mubr.msk.f32.mxu1 %vm320_vm3, %v299_v19  ;;  %v291_v34 = vld [vmem:[%s5798_s16 + $0x60] sm:$0xff]  ;;  %v292_v36 = vld [vmem:[%s5798_s16 + $0x68] sm:$0xff]  ;;  %v293_v38 = vld [vmem:[%s5798_s16 + $0x70] sm:$0xff] }
  0x19   : > { %v307_v35 = vld [vmem:[%s5798_s16 + $0xe0] sm:$0xff]  ;;  %v308_v37 = vld [vmem:[%s5798_s16 + $0xe8] sm:$0xff]  ;;  %v309_v39 = vld [vmem:[%s5798_s16 + $0xf0] sm:$0xff] }
  0x1a   : > { %5007 = vmatmul.mubr.msk.f32.gmra.mrb[4].mxu0 %vm320_vm3, %v284_v20  ;;  %v294_v40 = vld [vmem:[%s5798_s16 + $0x78] sm:$0xff]  ;;  %v711_v42 = vld [vmem:[%s5798_s16 + $0x100] sm:$0xff]  ;;  %v712_v44 = vld [vmem:[%s5798_s16 + $0x108] sm:$0xff] }
  0x1b   : > { %5031 = vmatmul.mubr.msk.f32.gmra.mrb[4].mxu1 %vm320_vm3, %v300_v21  ;;  %5009 = vmatprep.mubr.msk.f32.mxu0 %vm320_vm3, %v285_v22  ;;  %v310_v41 = vld [vmem:[%s5798_s16 + $0xf8] sm:$0xff]  ;;  %v1141_v43 = vld [vmem:[%s5798_s16 + $0x200] sm:$0xff]  ;;  %v1142_v45 = vld [vmem:[%s5798_s16 + $0x208] sm:$0xff] }
  0x1c   : > { %5033 = vmatprep.mubr.msk.f32.mxu1 %vm320_vm3, %v301_v23  ;;  %v713_v46 = vld [vmem:[%s5798_s16 + $0x110] sm:$0xff]  ;;  %v714_v48 = vld [vmem:[%s5798_s16 + $0x118] sm:$0xff]  ;;  %v715_v50 = vld [vmem:[%s5798_s16 + $0x120] sm:$0xff] }
  0x1d   : > { %v1143_v47 = vld [vmem:[%s5798_s16 + $0x210] sm:$0xff]  ;;  %v1144_v49 = vld [vmem:[%s5798_s16 + $0x218] sm:$0xff]  ;;  %v1145_v51 = vld [vmem:[%s5798_s16 + $0x220] sm:$0xff] }
  0x1e   : > { %5010 = vmatmul.mubr.msk.f32.gmra.mrb[6].mxu0 %vm320_vm3, %v286_v24  ;;  %v716_v52 = vld [vmem:[%s5798_s16 + $0x128] sm:$0xff]  ;;  %v717_v54 = vld [vmem:[%s5798_s16 + $0x130] sm:$0xff]  ;;  %v718_v56 = vld [vmem:[%s5798_s16 + $0x138] sm:$0xff] }
  0x1f   : > { %5034 = vmatmul.mubr.msk.f32.gmra.mrb[6].mxu1 %vm320_vm3, %v302_v25  ;;  %5012 = vmatprep.mubr.msk.f32.mxu0 %vm320_vm3, %v287_v26  ;;  %v1146_v53 = vld [vmem:[%s5798_s16 + $0x228] sm:$0xff]  ;;  %v1147_v55 = vld [vmem:[%s5798_s16 + $0x230] sm:$0xff]  ;;  %v1148_v57 = vld [vmem:[%s5798_s16 + $0x238] sm:$0xff] }
  0x20   : > { %5036 = vmatprep.mubr.msk.f32.mxu1 %vm320_vm3, %v303_v27  ;;  %v719_v58 = vld [vmem:[%s5798_s16 + $0x140] sm:$0xff]  ;;  %v720_v60 = vld [vmem:[%s5798_s16 + $0x148] sm:$0xff]  ;;  %v721_v62 = vld [vmem:[%s5798_s16 + $0x150] sm:$0xff] }
  0x21   : > { %v1149_v59 = vld [vmem:[%s5798_s16 + $0x240] sm:$0xff]  ;;  %v1150_v61 = vld [vmem:[%s5798_s16 + $0x248] sm:$0xff]  ;;  %v1151_v63 = vld [vmem:[%s5798_s16 + $0x250] sm:$0xff] }
  0x22   : > { %5013 = vmatmul.mubr.msk.f32.gmra.mrb[8].mxu0 %vm320_vm3, %v288_v28  ;;  %v722_v0 = vld [vmem:[%s5798_s16 + $0x158] sm:$0xff]  ;;  %v723_v2 = vld [vmem:[%s5798_s16 + $0x160] sm:$0xff]  ;;  %v724_v4 = vld [vmem:[%s5798_s16 + $0x168] sm:$0xff] }
  0x23   : > { %5037 = vmatmul.mubr.msk.f32.gmra.mrb[8].mxu1 %vm320_vm3, %v304_v29  ;;  %5015 = vmatprep.mubr.msk.f32.mxu0 %vm320_vm3, %v289_v30  ;;  %v1152_v1 = vld [vmem:[%s5798_s16 + $0x258] sm:$0xff]  ;;  %v1153_v3 = vld [vmem:[%s5798_s16 + $0x260] sm:$0xff]  ;;  %v1154_v5 = vld [vmem:[%s5798_s16 + $0x268] sm:$0xff] }
  0x24   : > { %5039 = vmatprep.mubr.msk.f32.mxu1 %vm320_vm3, %v305_v31  ;;  %v725_v6 = vld [vmem:[%s5798_s16 + $0x170] sm:$0xff]  ;;  %v726_v8 = vld [vmem:[%s5798_s16 + $0x178] sm:$0xff]  ;;  %v727_v10 = vld [vmem:[%s5798_s16 + $0x180] sm:$0xff] }
  0x25   : > { %v1155_v7 = vld [vmem:[%s5798_s16 + $0x270] sm:$0xff]  ;;  %v1156_v9 = vld [vmem:[%s5798_s16 + $0x278] sm:$0xff]  ;;  %v1157_v11 = vld [vmem:[%s5798_s16 + $0x280] sm:$0xff] }
  0x26   : > { %5016 = vmatmul.mubr.msk.f32.gmra.mrb[10].mxu0 %vm320_vm3, %v290_v32  ;;  %v728_v12 = vld [vmem:[%s5798_s16 + $0x188] sm:$0xff]  ;;  %v729_v14 = vld [vmem:[%s5798_s16 + $0x190] sm:$0xff]  ;;  %v730_v16 = vld [vmem:[%s5798_s16 + $0x198] sm:$0xff] }
  0x27   : > { %5040 = vmatmul.mubr.msk.f32.gmra.mrb[10].mxu1 %vm320_vm3, %v306_v33  ;;  %5018 = vmatprep.mubr.msk.f32.mxu0 %vm320_vm3, %v291_v34  ;;  %v1158_v13 = vld [vmem:[%s5798_s16 + $0x288] sm:$0xff]  ;;  %v1160_v17 = vld [vmem:[%s5798_s16 + $0x298] sm:$0xff]  ;;  %v731_v18 = vld [vmem:[%s5798_s16 + $0x1a0] sm:$0xff] }
  0x28   : > { %5042 = vmatprep.mubr.msk.f32.mxu1 %vm320_vm3, %v307_v35  ;;  %v1161_v19 = vld [vmem:[%s5798_s16 + $0x2a0] sm:$0xff]  ;;  %v732_v20 = vld [vmem:[%s5798_s16 + $0x1a8] sm:$0xff]  ;;  %v733_v22 = vld [vmem:[%s5798_s16 + $0x1b0] sm:$0xff] }
  0x29   : > { %v1162_v21 = vld [vmem:[%s5798_s16 + $0x2a8] sm:$0xff]  ;;  %v1163_v23 = vld [vmem:[%s5798_s16 + $0x2b0] sm:$0xff]  ;;  %v734_v24 = vld [vmem:[%s5798_s16 + $0x1b8] sm:$0xff] }
  0x2a   : > { %5019 = vmatmul.mubr.msk.f32.gmra.mrb[12].mxu0 %vm320_vm3, %v292_v36  ;;  %v1164_v25 = vld [vmem:[%s5798_s16 + $0x2b8] sm:$0xff]  ;;  %v735_v26 = vld [vmem:[%s5798_s16 + $0x1c0] sm:$0xff]  ;;  %v736_v28 = vld [vmem:[%s5798_s16 + $0x1c8] sm:$0xff] }
  0x2b   : > { %5043 = vmatmul.mubr.msk.f32.gmra.mrb[12].mxu1 %vm320_vm3, %v308_v37  ;;  %5021 = vmatprep.mubr.msk.f32.mxu0 %vm320_vm3, %v293_v38  ;;  %v1165_v27 = vld [vmem:[%s5798_s16 + $0x2c0] sm:$0xff]  ;;  %v1166_v29 = vld [vmem:[%s5798_s16 + $0x2c8] sm:$0xff]  ;;  %v737_v30 = vld [vmem:[%s5798_s16 + $0x1d0] sm:$0xff] }
  0x2c   : > { %5045 = vmatprep.mubr.msk.f32.mxu1 %vm320_vm3, %v309_v39  ;;  %v1167_v31 = vld [vmem:[%s5798_s16 + $0x2d0] sm:$0xff]  ;;  %v738_v32 = vld [vmem:[%s5798_s16 + $0x1d8] sm:$0xff]  ;;  %v739_v34 = vld [vmem:[%s5798_s16 + $0x1e0] sm:$0xff] }
  0x2d   : > { %v1168_v33 = vld [vmem:[%s5798_s16 + $0x2d8] sm:$0xff]  ;;  %v1169_v35 = vld [vmem:[%s5798_s16 + $0x2e0] sm:$0xff]  ;;  %v740_v36 = vld [vmem:[%s5798_s16 + $0x1e8] sm:$0xff] }
  0x2e   : > { %5022 = vmatmul.mubr.msk.f32.gmra.mrb[14].mxu0 %vm320_vm3, %v294_v40  ;;  %v1170_v37 = vld [vmem:[%s5798_s16 + $0x2e8] sm:$0xff]  ;;  %v741_v38 = vld [vmem:[%s5798_s16 + $0x1f0] sm:$0xff]  ;;  %v742_v40 = vld [vmem:[%s5798_s16 + $0x1f8] sm:$0xff] }
  0x2f   : > { %5046 = vmatmul.mubr.msk.f32.gmra.mrb[14].mxu1 %vm320_vm3, %v310_v41  ;;  %5104 = vmatprep.mubr.msk.f32.mxu0 %vm320_vm3, %v1141_v43  ;;  %v1171_v39 = vld [vmem:[%s5798_s16 + $0x2f0] sm:$0xff]  ;;  %v1172_v41 = vld [vmem:[%s5798_s16 + $0x2f8] sm:$0xff]  ;;  %v1572_v43 = vld [vmem:[%s5798_s16 + $0x308] sm:$0xff] }
  0x30   : > { %5052 = vmatprep.mubr.msk.f32.mxu1 %vm320_vm3, %v711_v42  ;;  %v1571_v42 = vld [vmem:[%s5798_s16 + $0x300] sm:$0xff] }
  0x32   : > { %5105 = vmatmul.mubr.msk.f32.vlgmr.msra.gmra.mrb[16].mxu0 %vm320_vm3, %v1142_v45  ;;  %v1574_v45 = vld [vmem:[%s5798_s16 + $0x318] sm:$0xff] }
  0x33   : > { %5053 = vmatmul.mubr.msk.f32.vlgmr.msra.gmra.mrb[16].mxu1 %vm320_vm3, %v712_v44  ;;  %5107 = vmatprep.mubr.msk.f32.mxu0 %vm320_vm3, %v1143_v47  ;;  %v1573_v44 = vld [vmem:[%s5798_s16 + $0x310] sm:$0xff]  ;;  %v1576_v47 = vld [vmem:[%s5798_s16 + $0x328] sm:$0xff] }
  0x34   : > { %5443 = vmatpush3.bf16.msk.msra.mxu1 %vm5771_vm2, %v5812_v15  ;;  %5055 = vmatprep.mubr.msk.f32.mxu1 %vm320_vm3, %v713_v46  ;;  %v1159_v15 = vld [vmem:[%s5798_s16 + $0x290] sm:$0xff]  ;;  %v1575_v46 = vld [vmem:[%s5798_s16 + $0x320] sm:$0xff] }
  0x36   : > { %5108 = vmatmul.mubr.msk.f32.gmra.mrb[18].mxu0 %vm320_vm3, %v1144_v49  ;;  %v6023_v49 = vld [vmem:[%s5798_s16 + $0x338] sm:$0xff] }
  0x37   : > { %5056 = vmatmul.mubr.msk.f32.gmra.mrb[18].mxu1 %vm320_vm3, %v714_v48  ;;  %5110 = vmatprep.mubr.msk.f32.mxu0 %vm320_vm3, %v1145_v51  ;;  %v1577_v48 = vld [vmem:[%s5798_s16 + $0x330] sm:$0xff]  ;;  %v5713_v51 = vmov 0.0  }
  0x38   : > { %5058 = vmatprep.mubr.msk.f32.mxu1 %vm320_vm3, %v715_v50  ;;  %v6026_v50 = vld [vmem:[%s5798_s16 + $0x340] sm:$0xff]  ;;  %2002 = vst.msk [vmem:[#allocation2 + $0x8] sm:$0xff] %vm694_vm4, %v5713_v51  ;;  %2001 = vst.msk [vmem:[#allocation2] sm:$0xff] %vm694_vm4, %v5713_v51 }
  0x39   : > { %2003 = vst.msk [vmem:[#allocation2 + $0x10] sm:$0xff] %vm694_vm4, %v5713_v51  ;;  %2004 = vst.msk [vmem:[#allocation2 + $0x18] sm:$0xff] %vm694_vm4, %v5713_v51 }
  0x3a   : > { %5111 = vmatmul.mubr.msk.f32.gmra.mrb[20].mxu0 %vm320_vm3, %v1146_v53  ;;  %2005 = vst.msk [vmem:[#allocation2 + $0x20] sm:$0xff] %vm694_vm4, %v5713_v51  ;;  %2006 = vst.msk [vmem:[#allocation2 + $0x28] sm:$0xff] %vm694_vm4, %v5713_v51  ;;  %v1581_v53 = vld [vmem:[%s5798_s16 + $0x350] sm:$0xff] }
  0x3b   : > { %5059 = vmatmul.mubr.msk.f32.gmra.mrb[20].mxu1 %vm320_vm3, %v716_v52  ;;  %5113 = vmatprep.mubr.msk.f32.mxu0 %vm320_vm3, %v1147_v55  ;;  %2007 = vst.msk [vmem:[#allocation2 + $0x30] sm:$0xff] %vm694_vm4, %v5713_v51  ;;  %2008 = vst.msk [vmem:[#allocation2 + $0x38] sm:$0xff] %vm694_vm4, %v5713_v51  ;;  %v1580_v52 = vld [vmem:[%s5798_s16 + $0x348] sm:$0xff]  ;;  %v1583_v55 = vld [vmem:[%s5798_s16 + $0x360] sm:$0xff] }
  0x3c   : > { %5061 = vmatprep.mubr.msk.f32.mxu1 %vm320_vm3, %v717_v54  ;;  %2009 = vst.msk [vmem:[#allocation2 + $0x40] sm:$0xff] %vm694_vm4, %v5713_v51  ;;  %2010 = vst.msk [vmem:[#allocation2 + $0x48] sm:$0xff] %vm694_vm4, %v5713_v51  ;;  %v1582_v54 = vld [vmem:[%s5798_s16 + $0x358] sm:$0xff] }
  0x3d   : > { %2011 = vst.msk [vmem:[#allocation2 + $0x50] sm:$0xff] %vm694_vm4, %v5713_v51  ;;  %2012 = vst.msk [vmem:[#allocation2 + $0x58] sm:$0xff] %vm694_vm4, %v5713_v51 }
  0x3e   : > { %5114 = vmatmul.mubr.msk.f32.gmra.mrb[22].mxu0 %vm320_vm3, %v1148_v57  ;;  %2013 = vst.msk [vmem:[#allocation2 + $0x60] sm:$0xff] %vm694_vm4, %v5713_v51  ;;  %2014 = vst.msk [vmem:[#allocation2 + $0x68] sm:$0xff] %vm694_vm4, %v5713_v51  ;;  %v1584_v57 = vld [vmem:[%s5798_s16 + $0x368] sm:$0xff] }
  0x3f   : > { %5062 = vmatmul.mubr.msk.f32.gmra.mrb[22].mxu1 %vm320_vm3, %v718_v56  ;;  %5116 = vmatprep.mubr.msk.f32.mxu0 %vm320_vm3, %v1149_v59  ;;  %2015 = vst.msk [vmem:[#allocation2 + $0x70] sm:$0xff] %vm694_vm4, %v5713_v51  ;;  %2016 = vst.msk [vmem:[#allocation2 + $0x78] sm:$0xff] %vm694_vm4, %v5713_v51  ;;  %v2301_v56 = vld [vmem:[#allocation2 + $0x8] sm:$0xff] }
  0x40   : > { %5064 = vmatprep.mubr.msk.f32.mxu1 %vm320_vm3, %v719_v58  ;;  %2017 = vst.msk [vmem:[#allocation2 + $0x80] sm:$0xff] %vm694_vm4, %v5713_v51  ;;  %2018 = vst.msk [vmem:[#allocation2 + $0x88] sm:$0xff] %vm694_vm4, %v5713_v51  ;;  %2409 = vrot.lane.b32.xlu0 %v2301_v56, %s5714_s17  ;;  %v1585_v58 = vld [vmem:[%s5798_s16 + $0x370] sm:$0xff] }
  0x41   : > { %2019 = vst.msk [vmem:[#allocation2 + $0x90] sm:$0xff] %vm694_vm4, %v5713_v51  ;;  %2020 = vst.msk [vmem:[#allocation2 + $0x98] sm:$0xff] %vm694_vm4, %v5713_v51  ;;  %v2302_v59 = vld [vmem:[#allocation2 + $0x10] sm:$0xff] }
  0x42   : > { %5117 = vmatmul.mubr.msk.f32.gmra.mrb[24].mxu0 %vm320_vm3, %v1150_v61  ;;  %2021 = vst.msk [vmem:[#allocation2 + $0xa0] sm:$0xff] %vm694_vm4, %v5713_v51  ;;  %2022 = vst.msk [vmem:[#allocation2 + $0xa8] sm:$0xff] %vm694_vm4, %v5713_v51  ;;  %2411 = vrot.lane.b32.xlu1 %v2302_v59, %s5714_s17  ;;  %v1587_v61 = vld [vmem:[%s5798_s16 + $0x380] sm:$0xff] }
  0x43   : > { %5065 = vmatmul.mubr.msk.f32.gmra.mrb[24].mxu1 %vm320_vm3, %v720_v60  ;;  %5119 = vmatprep.mubr.msk.f32.mxu0 %vm320_vm3, %v1151_v63  ;;  %2023 = vst.msk [vmem:[#allocation2 + $0xb0] sm:$0xff] %vm694_vm4, %v5713_v51  ;;  %2024 = vst.msk [vmem:[#allocation2 + $0xb8] sm:$0xff] %vm694_vm4, %v5713_v51  ;;  %v1586_v60 = vld [vmem:[%s5798_s16 + $0x378] sm:$0xff]  ;;  %v1589_v63 = vld [vmem:[%s5798_s16 + $0x390] sm:$0xff] }
  0x44   : > { %5067 = vmatprep.mubr.msk.f32.mxu1 %vm320_vm3, %v721_v62  ;;  %2025 = vst.msk [vmem:[#allocation2 + $0xc0] sm:$0xff] %vm694_vm4, %v5713_v51  ;;  %2026 = vst.msk [vmem:[#allocation2 + $0xc8] sm:$0xff] %vm694_vm4, %v5713_v51  ;;  %v1588_v62 = vld [vmem:[%s5798_s16 + $0x388] sm:$0xff] }
  0x45   : > { %2027 = vst.msk [vmem:[#allocation2 + $0xd0] sm:$0xff] %vm694_vm4, %v5713_v51  ;;  %2028 = vst.msk [vmem:[#allocation2 + $0xd8] sm:$0xff] %vm694_vm4, %v5713_v51 }
  0x46   : > { %5120 = vmatmul.mubr.msk.f32.gmra.mrb[26].mxu0 %vm320_vm3, %v1152_v1  ;;  %2029 = vst.msk [vmem:[#allocation2 + $0xe0] sm:$0xff] %vm694_vm4, %v5713_v51  ;;  %2030 = vst.msk [vmem:[#allocation2 + $0xe8] sm:$0xff] %vm694_vm4, %v5713_v51  ;;  %v1591_v1 = vld [vmem:[%s5798_s16 + $0x3a0] sm:$0xff] }
  0x47   : > { %5068 = vmatmul.mubr.msk.f32.gmra.mrb[26].mxu1 %vm320_vm3, %v722_v0  ;;  %5122 = vmatprep.mubr.msk.f32.mxu0 %vm320_vm3, %v1153_v3  ;;  %2031 = vst.msk [vmem:[#allocation2 + $0xf0] sm:$0xff] %vm694_vm4, %v5713_v51  ;;  %2032 = vst.msk [vmem:[#allocation2 + $0xf8] sm:$0xff] %vm694_vm4, %v5713_v51  ;;  %v1590_v0 = vld [vmem:[%s5798_s16 + $0x398] sm:$0xff]  ;;  %v1593_v3 = vld [vmem:[%s5798_s16 + $0x3b0] sm:$0xff] }
  0x48   : > { %5070 = vmatprep.mubr.msk.f32.mxu1 %vm320_vm3, %v723_v2  ;;  %2033 = vst.msk [vmem:[#allocation2 + $0x100] sm:$0xff] %vm694_vm4, %v5713_v51  ;;  %2034 = vst.msk [vmem:[#allocation2 + $0x108] sm:$0xff] %vm694_vm4, %v5713_v51  ;;  %v1592_v2 = vld [vmem:[%s5798_s16 + $0x3a8] sm:$0xff] }
  0x49   : > { %2035 = vst.msk [vmem:[#allocation2 + $0x110] sm:$0xff] %vm694_vm4, %v5713_v51  ;;  %2036 = vst.msk [vmem:[#allocation2 + $0x118] sm:$0xff] %vm694_vm4, %v5713_v51 }
  0x4a   : > { %5123 = vmatmul.mubr.msk.f32.gmra.mrb[28].mxu0 %vm320_vm3, %v1154_v5  ;;  %2037 = vst.msk [vmem:[#allocation2 + $0x120] sm:$0xff] %vm694_vm4, %v5713_v51  ;;  %2038 = vst.msk [vmem:[#allocation2 + $0x128] sm:$0xff] %vm694_vm4, %v5713_v51  ;;  %v1595_v5 = vld [vmem:[%s5798_s16 + $0x3c0] sm:$0xff] }
  0x4b   : > { %5071 = vmatmul.mubr.msk.f32.gmra.mrb[28].mxu1 %vm320_vm3, %v724_v4  ;;  %5125 = vmatprep.mubr.msk.f32.mxu0 %vm320_vm3, %v1155_v7  ;;  %2039 = vst.msk [vmem:[#allocation2 + $0x130] sm:$0xff] %vm694_vm4, %v5713_v51  ;;  %2040 = vst.msk [vmem:[#allocation2 + $0x138] sm:$0xff] %vm694_vm4, %v5713_v51  ;;  %v1594_v4 = vld [vmem:[%s5798_s16 + $0x3b8] sm:$0xff]  ;;  %v1597_v7 = vld [vmem:[%s5798_s16 + $0x3d0] sm:$0xff] }
  0x4c   : > { %5073 = vmatprep.mubr.msk.f32.mxu1 %vm320_vm3, %v725_v6  ;;  %2041 = vst.msk [vmem:[#allocation2 + $0x140] sm:$0xff] %vm694_vm4, %v5713_v51  ;;  %2042 = vst.msk [vmem:[#allocation2 + $0x148] sm:$0xff] %vm694_vm4, %v5713_v51  ;;  %v1596_v6 = vld [vmem:[%s5798_s16 + $0x3c8] sm:$0xff] }
  0x4d   : > { %2043 = vst.msk [vmem:[#allocation2 + $0x150] sm:$0xff] %vm694_vm4, %v5713_v51  ;;  %2044 = vst.msk [vmem:[#allocation2 + $0x158] sm:$0xff] %vm694_vm4, %v5713_v51 }
  0x4e   : > { %5126 = vmatmul.mubr.msk.f32.gmra.mrb[30].mxu0 %vm320_vm3, %v1156_v9  ;;  %2045 = vst.msk [vmem:[#allocation2 + $0x160] sm:$0xff] %vm694_vm4, %v5713_v51  ;;  %2046 = vst.msk [vmem:[#allocation2 + $0x168] sm:$0xff] %vm694_vm4, %v5713_v51  ;;  %v1599_v9 = vld [vmem:[%s5798_s16 + $0x3e0] sm:$0xff] }
  0x4f   : > { %5074 = vmatmul.mubr.msk.f32.gmra.mrb[30].mxu1 %vm320_vm3, %v726_v8  ;;  %5128 = vmatprep.mubr.msk.f32.mxu0 %vm320_vm3, %v1157_v11  ;;  %2047 = vst.msk [vmem:[#allocation2 + $0x170] sm:$0xff] %vm694_vm4, %v5713_v51  ;;  %2048 = vst.msk [vmem:[#allocation2 + $0x178] sm:$0xff] %vm694_vm4, %v5713_v51  ;;  %v1598_v8 = vld [vmem:[%s5798_s16 + $0x3d8] sm:$0xff]  ;;  %v1601_v11 = vld [vmem:[%s5798_s16 + $0x3f0] sm:$0xff] }
  0x50   : > { %5076 = vmatprep.mubr.msk.f32.mxu1 %vm320_vm3, %v727_v10  ;;  %2049 = vst.msk [vmem:[#allocation2 + $0x180] sm:$0xff] %vm694_vm4, %v5713_v51  ;;  %2050 = vst.msk [vmem:[#allocation2 + $0x188] sm:$0xff] %vm694_vm4, %v5713_v51  ;;  %v1600_v10 = vld [vmem:[%s5798_s16 + $0x3e8] sm:$0xff] }
  0x51   : > { %2051 = vst.msk [vmem:[#allocation2 + $0x190] sm:$0xff] %vm694_vm4, %v5713_v51  ;;  %2052 = vst.msk [vmem:[#allocation2 + $0x198] sm:$0xff] %vm694_vm4, %v5713_v51 }
  0x52   : > { %5129 = vmatmul.mubr.msk.f32.gmra.mrb[32].mxu0 %vm320_vm3, %v1158_v13  ;;  %2053 = vst.msk [vmem:[#allocation2 + $0x1a0] sm:$0xff] %vm694_vm4, %v5713_v51  ;;  %2054 = vst.msk [vmem:[#allocation2 + $0x1a8] sm:$0xff] %vm694_vm4, %v5713_v51 }
  0x53   : > { %5077 = vmatmul.mubr.msk.f32.gmra.mrb[32].mxu1 %vm320_vm3, %v728_v12  ;;  %5131 = vmatprep.mubr.msk.f32.mxu0 %vm320_vm3, %v1159_v15  ;;  %2055 = vst.msk [vmem:[#allocation2 + $0x1b0] sm:$0xff] %vm694_vm4, %v5713_v51  ;;  %2056 = vst.msk [vmem:[#allocation2 + $0x1b8] sm:$0xff] %vm694_vm4, %v5713_v51  ;;  %v1602_v12 = vld [vmem:[%s5798_s16 + $0x3f8] sm:$0xff]  ;;  %v6227_v15 = vld [vmem:[%s7581_s2] ss:$0 sm:$0xff] }
  0x54   : > { %5079 = vmatprep.mubr.msk.f32.mxu1 %vm320_vm3, %v729_v14  ;;  %2057 = vst.msk [vmem:[#allocation2 + $0x1c0] sm:$0xff] %vm694_vm4, %v5713_v51  ;;  %2058 = vst.msk [vmem:[#allocation2 + $0x1c8] sm:$0xff] %vm694_vm4, %v5713_v51 }
  0x55   : > { %2059 = vst.msk [vmem:[#allocation2 + $0x1d0] sm:$0xff] %vm694_vm4, %v5713_v51  ;;  %2060 = vst.msk [vmem:[#allocation2 + $0x1d8] sm:$0xff] %vm694_vm4, %v5713_v51 }
  0x56   : > { %5132 = vmatmul.mubr.msk.f32.gmra.mrb[34].mxu0 %vm320_vm3, %v1160_v17  ;;  %2061 = vst.msk [vmem:[#allocation2 + $0x1e0] sm:$0xff] %vm694_vm4, %v5713_v51  ;;  %2062 = vst.msk [vmem:[#allocation2 + $0x1e8] sm:$0xff] %vm694_vm4, %v5713_v51 }
  0x57   : > { %5080 = vmatmul.mubr.msk.f32.gmra.mrb[34].mxu1 %vm320_vm3, %v730_v16  ;;  %5134 = vmatprep.mubr.msk.f32.mxu0 %vm320_vm3, %v1161_v19  ;;  %2063 = vst.msk [vmem:[#allocation2 + $0x1f0] sm:$0xff] %vm694_vm4, %v5713_v51  ;;  %2064 = vst.msk [vmem:[#allocation2 + $0x1f8] sm:$0xff] %vm694_vm4, %v5713_v51 }
  0x58   : > { %5082 = vmatprep.mubr.msk.f32.mxu1 %vm320_vm3, %v731_v18  ;;  %2065 = vst.msk [vmem:[#allocation2 + $0x200] sm:$0xff] %vm694_vm4, %v5713_v51  ;;  %2066 = vst.msk [vmem:[#allocation2 + $0x208] sm:$0xff] %vm694_vm4, %v5713_v51 }
  0x59   : > { %2067 = vst.msk [vmem:[#allocation2 + $0x210] sm:$0xff] %vm694_vm4, %v5713_v51  ;;  %2068 = vst.msk [vmem:[#allocation2 + $0x218] sm:$0xff] %vm694_vm4, %v5713_v51 }
  0x5a   : > { %5135 = vmatmul.mubr.msk.f32.gmra.mrb[36].mxu0 %vm320_vm3, %v1162_v21  ;;  %2069 = vst.msk [vmem:[#allocation2 + $0x220] sm:$0xff] %vm694_vm4, %v5713_v51  ;;  %2070 = vst.msk [vmem:[#allocation2 + $0x228] sm:$0xff] %vm694_vm4, %v5713_v51 }
  0x5b   : > { %5083 = vmatmul.mubr.msk.f32.gmra.mrb[36].mxu1 %vm320_vm3, %v732_v20  ;;  %5137 = vmatprep.mubr.msk.f32.mxu0 %vm320_vm3, %v1163_v23  ;;  %2071 = vst.msk [vmem:[#allocation2 + $0x230] sm:$0xff] %vm694_vm4, %v5713_v51  ;;  %2072 = vst.msk [vmem:[#allocation2 + $0x238] sm:$0xff] %vm694_vm4, %v5713_v51 }
  0x5c   : > { %5085 = vmatprep.mubr.msk.f32.mxu1 %vm320_vm3, %v733_v22  ;;  %3691 = vst.msk [vmem:[#allocation3] sm:$0xff] %vm2697_vm5, %v5713_v51  ;;  %3692 = vst.msk [vmem:[#allocation3 + $0x8] sm:$0xff] %vm2697_vm5, %v5713_v51 }
  0x5d   : > { %3693 = vst.msk [vmem:[#allocation3 + $0x10] sm:$0xff] %vm2697_vm5, %v5713_v51  ;;  %3694 = vst.msk [vmem:[#allocation3 + $0x18] sm:$0xff] %vm2697_vm5, %v5713_v51 }
  0x5e   : > { %5138 = vmatmul.mubr.msk.f32.gmra.mrb[38].mxu0 %vm320_vm3, %v1164_v25  ;;  %3695 = vst.msk [vmem:[#allocation3 + $0x20] sm:$0xff] %vm2697_vm5, %v5713_v51  ;;  %3696 = vst.msk [vmem:[#allocation3 + $0x28] sm:$0xff] %vm2697_vm5, %v5713_v51 }
  0x5f   : > { %5086 = vmatmul.mubr.msk.f32.gmra.mrb[38].mxu1 %vm320_vm3, %v734_v24  ;;  %5140 = vmatprep.mubr.msk.f32.mxu0 %vm320_vm3, %v1165_v27  ;;  %v4531_v27 = vld [vmem:[%s7582_s3 + $0x68] sm:$0xff]  ;;  %3697 = vst.msk [vmem:[#allocation3 + $0x30] sm:$0xff] %vm2697_vm5, %v5713_v51  ;;  %3698 = vst.msk [vmem:[#allocation3 + $0x38] sm:$0xff] %vm2697_vm5, %v5713_v51 }
  0x60   : > { %5088 = vmatprep.mubr.msk.f32.mxu1 %vm320_vm3, %v735_v26  ;;  %v4530_v26 = vld [vmem:[%s7582_s3 + $0x60] sm:$0xff]  ;;  %3699 = vst.msk [vmem:[#allocation3 + $0x40] sm:$0xff] %vm2697_vm5, %v5713_v51  ;;  %3700 = vst.msk [vmem:[#allocation3 + $0x48] sm:$0xff] %vm2697_vm5, %v5713_v51 }
  0x61   : > { %3701 = vst.msk [vmem:[#allocation3 + $0x50] sm:$0xff] %vm2697_vm5, %v5713_v51  ;;  %3702 = vst.msk [vmem:[#allocation3 + $0x58] sm:$0xff] %vm2697_vm5, %v5713_v51 }
  0x62   : > { %5141 = vmatmul.mubr.msk.f32.gmra.mrb[40].mxu0 %vm320_vm3, %v1166_v29  ;;  %3703 = vst.msk [vmem:[#allocation3 + $0x60] sm:$0xff] %vm2697_vm5, %v5713_v51  ;;  %3704 = vst.msk [vmem:[#allocation3 + $0x68] sm:$0xff] %vm2697_vm5, %v5713_v51 }
  0x63   : > { %5089 = vmatmul.mubr.msk.f32.gmra.mrb[40].mxu1 %vm320_vm3, %v736_v28  ;;  %5143 = vmatprep.mubr.msk.f32.mxu0 %vm320_vm3, %v1167_v31  ;;  %v5444_v28 = vpack.c.bf16 %v4531_v27, %v4530_v26  ;;  %3705 = vst.msk [vmem:[#allocation3 + $0x70] sm:$0xff] %vm2697_vm5, %v5713_v51  ;;  %3706 = vst.msk [vmem:[#allocation3 + $0x78] sm:$0xff] %vm2697_vm5, %v5713_v51 }
  0x64   : > { %5091 = vmatprep.mubr.msk.f32.mxu1 %vm320_vm3, %v737_v30  ;;  %3707 = vst.msk [vmem:[#allocation3 + $0x80] sm:$0xff] %vm2697_vm5, %v5713_v51  ;;  %3708 = vst.msk [vmem:[#allocation3 + $0x88] sm:$0xff] %vm2697_vm5, %v5713_v51 }
  0x65   : > { %5445 = vmatprep.subr.bf16.mxu0 %v5444_v28  ;;  %3709 = vst.msk [vmem:[#allocation3 + $0x90] sm:$0xff] %vm2697_vm5, %v5713_v51  ;;  %3710 = vst.msk [vmem:[#allocation3 + $0x98] sm:$0xff] %vm2697_vm5, %v5713_v51 }
  0x66   : > { %5144 = vmatmul.mubr.msk.f32.gmra.mrb[42].mxu0 %vm320_vm3, %v1168_v33  ;;  %3711 = vst.msk [vmem:[#allocation3 + $0xa0] sm:$0xff] %vm2697_vm5, %v5713_v51  ;;  %3712 = vst.msk [vmem:[#allocation3 + $0xa8] sm:$0xff] %vm2697_vm5, %v5713_v51 }
  0x67   : > { %5092 = vmatmul.mubr.msk.f32.gmra.mrb[42].mxu1 %vm320_vm3, %v738_v32  ;;  %5146 = vmatprep.mubr.msk.f32.mxu0 %vm320_vm3, %v1169_v35  ;;  %3713 = vst.msk [vmem:[#allocation3 + $0xb0] sm:$0xff] %vm2697_vm5, %v5713_v51  ;;  %3714 = vst.msk [vmem:[#allocation3 + $0xb8] sm:$0xff] %vm2697_vm5, %v5713_v51 }
  0x68   : > { %5094 = vmatprep.mubr.msk.f32.mxu1 %vm320_vm3, %v739_v34  ;;  %5447 = vmatpush3.bf16.msra.mxu0 %v5444_v28  ;;  %3715 = vst.msk [vmem:[#allocation3 + $0xc0] sm:$0xff] %vm2697_vm5, %v5713_v51  ;;  %3716 = vst.msk [vmem:[#allocation3 + $0xc8] sm:$0xff] %vm2697_vm5, %v5713_v51 }
  0x69   : > { %3717 = vst.msk [vmem:[#allocation3 + $0xd0] sm:$0xff] %vm2697_vm5, %v5713_v51  ;;  %3718 = vst.msk [vmem:[#allocation3 + $0xd8] sm:$0xff] %vm2697_vm5, %v5713_v51 }
  0x6a   : > { %5147 = vmatmul.mubr.msk.f32.gmra.mrb[44].mxu0 %vm320_vm3, %v1170_v37  ;;  %3719 = vst.msk [vmem:[#allocation3 + $0xe0] sm:$0xff] %vm2697_vm5, %v5713_v51  ;;  %3720 = vst.msk [vmem:[#allocation3 + $0xe8] sm:$0xff] %vm2697_vm5, %v5713_v51 }
  0x6b   : > { %5095 = vmatmul.mubr.msk.f32.gmra.mrb[44].mxu1 %vm320_vm3, %v740_v36  ;;  %5149 = vmatprep.mubr.msk.f32.mxu0 %vm320_vm3, %v1171_v39 }
  0x6c   : > { %5097 = vmatprep.mubr.msk.f32.mxu1 %vm320_vm3, %v741_v38 }
  0x6e   : > { %5150 = vmatmul.mubr.msk.f32.gmra.mrb[46].mxu0 %vm320_vm3, %v1172_v41 }
  0x6f   : > { %5098 = vmatmul.mubr.msk.f32.gmra.mrb[46].mxu1 %vm320_vm3, %v742_v40 }
  0x70   : > { %5156 = vmatprep.mubr.msk.f32.mxu1 %vm320_vm3, %v1571_v42 }
  0x73   : > { %5157 = vmatmul.mubr.msk.f32.vlgmr.msra.gmra.mrb[48].mxu1 %vm320_vm3, %v1572_v43 }
  0x74   : > { %5159 = vmatprep.mubr.msk.f32.mxu1 %vm320_vm3, %v1573_v44  ;;  %v4532_v44 = vld [vmem:[%s7582_s3 + $0x70] sm:$0xff] }
  0x77   : > { %5160 = vmatmul.mubr.msk.f32.gmra.mrb[50].mxu1 %vm320_vm3, %v1574_v45  ;;  %v4533_v45 = vld [vmem:[%s7582_s3 + $0x78] sm:$0xff] }
  0x78   : > { %5162 = vmatprep.mubr.msk.f32.mxu1 %vm320_vm3, %v1575_v46 }
  0x7b   : > { %5163 = vmatmul.mubr.msk.f32.gmra.mrb[52].mxu1 %vm320_vm3, %v1576_v47 }
  0x7c   : > { %5165 = vmatprep.mubr.msk.f32.mxu1 %vm320_vm3, %v1577_v48 }
  0x7f   : > { %5166 = vmatmul.mubr.msk.f32.gmra.mrb[54].mxu1 %vm320_vm3, %v6023_v49  ;;  %v5448_v49 = vpack.c.bf16 %v4533_v45, %v4532_v44 }
  0x80   : > { %5168 = vmatprep.mubr.msk.f32.mxu1 %vm320_vm3, %v6026_v50 }
  0x81   : > { %5449 = vmatprep.subr.bf16.mxu0 %v5448_v49 }
  0x82   : > { %5451 = vmatpush3.bf16.msra.mxu0 %v5448_v49 }
  0x83   : > { %5169 = vmatmul.mubr.msk.f32.gmra.mrb[56].mxu1 %vm320_vm3, %v1580_v52 }
  0x84   : > { %5171 = vmatprep.mubr.msk.f32.mxu1 %vm320_vm3, %v1581_v53 }
  0x87   : > { %5172 = vmatmul.mubr.msk.f32.gmra.mrb[58].mxu1 %vm320_vm3, %v1582_v54 }
  0x88   : > { %5174 = vmatprep.mubr.msk.f32.mxu1 %vm320_vm3, %v1583_v55 }
  0x8b   : > { %5175 = vmatmul.mubr.msk.f32.gmra.mrb[60].mxu1 %vm320_vm3, %v1584_v57 }
  0x8c   : > { %5177 = vmatprep.mubr.msk.f32.mxu1 %vm320_vm3, %v1585_v58 }
  0x8f   : > { %5178 = vmatmul.mubr.msk.f32.gmra.mrb[62].mxu1 %vm320_vm3, %v1586_v60 }
  0x90   : > { %5180 = vmatprep.mubr.msk.f32.mxu1 %vm320_vm3, %v1587_v61 }
  0x93   : > { %5181 = vmatmul.mubr.msk.f32.gmra.mrb[64].mxu1 %vm320_vm3, %v1588_v62 }
  0x94   : > { %5183 = vmatprep.mubr.msk.f32.mxu1 %vm320_vm3, %v1589_v63 }
  0x97   : > { %5184 = vmatmul.mubr.msk.f32.gmra.mrb[66].mxu1 %vm320_vm3, %v1590_v0 }
  0x98   : > { %5186 = vmatprep.mubr.msk.f32.mxu1 %vm320_vm3, %v1591_v1 }
  0x9b   : > { %5187 = vmatmul.mubr.msk.f32.gmra.mrb[68].mxu1 %vm320_vm3, %v1592_v2 }
  0x9c   : > { %5189 = vmatprep.mubr.msk.f32.mxu1 %vm320_vm3, %v1593_v3  ;;  %v4534_v3 = vld [vmem:[%s7582_s3 + $0x80] sm:$0xff] }
  0x9f   : > { %5190 = vmatmul.mubr.msk.f32.gmra.mrb[70].mxu1 %vm320_vm3, %v1594_v4  ;;  %v4535_v4 = vld [vmem:[%s7582_s3 + $0x88] sm:$0xff] }
  0xa0   : > { %5192 = vmatprep.mubr.msk.f32.mxu1 %vm320_vm3, %v1595_v5 }
  0xa3   : > { %5193 = vmatmul.mubr.msk.f32.gmra.mrb[72].mxu1 %vm320_vm3, %v1596_v6 }
  0xa4   : > { %5195 = vmatprep.mubr.msk.f32.mxu1 %vm320_vm3, %v1597_v7 }
  0xa7   : > { %5196 = vmatmul.mubr.msk.f32.gmra.mrb[74].mxu1 %vm320_vm3, %v1598_v8  ;;  %v5452_v8 = vpack.c.bf16 %v4535_v4, %v4534_v3 }
  0xa8   : > { %5198 = vmatprep.mubr.msk.f32.mxu1 %vm320_vm3, %v1599_v9 }
  0xa9   : > { %5453 = vmatprep.subr.bf16.mxu0 %v5452_v8 }
  0xaa   : > { %5455 = vmatpush3.bf16.msra.mxu0 %v5452_v8 }
  0xab   : > { %5199 = vmatmul.mubr.msk.f32.gmra.mrb[76].mxu1 %vm320_vm3, %v1600_v10 }
  0xac   : > { %5201 = vmatprep.mubr.msk.f32.mxu1 %vm320_vm3, %v1601_v11 }
  0xaf   : > { %5202 = vmatmul.mubr.msk.f32.gmra.mrb[78].mxu1 %vm320_vm3, %v1602_v12 }
  0xe5   : > { %v5002_v14 = vpop.f32.mrb[0].mxu0 }
  0xe6   : > { %v5026_v13 = vpop.f32.mrb[0].mxu1  ;;  %v487_v17 = vpop.f32.mrb[1].mxu0  ;;  %v493_v22 = vadd.f32 %v5002_v14, %v6227_v15 }
  0xe7   : > { %v567_v16 = vpop.f32.mrb[1].mxu1  ;;  %v573_v18 = vadd.f32 %v5026_v13, %v6227_v15  ;;  %v488_v25 = vadd.f32 %v6227_v15, %v487_v17 }
  0xe8   : > { %v568_v21 = vadd.f32 %v6227_v15, %v567_v16  ;;  %v647_v35 = vmax.f32 %v493_v22, 0.0  ;;  %v4537_v22 = vld [vmem:[%s7582_s3 + $0x98] sm:$0xff] }
  0xe9   : > { %v5005_v20 = vpop.f32.mrb[2].mxu0  ;;  %v663_v29 = vmax.f32 %v573_v18, 0.0  ;;  %v646_v41 = vmax.f32 %v488_v25, 0.0 }
  0xea   : > { %v5029_v19 = vpop.f32.mrb[2].mxu1  ;;  %v497_v24 = vpop.f32.mrb[3].mxu0  ;;  %v503_v30 = vadd.f32 %v5005_v20, %v6227_v15  ;;  %v662_v34 = vmax.f32 %v568_v21, 0.0  ;;  %v4536_v21 = vld [vmem:[%s7582_s3 + $0x90] sm:$0xff] }
  0xeb   : > { %v577_v23 = vpop.f32.mrb[3].mxu1  ;;  %v498_v31 = vadd.f32 %v6227_v15, %v497_v24  ;;  %v583_v40 = vadd.f32 %v5029_v19, %v6227_v15 }
  0xec   : > { %v578_v46 = vadd.f32 %v6227_v15, %v577_v23  ;;  %v649_v50 = vmax.f32 %v503_v30, 0.0  ;;  %v5456_v23 = vpack.c.bf16 %v4537_v22, %v4536_v21 }
  0xed   : > { %v5008_v32 = vpop.f32.mrb[4].mxu0  ;;  %v648_v52 = vmax.f32 %v498_v31, 0.0  ;;  %v665_v5 = vmax.f32 %v583_v40, 0.0 }
  0xee   : > { %v5032_v33 = vpop.f32.mrb[4].mxu1  ;;  %v513_v36 = vadd.f32 %v5008_v32, %v6227_v15  ;;  %v507_v38 = vpop.f32.mrb[5].mxu0  ;;  %v664_v9 = vmax.f32 %v578_v46, 0.0  ;;  %5457 = vmatprep.subr.bf16.mxu0 %v5456_v23 }
  0xef   : > { %v593_v37 = vadd.f32 %v5032_v33, %v6227_v15  ;;  %v587_v39 = vpop.f32.mrb[5].mxu1  ;;  %v508_v42 = vadd.f32 %v6227_v15, %v507_v38  ;;  %5459 = vmatpush3.bf16.msra.mxu0 %v5456_v23  ;;  %v4538_v33 = vld [vmem:[%s7582_s3 + $0xa0] sm:$0xff] }
  0xf0   : > { %v588_v43 = vadd.f32 %v6227_v15, %v587_v39  ;;  %v651_v47 = vmax.f32 %v513_v36, 0.0 }
  0xf1   : > { %v667_v48 = vmax.f32 %v593_v37, 0.0  ;;  %v650_v53 = vmax.f32 %v508_v42, 0.0  ;;  %v5011_v55 = vpop.f32.mrb[6].mxu0 }
  0xf2   : > { %v666_v54 = vmax.f32 %v588_v43, 0.0  ;;  %v5035_v56 = vpop.f32.mrb[6].mxu1  ;;  %v679_v57 = vmax.f32 %v647_v35, %v651_v47  ;;  %v523_v59 = vadd.f32 %v5011_v55, %v6227_v15  ;;  %v517_v61 = vpop.f32.mrb[7].mxu0 }
  0xf3   : > { %v687_v58 = vmax.f32 %v663_v29, %v667_v48  ;;  %v603_v60 = vadd.f32 %v5035_v56, %v6227_v15  ;;  %v597_v62 = vpop.f32.mrb[7].mxu1  ;;  %v678_v63 = vmax.f32 %v646_v41, %v650_v53  ;;  %v518_v1 = vadd.f32 %v6227_v15, %v517_v61  ;;  %v4540_v56 = vld [vmem:[%s7582_s3 + $0xb0] sm:$0xff] }
  0xf4   : > { %v686_v0 = vmax.f32 %v662_v34, %v666_v54  ;;  %v598_v2 = vadd.f32 %v6227_v15, %v597_v62  ;;  %696 = vst.msk [vmem:[#allocation4 + $0x8] sm:$0xff] %vm694_vm4, %v679_v57  ;;  %v653_v6 = vmax.f32 %v523_v59, 0.0  ;;  %v4539_v34 = vld [vmem:[%s7582_s3 + $0xa8] sm:$0xff]  ;;  %v4541_v57 = vld [vmem:[%s7582_s3 + $0xb8] sm:$0xff] }
  0xf5   : > { %704 = vst.msk [vmem:[#allocation4 + $0x48] sm:$0xff] %vm694_vm4, %v687_v58  ;;  %v669_v7 = vmax.f32 %v603_v60, 0.0  ;;  %695 = vst.msk [vmem:[#allocation4] sm:$0xff] %vm694_vm4, %v678_v63  ;;  %v652_v10 = vmax.f32 %v518_v1, 0.0  ;;  %v5014_v13 = vpop.f32.mrb[8].mxu0  ;;  %v5460_v38 = vpack.c.bf16 %v4539_v34, %v4538_v33 }
  0xf6   : > { %703 = vst.msk [vmem:[#allocation4 + $0x40] sm:$0xff] %vm694_vm4, %v686_v0  ;;  %v668_v11 = vmax.f32 %v598_v2, 0.0  ;;  %v5038_v12 = vpop.f32.mrb[8].mxu1  ;;  %v681_v14 = vmax.f32 %v649_v50, %v653_v6  ;;  %v527_v18 = vpop.f32.mrb[9].mxu0  ;;  %v6284_v26 = vadd.f32 %v5014_v13, %v6227_v15  ;;  %v5464_v0 = vpack.c.bf16 %v4541_v57, %v4540_v56 }
  0xf7   : > { %v689_v16 = vmax.f32 %v665_v5, %v669_v7  ;;  %v607_v17 = vpop.f32.mrb[9].mxu1  ;;  %v680_v19 = vmax.f32 %v648_v52, %v652_v10  ;;  %v6278_v24 = vadd.f32 %v5038_v12, %v6227_v15  ;;  %v6287_v29 = vadd.f32 %v6227_v15, %v527_v18  ;;  %5461 = vmatprep.subr.bf16.mxu0 %v5460_v38 }
  0xf8   : > { %v688_v20 = vmax.f32 %v664_v9, %v668_v11  ;;  %698 = vst.msk [vmem:[#allocation4 + $0x18] sm:$0xff] %vm694_vm4, %v681_v14  ;;  %v6281_v25 = vadd.f32 %v6227_v15, %v607_v17  ;;  %v655_v43 = vmax.f32 %v6284_v26, 0.0  ;;  %5463 = vmatpush3.bf16.msra.mxu0 %v5460_v38 }
  0xf9   : > { %706 = vst.msk [vmem:[#allocation4 + $0x58] sm:$0xff] %vm694_vm4, %v689_v16  ;;  %697 = vst.msk [vmem:[#allocation4 + $0x10] sm:$0xff] %vm694_vm4, %v680_v19  ;;  %v5017_v28 = vpop.f32.mrb[10].mxu0  ;;  %v671_v41 = vmax.f32 %v6278_v24, 0.0  ;;  %v654_v46 = vmax.f32 %v6287_v29, 0.0  ;;  %5465 = vmatprep.subr.bf16.mxu0 %v5464_v0 }
  0xfa   : > { %705 = vst.msk [vmem:[#allocation4 + $0x50] sm:$0xff] %vm694_vm4, %v688_v20  ;;  %v5041_v27 = vpop.f32.mrb[10].mxu1  ;;  %v537_v31 = vpop.f32.mrb[11].mxu0  ;;  %v6290_v32 = vadd.f32 %v5017_v28, %v6227_v15  ;;  %v670_v42 = vmax.f32 %v6281_v25, 0.0 }
  0xfb   : > { %v617_v30 = vpop.f32.mrb[11].mxu1  ;;  %v6303_v47 = vadd.f32 %v6227_v15, %v537_v31  ;;  %v6319_v61 = vadd.f32 %v5041_v27, %v6227_v15 }
  0xfc   : > { %v2073_v35 = vld [vmem:[#allocation4] ss:$2 sm:$0xff]  ;;  %v2137_v36 = vld [vmem:[#allocation4 + $0x1] ss:$2 sm:$0xff]  ;;  %v657_v52 = vmax.f32 %v6290_v32, 0.0  ;;  %v6322_v62 = vadd.f32 %v6227_v15, %v617_v30  ;;  %5467 = vmatpush3.bf16.msra.mxu0 %v5464_v0 }
  0xfd   : > { %v2081_v37 = vld [vmem:[#allocation4 + $0x40] ss:$2 sm:$0xff]  ;;  %v2200_v39 = vmax.f32 %v2073_v35, %v2137_v36  ;;  %v2145_v40 = vld [vmem:[#allocation4 + $0x41] ss:$2 sm:$0xff]  ;;  %v5020_v44 = vpop.f32.mrb[12].mxu0  ;;  %v656_v8 = vmax.f32 %v6303_v47, 0.0 }
  0xfe   : > { %v2204_v45 = vmax.f32 %v2081_v37, %v2145_v40  ;;  %v6306_v48 = vadd.f32 %v5020_v44, %v6227_v15  ;;  %v5044_v49 = vpop.f32.mrb[12].mxu1  ;;  %v547_v50 = vpop.f32.mrb[13].mxu0  ;;  %v673_v22 = vmax.f32 %v6319_v61, 0.0  ;;  %v672_v25 = vmax.f32 %v6322_v62, 0.0 }
  0xff   : > { %v633_v53 = vadd.f32 %v5044_v49, %v6227_v15  ;;  %v548_v54 = vadd.f32 %v6227_v15, %v547_v50  ;;  %v627_v55 = vpop.f32.mrb[13].mxu1  ;;  %2233 = vst.msk [vmem:[#allocation2 + $0x28] sm:$0xff] %vm694_vm4, %v2200_v39 }
 0x100   : > { %v2075_v58 = vld [vmem:[#allocation4 + $0x10] ss:$2 sm:$0xff]  ;;  %v2139_v59 = vld [vmem:[#allocation4 + $0x11] ss:$2 sm:$0xff]  ;;  %v628_v63 = vadd.f32 %v6227_v15, %v627_v55  ;;  %2237 = vst.msk [vmem:[#allocation2 + $0x68] sm:$0xff] %vm694_vm4, %v2204_v45  ;;  %v659_v3 = vmax.f32 %v6306_v48, 0.0 }
 0x101   : > { %v2083_v60 = vld [vmem:[#allocation4 + $0x50] ss:$2 sm:$0xff]  ;;  %v2201_v1 = vmax.f32 %v2075_v58, %v2139_v59  ;;  %v2147_v2 = vld [vmem:[#allocation4 + $0x51] ss:$2 sm:$0xff]  ;;  %v675_v4 = vmax.f32 %v633_v53, 0.0  ;;  %v658_v5 = vmax.f32 %v548_v54, 0.0 }
 0x102   : > { %v5023_v6 = vpop.f32.mrb[14].mxu0  ;;  %v2205_v7 = vmax.f32 %v2083_v60, %v2147_v2  ;;  %v674_v9 = vmax.f32 %v628_v63, 0.0  ;;  %v5047_v11 = vpop.f32.mrb[14].mxu1  ;;  %v683_v51 = vmax.f32 %v655_v43, %v659_v3 }
 0x103   : > { %v563_v10 = vadd.f32 %v5023_v6, %v6227_v15  ;;  %v557_v12 = vpop.f32.mrb[15].mxu0  ;;  %v691_v13 = vmax.f32 %v671_v41, %v675_v4  ;;  %v682_v14 = vmax.f32 %v654_v46, %v658_v5  ;;  %v643_v16 = vadd.f32 %v5047_v11, %v6227_v15  ;;  %v637_v17 = vpop.f32.mrb[15].mxu1  ;;  %2234 = vst.msk [vmem:[#allocation2 + $0x30] sm:$0xff] %vm694_vm4, %v2201_v1 }
 0x104   : > { %v690_v18 = vmax.f32 %v670_v42, %v674_v9  ;;  %v558_v20 = vadd.f32 %v6227_v15, %v557_v12  ;;  %v638_v21 = vadd.f32 %v6227_v15, %v637_v17  ;;  %2238 = vst.msk [vmem:[#allocation2 + $0x70] sm:$0xff] %vm694_vm4, %v2205_v7  ;;  %700 = vst.msk [vmem:[#allocation4 + $0x28] sm:$0xff] %vm694_vm4, %v683_v51 }
 0x105   : > { %v661_v19 = vmax.f32 %v563_v10, 0.0  ;;  %708 = vst.msk [vmem:[#allocation4 + $0x68] sm:$0xff] %vm694_vm4, %v691_v13  ;;  %699 = vst.msk [vmem:[#allocation4 + $0x20] sm:$0xff] %vm694_vm4, %v682_v14  ;;  %v677_v23 = vmax.f32 %v643_v16, 0.0  ;;  %v5106_v26 = vpop.f32.mrb[16].mxu0 }
 0x106   : > { %v5054_v24 = vpop.f32.mrb[16].mxu1  ;;  %707 = vst.msk [vmem:[#allocation4 + $0x60] sm:$0xff] %vm694_vm4, %v690_v18  ;;  %v660_v28 = vmax.f32 %v558_v20, 0.0  ;;  %v676_v29 = vmax.f32 %v638_v21, 0.0  ;;  %v2303_v31 = vld [vmem:[#allocation2 + $0x28] sm:$0xff]  ;;  %v1347_v33 = vpop.f32.mrb[17].mxu0  ;;  %v1353_v44 = vadd.f32 %v5106_v26, %v6227_v15 }
 0x107   : > { %v685_v27 = vmax.f32 %v657_v52, %v661_v19  ;;  %v917_v30 = vpop.f32.mrb[17].mxu1  ;;  %v693_v34 = vmax.f32 %v673_v22, %v677_v23  ;;  %2413 = vrot.lane.b32.xlu0 %v2303_v31, %s5714_s17  ;;  %v923_v32 = vadd.f32 %v5054_v24, %v6227_v15  ;;  %v2307_v42 = vld [vmem:[#allocation2 + $0x68] sm:$0xff]  ;;  %v1348_v45 = vadd.f32 %v6227_v15, %v1347_v33 }
 0x108   : > { %v684_v35 = vmax.f32 %v656_v8, %v660_v28  ;;  %v692_v36 = vmax.f32 %v672_v25, %v676_v29  ;;  %v6417_v39 = vadd.f32 %v6227_v15, %v917_v30  ;;  %v1507_v63 = vmax.f32 %v1353_v44, 0.0 }
 0x109   : > { %702 = vst.msk [vmem:[#allocation4 + $0x38] sm:$0xff] %vm694_vm4, %v685_v27  ;;  %710 = vst.msk [vmem:[#allocation4 + $0x78] sm:$0xff] %vm694_vm4, %v693_v34  ;;  %v5109_v38 = vpop.f32.mrb[18].mxu0  ;;  %v1077_v58 = vmax.f32 %v923_v32, 0.0  ;;  %v1506_v1 = vmax.f32 %v1348_v45, 0.0 }
 0x10a   : > { %v5057_v37 = vpop.f32.mrb[18].mxu1  ;;  %701 = vst.msk [vmem:[#allocation4 + $0x30] sm:$0xff] %vm694_vm4, %v684_v35  ;;  %709 = vst.msk [vmem:[#allocation4 + $0x70] sm:$0xff] %vm694_vm4, %v692_v36  ;;  %v2339_v41 = vld [vmem:[#allocation2 + $0x29] sm:$0xff]  ;;  %v1357_v43 = vpop.f32.mrb[19].mxu0  ;;  %v2340_v46 = vld [vmem:[#allocation2 + $0x31] sm:$0xff]  ;;  %v6424_v49 = vadd.f32 %v5109_v38, %v6227_v15 }
 0x10b   : > { %v927_v40 = vpop.f32.mrb[19].mxu1  ;;  %2557 = vrot.lane.b32.xlu1 %v2339_v41, %s5715_s26  ;;  %2421 = vrot.lane.b32.xlu0 %v2307_v42, %s5714_s17  ;;  %v2304_v50 = vld [vmem:[#allocation2 + $0x30] sm:$0xff]  ;;  %v6427_v52 = vadd.f32 %v6227_v15, %v1357_v43  ;;  %v1076_v59 = vmax.f32 %v6417_v39, 0.0  ;;  %v933_v51 = vadd.f32 %v5057_v37, %v6227_v15 }
 0x10c   : > { %v2077_v47 = vld [vmem:[#allocation4 + $0x20] ss:$2 sm:$0xff]  ;;  %v2141_v48 = vld [vmem:[#allocation4 + $0x21] ss:$2 sm:$0xff]  ;;  %v1509_v5 = vmax.f32 %v6424_v49, 0.0  ;;  %v928_v13 = vadd.f32 %v6227_v15, %v927_v40 }
 0x10d   : > { %v2202_v53 = vmax.f32 %v2077_v47, %v2141_v48  ;;  %v2085_v54 = vld [vmem:[#allocation4 + $0x60] ss:$2 sm:$0xff]  ;;  %v2149_v55 = vld [vmem:[#allocation4 + $0x61] ss:$2 sm:$0xff]  ;;  %v5112_v62 = vpop.f32.mrb[20].mxu0  ;;  %v1508_v6 = vmax.f32 %v6427_v52, 0.0 }
 0x10e   : > { %v5060_v56 = vpop.f32.mrb[20].mxu1  ;;  %v2206_v57 = vmax.f32 %v2085_v54, %v2149_v55  ;;  %v1373_v2 = vadd.f32 %v5112_v62, %v6227_v15  ;;  %v1367_v3 = vpop.f32.mrb[21].mxu0  ;;  %v2308_v8 = vld [vmem:[#allocation2 + $0x70] sm:$0xff]  ;;  %v1079_v33 = vmax.f32 %v933_v51, 0.0  ;;  %v1078_v39 = vmax.f32 %v928_v13, 0.0 }
 0x10f   : > { %v943_v60 = vadd.f32 %v5060_v56, %v6227_v15  ;;  %v937_v61 = vpop.f32.mrb[21].mxu1  ;;  %2235 = vst.msk [vmem:[#allocation2 + $0x48] sm:$0xff] %vm694_vm4, %v2202_v53  ;;  %2559 = vrot.lane.b32.xlu1 %v2340_v46, %s5715_s26  ;;  %2415 = vrot.lane.b32.xlu0 %v2304_v50, %s5714_s17  ;;  %v1368_v7 = vadd.f32 %v6227_v15, %v1367_v3  ;;  %v2343_v9 = vld [vmem:[#allocation2 + $0x69] sm:$0xff]  ;;  %v2344_v37 = vld [vmem:[#allocation2 + $0x71] sm:$0xff] }
 0x110   : > { %v938_v0 = vadd.f32 %v6227_v15, %v937_v61  ;;  %2239 = vst.msk [vmem:[#allocation2 + $0x88] sm:$0xff] %vm694_vm4, %v2206_v57  ;;  %v1511_v20 = vmax.f32 %v1373_v2, 0.0 }
 0x111   : > { %v1081_v4 = vmax.f32 %v943_v60, 0.0  ;;  %v2079_v10 = vld [vmem:[#allocation4 + $0x30] ss:$2 sm:$0xff]  ;;  %v2143_v11 = vld [vmem:[#allocation4 + $0x31] ss:$2 sm:$0xff]  ;;  %v5115_v21 = vpop.f32.mrb[22].mxu0 }
 0x112   : > { %v2087_v12 = vld [vmem:[#allocation4 + $0x70] ss:$2 sm:$0xff]  ;;  %v2203_v14 = vmax.f32 %v2079_v10, %v2143_v11  ;;  %v2151_v16 = vld [vmem:[#allocation4 + $0x71] ss:$2 sm:$0xff]  ;;  %v1080_v18 = vmax.f32 %v938_v0, 0.0  ;;  %v5063_v19 = vpop.f32.mrb[22].mxu1  ;;  %v1383_v25 = vadd.f32 %v5115_v21, %v6227_v15  ;;  %v1539_v29 = vmax.f32 %v1507_v63, %v1511_v20 }
 0x113   : > { %v1109_v17 = vmax.f32 %v1077_v58, %v1081_v4  ;;  %v2207_v22 = vmax.f32 %v2087_v12, %v2151_v16  ;;  %v953_v23 = vadd.f32 %v5063_v19, %v6227_v15  ;;  %v947_v24 = vpop.f32.mrb[23].mxu1  ;;  %v1510_v26 = vmax.f32 %v1368_v7, 0.0  ;;  %2423 = vrot.lane.b32.xlu1 %v2308_v8, %s5714_s17  ;;  %2565 = vrot.lane.b32.xlu0 %v2343_v9, %s5715_s26  ;;  %v1377_v27 = vpop.f32.mrb[23].mxu0 }
 0x114   : > { %2236 = vst.msk [vmem:[#allocation2 + $0x50] sm:$0xff] %vm694_vm4, %v2203_v14  ;;  %v1108_v28 = vmax.f32 %v1076_v59, %v1080_v18  ;;  %v948_v30 = vadd.f32 %v6227_v15, %v947_v24  ;;  %v1378_v31 = vadd.f32 %v6227_v15, %v1377_v27  ;;  %v1513_v38 = vmax.f32 %v1383_v25, 0.0  ;;  %1556 = vst.msk [vmem:[#allocation4 + $0x108] sm:$0xff] %vm694_vm4, %v1539_v29 }
 0x115   : > { %1126 = vst.msk [vmem:[#allocation4 + $0x88] sm:$0xff] %vm694_vm4, %v1109_v17  ;;  %2240 = vst.msk [vmem:[#allocation2 + $0x90] sm:$0xff] %vm694_vm4, %v2207_v22  ;;  %v1083_v34 = vmax.f32 %v953_v23, 0.0  ;;  %v1538_v35 = vmax.f32 %v1506_v1, %v1510_v26  ;;  %v5118_v32 = vpop.f32.mrb[24].mxu0 }
 0x116   : > { %v5066_v36 = vpop.f32.mrb[24].mxu1  ;;  %1125 = vst.msk [vmem:[#allocation4 + $0x80] sm:$0xff] %vm694_vm4, %v1108_v28  ;;  %v1082_v40 = vmax.f32 %v948_v30, 0.0  ;;  %v2305_v42 = vld [vmem:[#allocation2 + $0x48] sm:$0xff]  ;;  %v1512_v43 = vmax.f32 %v1378_v31, 0.0  ;;  %v1387_v44 = vpop.f32.mrb[25].mxu0  ;;  %v1541_v46 = vmax.f32 %v1509_v5, %v1513_v38  ;;  %v1393_v55 = vadd.f32 %v5118_v32, %v6227_v15 }
 0x117   : > { %v957_v41 = vpop.f32.mrb[25].mxu1  ;;  %v1111_v45 = vmax.f32 %v1079_v33, %v1083_v34  ;;  %1555 = vst.msk [vmem:[#allocation4 + $0x100] sm:$0xff] %vm694_vm4, %v1538_v35  ;;  %2567 = vrot.lane.b32.xlu1 %v2344_v37, %s5715_s26  ;;  %2417 = vrot.lane.b32.xlu0 %v2305_v42, %s5714_s17  ;;  %v963_v48 = vadd.f32 %v5066_v36, %v6227_v15  ;;  %v2309_v54 = vld [vmem:[#allocation2 + $0x88] sm:$0xff] }
 0x118   : > { %v1110_v47 = vmax.f32 %v1078_v39, %v1082_v40  ;;  %v1540_v49 = vmax.f32 %v1508_v6, %v1512_v43  ;;  %1558 = vst.msk [vmem:[#allocation4 + $0x118] sm:$0xff] %vm694_vm4, %v1541_v46  ;;  %v958_v57 = vadd.f32 %v6227_v15, %v957_v41  ;;  %v6465_v59 = vadd.f32 %v6227_v15, %v1387_v44 }
 0x119   : > { %1128 = vst.msk [vmem:[#allocation4 + $0x98] sm:$0xff] %vm694_vm4, %v1111_v45  ;;  %v5121_v52 = vpop.f32.mrb[26].mxu0  ;;  %v1085_v60 = vmax.f32 %v963_v48, 0.0  ;;  %v1515_v8 = vmax.f32 %v1393_v55, 0.0 }
 0x11a   : > { %v5069_v50 = vpop.f32.mrb[26].mxu1  ;;  %1127 = vst.msk [vmem:[#allocation4 + $0x90] sm:$0xff] %vm694_vm4, %v1110_v47  ;;  %1557 = vst.msk [vmem:[#allocation4 + $0x110] sm:$0xff] %vm694_vm4, %v1540_v49  ;;  %v1397_v56 = vpop.f32.mrb[27].mxu0  ;;  %v6469_v61 = vadd.f32 %v5121_v52, %v6227_v15  ;;  %v1084_v11 = vmax.f32 %v958_v57, 0.0  ;;  %v1514_v51 = vmax.f32 %v6465_v59, 0.0 }
 0x11b   : > { %v967_v53 = vpop.f32.mrb[27].mxu1  ;;  %v2306_v58 = vld [vmem:[#allocation2 + $0x50] sm:$0xff]  ;;  %2425 = vrot.lane.b32.xlu0 %v2309_v54, %s5714_s17  ;;  %v6472_v63 = vadd.f32 %v6227_v15, %v1397_v56  ;;  %v973_v23 = vadd.f32 %v5069_v50, %v6227_v15 }
 0x11c   : > { %2419 = vrot.lane.b32.xlu1 %v2306_v58, %s5714_s17  ;;  %v2341_v62 = vld [vmem:[#allocation2 + $0x49] sm:$0xff]  ;;  %v2342_v3 = vld [vmem:[#allocation2 + $0x51] sm:$0xff]  ;;  %v1517_v16 = vmax.f32 %v6469_v61, 0.0  ;;  %v968_v24 = vadd.f32 %v6227_v15, %v967_v53 }
 0x11d   : > { %v2089_v0 = vld [vmem:[#allocation4 + $0x80] ss:$2 sm:$0xff]  ;;  %v2153_v1 = vld [vmem:[#allocation4 + $0x81] ss:$2 sm:$0xff]  ;;  %v5124_v13 = vpop.f32.mrb[28].mxu0  ;;  %v1516_v17 = vmax.f32 %v6472_v63, 0.0 }
 0x11e   : > { %v5072_v2 = vpop.f32.mrb[28].mxu1  ;;  %v2208_v4 = vmax.f32 %v2089_v0, %v2153_v1  ;;  %v2105_v5 = vld [vmem:[#allocation4 + $0x100] ss:$2 sm:$0xff]  ;;  %v2169_v6 = vld [vmem:[#allocation4 + $0x101] ss:$2 sm:$0xff]  ;;  %v1413_v18 = vadd.f32 %v5124_v13, %v6227_v15  ;;  %v1407_v19 = vpop.f32.mrb[29].mxu0 }
 0x11f   : > { %v983_v7 = vadd.f32 %v5072_v2, %v6227_v15  ;;  %v977_v9 = vpop.f32.mrb[29].mxu1  ;;  %v2216_v10 = vmax.f32 %v2105_v5, %v2169_v6  ;;  %2561 = vrot.lane.b32.xlu0 %v2341_v62, %s5715_s26  ;;  %v2345_v20 = vld [vmem:[#allocation2 + $0x89] sm:$0xff]  ;;  %v1408_v25 = vadd.f32 %v6227_v15, %v1407_v19  ;;  %v1087_v45 = vmax.f32 %v973_v23, 0.0  ;;  %v2346_v58 = vld [vmem:[#allocation2 + $0x91] sm:$0xff] }
 0x120   : > { %v978_v12 = vadd.f32 %v6227_v15, %v977_v9  ;;  %2241 = vst.msk [vmem:[#allocation2 + $0xa8] sm:$0xff] %vm694_vm4, %v2208_v4  ;;  %2563 = vrot.lane.b32.xlu1 %v2342_v3, %s5715_s26  ;;  %v1519_v33 = vmax.f32 %v1413_v18, 0.0  ;;  %v2310_v32 = vld [vmem:[#allocation2 + $0x90] sm:$0xff]  ;;  %v1086_v52 = vmax.f32 %v968_v24, 0.0 }
 0x121   : > { %v1089_v14 = vmax.f32 %v983_v7, 0.0  ;;  %v2091_v21 = vld [vmem:[#allocation4 + $0x90] ss:$2 sm:$0xff]  ;;  %v2155_v22 = vld [vmem:[#allocation4 + $0x91] ss:$2 sm:$0xff]  ;;  %2249 = vst.msk [vmem:[#allocation2 + $0x128] sm:$0xff] %vm694_vm4, %v2216_v10 }
 0x122   : > { %v2107_v26 = vld [vmem:[#allocation4 + $0x110] ss:$2 sm:$0xff]  ;;  %v2209_v27 = vmax.f32 %v2091_v21, %v2155_v22  ;;  %v2171_v28 = vld [vmem:[#allocation4 + $0x111] ss:$2 sm:$0xff]  ;;  %v1088_v30 = vmax.f32 %v978_v12, 0.0  ;;  %v5075_v31 = vpop.f32.mrb[30].mxu1  ;;  %v1543_v42 = vmax.f32 %v1515_v8, %v1519_v33 }
 0x123   : > { %v1113_v29 = vmax.f32 %v1085_v60, %v1089_v14  ;;  %v5127_v34 = vpop.f32.mrb[30].mxu0  ;;  %v2217_v35 = vmax.f32 %v2107_v26, %v2171_v28  ;;  %v993_v36 = vadd.f32 %v5075_v31, %v6227_v15  ;;  %v987_v37 = vpop.f32.mrb[31].mxu1  ;;  %v1518_v38 = vmax.f32 %v1408_v25, 0.0  ;;  %2569 = vrot.lane.b32.xlu0 %v2345_v20, %s5715_s26 }
 0x124   : > { %v1423_v39 = vadd.f32 %v5127_v34, %v6227_v15  ;;  %v1417_v40 = vpop.f32.mrb[31].mxu0  ;;  %2242 = vst.msk [vmem:[#allocation2 + $0xb0] sm:$0xff] %vm694_vm4, %v2209_v27  ;;  %v1112_v41 = vmax.f32 %v1084_v11, %v1088_v30  ;;  %v988_v43 = vadd.f32 %v6227_v15, %v987_v37  ;;  %2427 = vrot.lane.b32.xlu1 %v2310_v32, %s5714_s17  ;;  %1560 = vst.msk [vmem:[#allocation4 + $0x128] sm:$0xff] %vm694_vm4, %v1543_v42 }
 0x125   : > { %1130 = vst.msk [vmem:[#allocation4 + $0xa8] sm:$0xff] %vm694_vm4, %v1113_v29  ;;  %v1418_v44 = vadd.f32 %v6227_v15, %v1417_v40  ;;  %2250 = vst.msk [vmem:[#allocation2 + $0x130] sm:$0xff] %vm694_vm4, %v2217_v35  ;;  %v1091_v46 = vmax.f32 %v993_v36, 0.0  ;;  %v1542_v47 = vmax.f32 %v1514_v51, %v1518_v38  ;;  %v5130_v50 = vpop.f32.mrb[32].mxu0 }
 0x126   : > { %v5078_v48 = vpop.f32.mrb[32].mxu1  ;;  %v1521_v49 = vmax.f32 %v1423_v39, 0.0  ;;  %1129 = vst.msk [vmem:[#allocation4 + $0xa0] sm:$0xff] %vm694_vm4, %v1112_v41  ;;  %v1090_v53 = vmax.f32 %v988_v43, 0.0  ;;  %v1427_v56 = vpop.f32.mrb[33].mxu0  ;;  %v6505_v2 = vadd.f32 %v5130_v50, %v6227_v15 }
 0x127   : > { %v997_v54 = vpop.f32.mrb[33].mxu1  ;;  %v1520_v55 = vmax.f32 %v1418_v44, 0.0  ;;  %v1115_v57 = vmax.f32 %v1087_v45, %v1091_v46  ;;  %1559 = vst.msk [vmem:[#allocation4 + $0x120] sm:$0xff] %vm694_vm4, %v1542_v47  ;;  %v2311_v59 = vld [vmem:[#allocation2 + $0xa8] sm:$0xff]  ;;  %v1003_v62 = vadd.f32 %v5078_v48, %v6227_v15  ;;  %v6511_v8 = vadd.f32 %v6227_v15, %v1427_v56 }
 0x128   : > { %v1545_v60 = vmax.f32 %v1517_v16, %v1521_v49  ;;  %v1114_v61 = vmax.f32 %v1086_v52, %v1090_v53  ;;  %2571 = vrot.lane.b32.xlu1 %v2346_v58, %s5715_s26  ;;  %2429 = vrot.lane.b32.xlu0 %v2311_v59, %s5714_s17  ;;  %v2319_v1 = vld [vmem:[#allocation2 + $0x128] sm:$0xff]  ;;  %v998_v4 = vadd.f32 %v6227_v15, %v997_v54  ;;  %v1523_v14 = vmax.f32 %v6505_v2, 0.0 }
 0x129   : > { %v1544_v63 = vmax.f32 %v1516_v17, %v1520_v55  ;;  %1132 = vst.msk [vmem:[#allocation4 + $0xb8] sm:$0xff] %vm694_vm4, %v1115_v57  ;;  %v5133_v3 = vpop.f32.mrb[34].mxu0  ;;  %v1093_v9 = vmax.f32 %v1003_v62, 0.0  ;;  %v1522_v24 = vmax.f32 %v6511_v8, 0.0 }
 0x12a   : > { %v5081_v0 = vpop.f32.mrb[34].mxu1  ;;  %1562 = vst.msk [vmem:[#allocation4 + $0x138] sm:$0xff] %vm694_vm4, %v1545_v60  ;;  %1131 = vst.msk [vmem:[#allocation4 + $0xb0] sm:$0xff] %vm694_vm4, %v1114_v61  ;;  %v1437_v6 = vpop.f32.mrb[35].mxu0  ;;  %v6519_v11 = vadd.f32 %v5133_v3, %v6227_v15  ;;  %v1092_v19 = vmax.f32 %v998_v4, 0.0 }
 0x12b   : > { %v1007_v5 = vpop.f32.mrb[35].mxu1  ;;  %1561 = vst.msk [vmem:[#allocation4 + $0x130] sm:$0xff] %vm694_vm4, %v1544_v63  ;;  %v2312_v7 = vld [vmem:[#allocation2 + $0xb0] sm:$0xff]  ;;  %v6514_v10 = vadd.f32 %v5081_v0, %v6227_v15  ;;  %v6526_v27 = vadd.f32 %v6227_v15, %v1437_v6 }
 0x12c   : > { %2431 = vrot.lane.b32.xlu1 %v2312_v7, %s5714_s17  ;;  %2445 = vrot.lane.b32.xlu0 %v2319_v1, %s5714_s17  ;;  %v2348_v26 = vld [vmem:[#allocation2 + $0xb1] sm:$0xff]  ;;  %v2347_v25 = vld [vmem:[#allocation2 + $0xa9] sm:$0xff]  ;;  %v1525_v31 = vmax.f32 %v6519_v11, 0.0  ;;  %v1008_v32 = vadd.f32 %v6227_v15, %v1007_v5 }
 0x12d   : > { %v2093_v12 = vld [vmem:[#allocation4 + $0xa0] ss:$2 sm:$0xff]  ;;  %v2157_v51 = vld [vmem:[#allocation4 + $0xa1] ss:$2 sm:$0xff]  ;;  %v5136_v28 = vpop.f32.mrb[36].mxu0  ;;  %v1095_v29 = vmax.f32 %v6514_v10, 0.0 }
 0x12e   : > { %v5084_v13 = vpop.f32.mrb[36].mxu1  ;;  %v2210_v16 = vmax.f32 %v2093_v12, %v2157_v51  ;;  %v2109_v17 = vld [vmem:[#allocation4 + $0x120] ss:$2 sm:$0xff]  ;;  %v2173_v18 = vld [vmem:[#allocation4 + $0x121] ss:$2 sm:$0xff]  ;;  %v1453_v33 = vadd.f32 %v5136_v28, %v6227_v15  ;;  %v1447_v34 = vpop.f32.mrb[37].mxu0 }
 0x12f   : > { %v1023_v20 = vadd.f32 %v5084_v13, %v6227_v15  ;;  %v1017_v21 = vpop.f32.mrb[37].mxu1  ;;  %v2218_v22 = vmax.f32 %v2109_v17, %v2173_v18  ;;  %v2320_v35 = vld [vmem:[#allocation2 + $0x130] sm:$0xff]  ;;  %v1448_v40 = vadd.f32 %v6227_v15, %v1447_v34  ;;  %v1524_v56 = vmax.f32 %v6526_v27, 0.0 }
 0x130   : > { %v1018_v23 = vadd.f32 %v6227_v15, %v1017_v21  ;;  %2243 = vst.msk [vmem:[#allocation2 + $0xc8] sm:$0xff] %vm694_vm4, %v2210_v16  ;;  %2575 = vrot.lane.b32.xlu1 %v2348_v26, %s5715_s26  ;;  %2573 = vrot.lane.b32.xlu0 %v2347_v25, %s5715_s26  ;;  %v2355_v36 = vld [vmem:[#allocation2 + $0x129] sm:$0xff]  ;;  %v1527_v46 = vmax.f32 %v1453_v33, 0.0  ;;  %v2356_v62 = vld [vmem:[#allocation2 + $0x131] sm:$0xff]  ;;  %v1094_v2 = vmax.f32 %v1008_v32, 0.0 }
 0x131   : > { %v1097_v30 = vmax.f32 %v1023_v20, 0.0  ;;  %v2095_v37 = vld [vmem:[#allocation4 + $0xb0] ss:$2 sm:$0xff]  ;;  %v2159_v38 = vld [vmem:[#allocation4 + $0xb1] ss:$2 sm:$0xff]  ;;  %2251 = vst.msk [vmem:[#allocation2 + $0x148] sm:$0xff] %vm694_vm4, %v2218_v22 }
 0x132   : > { %v2111_v39 = vld [vmem:[#allocation4 + $0x130] ss:$2 sm:$0xff]  ;;  %v2211_v41 = vmax.f32 %v2095_v37, %v2159_v38  ;;  %v2175_v42 = vld [vmem:[#allocation4 + $0x131] ss:$2 sm:$0xff]  ;;  %v1096_v44 = vmax.f32 %v1018_v23, 0.0  ;;  %v5087_v45 = vpop.f32.mrb[38].mxu1  ;;  %v1547_v57 = vmax.f32 %v1523_v14, %v1527_v46 }
 0x133   : > { %v1117_v43 = vmax.f32 %v1093_v9, %v1097_v30  ;;  %v5139_v47 = vpop.f32.mrb[38].mxu0  ;;  %v2219_v48 = vmax.f32 %v2111_v39, %v2175_v42  ;;  %v1033_v49 = vadd.f32 %v5087_v45, %v6227_v15  ;;  %v1027_v50 = vpop.f32.mrb[39].mxu1  ;;  %v1526_v52 = vmax.f32 %v1448_v40, 0.0 }
 0x134   : > { %v1463_v53 = vadd.f32 %v5139_v47, %v6227_v15  ;;  %v1457_v54 = vpop.f32.mrb[39].mxu0  ;;  %2244 = vst.msk [vmem:[#allocation2 + $0xd0] sm:$0xff] %vm694_vm4, %v2211_v41  ;;  %v1116_v55 = vmax.f32 %v1092_v19, %v1096_v44  ;;  %v1028_v58 = vadd.f32 %v6227_v15, %v1027_v50  ;;  %2447 = vrot.lane.b32.xlu1 %v2320_v35, %s5714_s17  ;;  %1564 = vst.msk [vmem:[#allocation4 + $0x148] sm:$0xff] %vm694_vm4, %v1547_v57 }
 0x135   : > { %1134 = vst.msk [vmem:[#allocation4 + $0xc8] sm:$0xff] %vm694_vm4, %v1117_v43  ;;  %2589 = vrot.lane.b32.xlu0 %v2355_v36, %s5715_s26  ;;  %2252 = vst.msk [vmem:[#allocation2 + $0x150] sm:$0xff] %vm694_vm4, %v2219_v48  ;;  %v1099_v59 = vmax.f32 %v1033_v49, 0.0  ;;  %v1546_v60 = vmax.f32 %v1522_v24, %v1526_v52  ;;  %v1458_v0 = vadd.f32 %v6227_v15, %v1457_v54  ;;  %v5142_v1 = vpop.f32.mrb[40].mxu0  ;;  %v6572_v24 = vld [vmem:[%s7581_s2] ss:$0 sm:$0xff] }
 0x136   : > { %v5090_v61 = vpop.f32.mrb[40].mxu1  ;;  %v1529_v63 = vmax.f32 %v1463_v53, 0.0  ;;  %1133 = vst.msk [vmem:[#allocation4 + $0xc0] sm:$0xff] %vm694_vm4, %v1116_v55  ;;  %v1098_v3 = vmax.f32 %v1028_v58, 0.0  ;;  %v1467_v5 = vpop.f32.mrb[41].mxu0  ;;  %v6556_v14 = vadd.f32 %v5142_v1, %v6227_v15 }
 0x137   : > { %v1037_v4 = vpop.f32.mrb[41].mxu1  ;;  %v1119_v6 = vmax.f32 %v1095_v29, %v1099_v59  ;;  %1563 = vst.msk [vmem:[#allocation4 + $0x140] sm:$0xff] %vm694_vm4, %v1546_v60  ;;  %v2313_v7 = vld [vmem:[#allocation2 + $0xc8] sm:$0xff]  ;;  %v1528_v9 = vmax.f32 %v1458_v0, 0.0  ;;  %v1043_v11 = vadd.f32 %v5090_v61, %v6227_v15  ;;  %v6562_v21 = vadd.f32 %v6227_v15, %v1467_v5 }
 0x138   : > { %v1549_v8 = vmax.f32 %v1525_v31, %v1529_v63  ;;  %v1118_v10 = vmax.f32 %v1094_v2, %v1098_v3  ;;  %2591 = vrot.lane.b32.xlu1 %v2356_v62, %s5715_s26  ;;  %v2321_v13 = vld [vmem:[#allocation2 + $0x148] sm:$0xff]  ;;  %v1038_v17 = vadd.f32 %v6227_v15, %v1037_v4  ;;  %v1531_v29 = vmax.f32 %v6556_v14, 0.0 }
 0x139   : > { %2433 = vrot.lane.b32.xlu0 %v2313_v7, %s5714_s17  ;;  %1136 = vst.msk [vmem:[#allocation4 + $0xd8] sm:$0xff] %vm694_vm4, %v1119_v6  ;;  %v1548_v51 = vmax.f32 %v1524_v56, %v1528_v9  ;;  %v5145_v16 = vpop.f32.mrb[42].mxu0  ;;  %v1101_v22 = vmax.f32 %v1043_v11, 0.0  ;;  %v1530_v32 = vmax.f32 %v6562_v21, 0.0 }
 0x13a   : > { %v5093_v12 = vpop.f32.mrb[42].mxu1  ;;  %1566 = vst.msk [vmem:[#allocation4 + $0x158] sm:$0xff] %vm694_vm4, %v1549_v8  ;;  %1135 = vst.msk [vmem:[#allocation4 + $0xd0] sm:$0xff] %vm694_vm4, %v1118_v10  ;;  %v1477_v19 = vpop.f32.mrb[43].mxu0  ;;  %v6575_v26 = vadd.f32 %v6572_v24, %v5145_v16  ;;  %v1100_v33 = vmax.f32 %v1038_v17, 0.0 }
 0x13b   : > { %v1047_v18 = vpop.f32.mrb[43].mxu1  ;;  %1565 = vst.msk [vmem:[#allocation4 + $0x150] sm:$0xff] %vm694_vm4, %v1548_v51  ;;  %v2314_v20 = vld [vmem:[#allocation2 + $0xd0] sm:$0xff]  ;;  %v6565_v23 = vadd.f32 %v5093_v12, %v6227_v15  ;;  %v1478_v53 = vadd.f32 %v6572_v24, %v1477_v19 }
 0x13c   : > { %2435 = vrot.lane.b32.xlu1 %v2314_v20, %s5714_s17  ;;  %v1048_v37 = vadd.f32 %v6572_v24, %v1047_v18  ;;  %v2350_v39 = vld [vmem:[#allocation2 + $0xd1] sm:$0xff]  ;;  %v2349_v40 = vld [vmem:[#allocation2 + $0xc9] sm:$0xff]  ;;  %v1533_v44 = vmax.f32 %v6575_v26, 0.0 }
 0x13d   : > { %2449 = vrot.lane.b32.xlu0 %v2321_v13, %s5714_s17  ;;  %v2097_v25 = vld [vmem:[#allocation4 + $0xc0] ss:$2 sm:$0xff]  ;;  %v2161_v27 = vld [vmem:[#allocation4 + $0xc1] ss:$2 sm:$0xff]  ;;  %v5148_v41 = vpop.f32.mrb[44].mxu0  ;;  %v1103_v42 = vmax.f32 %v6565_v23, 0.0 }
 0x13e   : > { %v5096_v28 = vpop.f32.mrb[44].mxu1  ;;  %v2212_v30 = vmax.f32 %v2097_v25, %v2161_v27  ;;  %v2113_v15 = vld [vmem:[#allocation4 + $0x140] ss:$2 sm:$0xff]  ;;  %v2177_v31 = vld [vmem:[#allocation4 + $0x141] ss:$2 sm:$0xff]  ;;  %v1493_v45 = vadd.f32 %v6572_v24, %v5148_v41  ;;  %v1487_v46 = vpop.f32.mrb[45].mxu0 }
 0x13f   : > { %v1063_v34 = vadd.f32 %v6572_v24, %v5096_v28  ;;  %v1057_v35 = vpop.f32.mrb[45].mxu1  ;;  %v2220_v36 = vmax.f32 %v2113_v15, %v2177_v31  ;;  %v2322_v47 = vld [vmem:[#allocation2 + $0x150] sm:$0xff]  ;;  %v1488_v55 = vadd.f32 %v6572_v24, %v1487_v46  ;;  %v1102_v4 = vmax.f32 %v1048_v37, 0.0 }
 0x140   : > { %v1058_v38 = vadd.f32 %v6572_v24, %v1057_v35  ;;  %2245 = vst.msk [vmem:[#allocation2 + $0xe8] sm:$0xff] %vm694_vm4, %v2212_v30  ;;  %2579 = vrot.lane.b32.xlu1 %v2350_v39, %s5715_s26  ;;  %v2357_v48 = vld [vmem:[#allocation2 + $0x149] sm:$0xff]  ;;  %v1535_v61 = vmax.f32 %v1493_v45, 0.0  ;;  %v1532_v9 = vmax.f32 %v1478_v53, 0.0  ;;  %v2358_v51 = vld [vmem:[#allocation2 + $0x151] sm:$0xff] }
 0x141   : > { %v1105_v43 = vmax.f32 %v1063_v34, 0.0  ;;  %2577 = vrot.lane.b32.xlu0 %v2349_v40, %s5715_s26  ;;  %v2099_v49 = vld [vmem:[#allocation4 + $0xd0] ss:$2 sm:$0xff]  ;;  %v2163_v50 = vld [vmem:[#allocation4 + $0xd1] ss:$2 sm:$0xff]  ;;  %2253 = vst.msk [vmem:[#allocation2 + $0x168] sm:$0xff] %vm694_vm4, %v2220_v36 }
 0x142   : > { %v1104_v52 = vmax.f32 %v1058_v38, 0.0  ;;  %v5099_v54 = vpop.f32.mrb[46].mxu1  ;;  %v2213_v56 = vmax.f32 %v2099_v49, %v2163_v50  ;;  %v2115_v57 = vld [vmem:[#allocation4 + $0x150] ss:$2 sm:$0xff]  ;;  %v2179_v58 = vld [vmem:[#allocation4 + $0x151] ss:$2 sm:$0xff]  ;;  %v1551_v6 = vmax.f32 %v1531_v29, %v1535_v61 }
 0x143   : > { %v1121_v59 = vmax.f32 %v1101_v22, %v1105_v43  ;;  %v1073_v60 = vadd.f32 %v6572_v24, %v5099_v54  ;;  %v1067_v62 = vpop.f32.mrb[47].mxu1  ;;  %v2221_v63 = vmax.f32 %v2115_v57, %v2179_v58  ;;  %v1534_v2 = vmax.f32 %v1488_v55, 0.0  ;;  %v5151_v3 = vpop.f32.mrb[46].mxu0  ;;  %v6610_v22 = vld [vmem:[%s7581_s2] ss:$0 sm:$0xff] }
 0x144   : > { %v1120_v0 = vmax.f32 %v1100_v33, %v1104_v52  ;;  %v1068_v1 = vadd.f32 %v6572_v24, %v1067_v62  ;;  %2246 = vst.msk [vmem:[#allocation2 + $0xf0] sm:$0xff] %vm694_vm4, %v2213_v56  ;;  %2451 = vrot.lane.b32.xlu1 %v2322_v47, %s5714_s17  ;;  %v1503_v7 = vadd.f32 %v6572_v24, %v5151_v3  ;;  %v1497_v8 = vpop.f32.mrb[47].mxu0  ;;  %1568 = vst.msk [vmem:[#allocation4 + $0x168] sm:$0xff] %vm694_vm4, %v1551_v6 }
 0x145   : > { %1138 = vst.msk [vmem:[#allocation4 + $0xe8] sm:$0xff] %vm694_vm4, %v1121_v59  ;;  %v1107_v5 = vmax.f32 %v1073_v60, 0.0  ;;  %2593 = vrot.lane.b32.xlu0 %v2357_v48, %s5715_s26  ;;  %2254 = vst.msk [vmem:[#allocation2 + $0x170] sm:$0xff] %vm694_vm4, %v2221_v63  ;;  %v1550_v11 = vmax.f32 %v1530_v32, %v1534_v2  ;;  %v1498_v13 = vadd.f32 %v6572_v24, %v1497_v8  ;;  %v2734_v8 = vld [vmem:[%s7582_s3] sm:$0xff] }
 0x146   : > { %1137 = vst.msk [vmem:[#allocation4 + $0xe0] sm:$0xff] %vm694_vm4, %v1120_v0  ;;  %v1106_v10 = vmax.f32 %v1068_v1, 0.0  ;;  %v5158_v12 = vpop.f32.mrb[48].mxu1  ;;  %v1537_v17 = vmax.f32 %v1503_v7, 0.0 }
 0x147   : > { %v1123_v14 = vmax.f32 %v1103_v42, %v1107_v5  ;;  %v1777_v16 = vpop.f32.mrb[49].mxu1  ;;  %1567 = vst.msk [vmem:[#allocation4 + $0x160] sm:$0xff] %vm694_vm4, %v1550_v11  ;;  %v2315_v19 = vld [vmem:[#allocation2 + $0xe8] sm:$0xff]  ;;  %v1536_v20 = vmax.f32 %v1498_v13, 0.0  ;;  %v1783_v30 = vadd.f32 %v5158_v12, %v6610_v22 }
 0x148   : > { %v1122_v18 = vmax.f32 %v1102_v4, %v1106_v10  ;;  %2595 = vrot.lane.b32.xlu1 %v2358_v51, %s5715_s26  ;;  %v1553_v21 = vmax.f32 %v1533_v44, %v1537_v17  ;;  %v2323_v26 = vld [vmem:[#allocation2 + $0x168] sm:$0xff]  ;;  %v1778_v31 = vadd.f32 %v6610_v22, %v1777_v16 }
 0x149   : > { %1140 = vst.msk [vmem:[#allocation4 + $0xf8] sm:$0xff] %vm694_vm4, %v1123_v14  ;;  %2437 = vrot.lane.b32.xlu0 %v2315_v19, %s5714_s17  ;;  %v1552_v24 = vmax.f32 %v1532_v9, %v1536_v20  ;;  %v1937_v43 = vmax.f32 %v1783_v30, 0.0  ;;  %v2735_v9 = vld [vmem:[%s7582_s3 + $0x8] sm:$0xff] }
 0x14a   : > { %1139 = vst.msk [vmem:[#allocation4 + $0xf0] sm:$0xff] %vm694_vm4, %v1122_v18  ;;  %v5161_v23 = vpop.f32.mrb[50].mxu1  ;;  %1570 = vst.msk [vmem:[#allocation4 + $0x178] sm:$0xff] %vm694_vm4, %v1553_v21  ;;  %v1936_v47 = vmax.f32 %v1778_v31, 0.0  ;;  %v6643_v10 = vpack.c.bf16 %v2735_v9, %v2734_v8 }
 0x14b   : > { %v1787_v25 = vpop.f32.mrb[51].mxu1  ;;  %1569 = vst.msk [vmem:[#allocation4 + $0x170] sm:$0xff] %vm694_vm4, %v1552_v24  ;;  %v2316_v27 = vld [vmem:[#allocation2 + $0xf0] sm:$0xff]  ;;  %v1793_v44 = vadd.f32 %v5161_v23, %v6610_v22 }
 0x14c   : > { %2439 = vrot.lane.b32.xlu1 %v2316_v27, %s5714_s17  ;;  %v2352_v39 = vld [vmem:[#allocation2 + $0xf1] sm:$0xff]  ;;  %v2351_v40 = vld [vmem:[#allocation2 + $0xe9] sm:$0xff]  ;;  %v1788_v48 = vadd.f32 %v6610_v22, %v1787_v25  ;;  %5469 = vmatprep.subr.bf16.mxu0 %v6643_v10 }
 0x14d   : > { %v2101_v28 = vld [vmem:[#allocation4 + $0xe0] ss:$2 sm:$0xff]  ;;  %v2165_v29 = vld [vmem:[#allocation4 + $0xe1] ss:$2 sm:$0xff]  ;;  %2453 = vrot.lane.b32.xlu0 %v2323_v26, %s5714_s17  ;;  %v1939_v62 = vmax.f32 %v1793_v44, 0.0 }
 0x14e   : > { %v2214_v15 = vmax.f32 %v2101_v28, %v2165_v29  ;;  %v5164_v33 = vpop.f32.mrb[52].mxu1  ;;  %v2117_v34 = vld [vmem:[#allocation4 + $0x160] ss:$2 sm:$0xff]  ;;  %v2181_v35 = vld [vmem:[#allocation4 + $0x161] ss:$2 sm:$0xff]  ;;  %v1938_v0 = vmax.f32 %v1788_v48, 0.0 }
 0x14f   : > { %v1803_v36 = vadd.f32 %v5164_v33, %v6610_v22  ;;  %v1797_v37 = vpop.f32.mrb[53].mxu1  ;;  %v2222_v38 = vmax.f32 %v2117_v34, %v2181_v35  ;;  %v2324_v52 = vld [vmem:[#allocation2 + $0x170] sm:$0xff] }
 0x150   : > { %2247 = vst.msk [vmem:[#allocation2 + $0x108] sm:$0xff] %vm694_vm4, %v2214_v15  ;;  %v1798_v32 = vadd.f32 %v6610_v22, %v1797_v37  ;;  %2583 = vrot.lane.b32.xlu1 %v2352_v39, %s5715_s26  ;;  %v2359_v53 = vld [vmem:[#allocation2 + $0x169] sm:$0xff]  ;;  %v2360_v3 = vld [vmem:[#allocation2 + $0x171] sm:$0xff] }
 0x151   : > { %v2103_v41 = vld [vmem:[#allocation4 + $0xf0] ss:$2 sm:$0xff]  ;;  %v2167_v42 = vld [vmem:[#allocation4 + $0xf1] ss:$2 sm:$0xff]  ;;  %v1941_v45 = vmax.f32 %v1803_v36, 0.0  ;;  %2581 = vrot.lane.b32.xlu0 %v2351_v40, %s5715_s26  ;;  %2255 = vst.msk [vmem:[#allocation2 + $0x188] sm:$0xff] %vm694_vm4, %v2222_v38 }
 0x152   : > { %v2215_v46 = vmax.f32 %v2103_v41, %v2167_v42  ;;  %v1940_v49 = vmax.f32 %v1798_v32, 0.0  ;;  %v5167_v50 = vpop.f32.mrb[54].mxu1  ;;  %v2119_v54 = vld [vmem:[#allocation4 + $0x170] ss:$2 sm:$0xff]  ;;  %v2183_v55 = vld [vmem:[#allocation4 + $0x171] ss:$2 sm:$0xff] }
 0x153   : > { %v1969_v56 = vmax.f32 %v1937_v43, %v1941_v45  ;;  %v1813_v57 = vadd.f32 %v5167_v50, %v6610_v22  ;;  %v1807_v58 = vpop.f32.mrb[55].mxu1  ;;  %v2223_v59 = vmax.f32 %v2119_v54, %v2183_v55 }
 0x154   : > { %2248 = vst.msk [vmem:[#allocation2 + $0x110] sm:$0xff] %vm694_vm4, %v2215_v46  ;;  %v1968_v60 = vmax.f32 %v1936_v47, %v1940_v49  ;;  %v1808_v61 = vadd.f32 %v6610_v22, %v1807_v58  ;;  %2455 = vrot.lane.b32.xlu1 %v2324_v52, %s5714_s17 }
 0x155   : > { %1986 = vst.msk [vmem:[#allocation4 + $0x188] sm:$0xff] %vm694_vm4, %v1969_v56  ;;  %v1943_v63 = vmax.f32 %v1813_v57, 0.0  ;;  %2597 = vrot.lane.b32.xlu0 %v2359_v53, %s5715_s26  ;;  %2256 = vst.msk [vmem:[#allocation2 + $0x190] sm:$0xff] %vm694_vm4, %v2223_v59 }
 0x156   : > { %1985 = vst.msk [vmem:[#allocation4 + $0x180] sm:$0xff] %vm694_vm4, %v1968_v60  ;;  %v1942_v1 = vmax.f32 %v1808_v61, 0.0  ;;  %v5170_v2 = vpop.f32.mrb[56].mxu1 }
 0x157   : > { %v1971_v4 = vmax.f32 %v1939_v62, %v1943_v63  ;;  %v1817_v5 = vpop.f32.mrb[57].mxu1  ;;  %v2317_v6 = vld [vmem:[#allocation2 + $0x108] sm:$0xff]  ;;  %v1823_v17 = vadd.f32 %v5170_v2, %v6610_v22 }
 0x158   : > { %v1970_v7 = vmax.f32 %v1938_v0, %v1942_v1  ;;  %2599 = vrot.lane.b32.xlu1 %v2360_v3, %s5715_s26  ;;  %v2325_v12 = vld [vmem:[#allocation2 + $0x188] sm:$0xff]  ;;  %v1818_v19 = vadd.f32 %v6610_v22, %v1817_v5 }
 0x159   : > { %1988 = vst.msk [vmem:[#allocation4 + $0x198] sm:$0xff] %vm694_vm4, %v1971_v4  ;;  %2441 = vrot.lane.b32.xlu0 %v2317_v6, %s5714_s17  ;;  %v1945_v29 = vmax.f32 %v1823_v17, 0.0 }
 0x15a   : > { %1987 = vst.msk [vmem:[#allocation4 + $0x190] sm:$0xff] %vm694_vm4, %v1970_v7  ;;  %v5173_v11 = vpop.f32.mrb[58].mxu1  ;;  %v1944_v33 = vmax.f32 %v1818_v19, 0.0 }
 0x15b   : > { %v1827_v51 = vpop.f32.mrb[59].mxu1  ;;  %v2318_v13 = vld [vmem:[#allocation2 + $0x110] sm:$0xff]  ;;  %v1833_v30 = vadd.f32 %v5173_v11, %v6610_v22 }
 0x15c   : > { %2443 = vrot.lane.b32.xlu1 %v2318_v13, %s5714_s17  ;;  %v2354_v26 = vld [vmem:[#allocation2 + $0x111] sm:$0xff]  ;;  %v2353_v25 = vld [vmem:[#allocation2 + $0x109] sm:$0xff]  ;;  %v1828_v34 = vadd.f32 %v6610_v22, %v1827_v51 }
 0x15d   : > { %v2121_v14 = vld [vmem:[#allocation4 + $0x180] ss:$2 sm:$0xff]  ;;  %v2185_v16 = vld [vmem:[#allocation4 + $0x181] ss:$2 sm:$0xff]  ;;  %2457 = vrot.lane.b32.xlu0 %v2325_v12, %s5714_s17  ;;  %v1947_v43 = vmax.f32 %v1833_v30, 0.0 }
 0x15e   : > { %v2224_v18 = vmax.f32 %v2121_v14, %v2185_v16  ;;  %v5176_v20 = vpop.f32.mrb[60].mxu1  ;;  %v2326_v37 = vld [vmem:[#allocation2 + $0x190] sm:$0xff]  ;;  %v1946_v45 = vmax.f32 %v1828_v34, 0.0 }
 0x15f   : > { %v1843_v21 = vadd.f32 %v5176_v20, %v6610_v22  ;;  %v1837_v23 = vpop.f32.mrb[61].mxu1  ;;  %v2361_v38 = vld [vmem:[#allocation2 + $0x189] sm:$0xff]  ;;  %v2362_v48 = vld [vmem:[#allocation2 + $0x191] sm:$0xff]  ;;  %v6682_v20 = vpop.permute.xlu0 %2409 }
 0x160   : > { %2257 = vst.msk [vmem:[#allocation2 + $0x1a8] sm:$0xff] %vm694_vm4, %v2224_v18  ;;  %v1838_v24 = vadd.f32 %v6610_v22, %v1837_v23  ;;  %2587 = vrot.lane.b32.xlu1 %v2354_v26, %s5715_s26 }
 0x161   : > { %v2123_v27 = vld [vmem:[#allocation4 + $0x190] ss:$2 sm:$0xff]  ;;  %v2187_v28 = vld [vmem:[#allocation4 + $0x191] ss:$2 sm:$0xff]  ;;  %v1949_v15 = vmax.f32 %v1843_v21, 0.0  ;;  %2585 = vrot.lane.b32.xlu0 %v2353_v25, %s5715_s26 }
 0x162   : > { %v2225_v31 = vmax.f32 %v2123_v27, %v2187_v28  ;;  %v1948_v35 = vmax.f32 %v1838_v24, 0.0  ;;  %v5179_v36 = vpop.f32.mrb[62].mxu1 }
 0x163   : > { %v1973_v32 = vmax.f32 %v1945_v29, %v1949_v15  ;;  %v1853_v39 = vadd.f32 %v5179_v36, %v6610_v22  ;;  %v1847_v40 = vpop.f32.mrb[63].mxu1  ;;  %v6687_v15 = vpop.permute.xlu1 %2411 }
 0x164   : > { %2258 = vst.msk [vmem:[#allocation2 + $0x1b0] sm:$0xff] %vm694_vm4, %v2225_v31  ;;  %v1972_v41 = vmax.f32 %v1944_v33, %v1948_v35  ;;  %v1848_v42 = vadd.f32 %v6610_v22, %v1847_v40  ;;  %2459 = vrot.lane.b32.xlu1 %v2326_v37, %s5714_s17 }
 0x165   : > { %1990 = vst.msk [vmem:[#allocation4 + $0x1a8] sm:$0xff] %vm694_vm4, %v1973_v32  ;;  %v1951_v44 = vmax.f32 %v1853_v39, 0.0  ;;  %2601 = vrot.lane.b32.xlu0 %v2361_v38, %s5715_s26  ;;  %v2267_v39 = vld [vmem:[#allocation2 + $0x27] sm:$0xff] }
 0x166   : > { %1989 = vst.msk [vmem:[#allocation4 + $0x1a0] sm:$0xff] %vm694_vm4, %v1972_v41  ;;  %v1950_v46 = vmax.f32 %v1848_v42, 0.0  ;;  %v5182_v47 = vpop.f32.mrb[64].mxu1 }
 0x167   : > { %v1975_v49 = vmax.f32 %v1947_v43, %v1951_v44  ;;  %v1857_v50 = vpop.f32.mrb[65].mxu1  ;;  %v2327_v52 = vld [vmem:[#allocation2 + $0x1a8] sm:$0xff]  ;;  %v1863_v60 = vadd.f32 %v5182_v47, %v6610_v22 }
 0x168   : > { %v1974_v53 = vmax.f32 %v1946_v45, %v1950_v46  ;;  %2603 = vrot.lane.b32.xlu1 %v2362_v48, %s5715_s26  ;;  %v1858_v62 = vadd.f32 %v6610_v22, %v1857_v50 }
 0x169   : > { %1992 = vst.msk [vmem:[#allocation4 + $0x1b8] sm:$0xff] %vm694_vm4, %v1975_v49  ;;  %2461 = vrot.lane.b32.xlu0 %v2327_v52, %s5714_s17  ;;  %v1953_v6 = vmax.f32 %v1863_v60, 0.0  ;;  %v2736_v52 = vld [vmem:[%s7582_s3 + $0x10] sm:$0xff] }
 0x16a   : > { %1991 = vst.msk [vmem:[#allocation4 + $0x1b0] sm:$0xff] %vm694_vm4, %v1974_v53  ;;  %v5185_v54 = vpop.f32.mrb[66].mxu1  ;;  %v1952_v11 = vmax.f32 %v1858_v62, 0.0  ;;  %v2737_v53 = vld [vmem:[%s7582_s3 + $0x18] sm:$0xff] }
 0x16b   : > { %v1867_v55 = vpop.f32.mrb[67].mxu1  ;;  %v2328_v56 = vld [vmem:[#allocation2 + $0x1b0] sm:$0xff]  ;;  %v1873_v7 = vadd.f32 %v5185_v54, %v6610_v22 }
 0x16c   : > { %v2363_v57 = vld [vmem:[#allocation2 + $0x1a9] sm:$0xff]  ;;  %2463 = vrot.lane.b32.xlu1 %v2328_v56, %s5714_s17  ;;  %v2364_v3 = vld [vmem:[#allocation2 + $0x1b1] sm:$0xff]  ;;  %v1868_v12 = vadd.f32 %v6610_v22, %v1867_v55 }
 0x16d   : > { %v2125_v58 = vld [vmem:[#allocation4 + $0x1a0] ss:$2 sm:$0xff]  ;;  %v2189_v59 = vld [vmem:[#allocation4 + $0x1a1] ss:$2 sm:$0xff]  ;;  %2605 = vrot.lane.b32.xlu0 %v2363_v57, %s5715_s26  ;;  %v1955_v21 = vmax.f32 %v1873_v7, 0.0 }
 0x16e   : > { %v2226_v61 = vmax.f32 %v2125_v58, %v2189_v59  ;;  %v5188_v63 = vpop.f32.mrb[68].mxu1  ;;  %v1954_v24 = vmax.f32 %v1868_v12, 0.0 }
 0x16f   : > { %v1883_v0 = vadd.f32 %v5188_v63, %v6610_v22  ;;  %v1877_v1 = vpop.f32.mrb[69].mxu1 }
 0x170   : > { %2259 = vst.msk [vmem:[#allocation2 + $0x1c8] sm:$0xff] %vm694_vm4, %v2226_v61  ;;  %v1878_v2 = vadd.f32 %v6610_v22, %v1877_v1  ;;  %2607 = vrot.lane.b32.xlu1 %v2364_v3, %s5715_s26 }
 0x171   : > { %v2127_v4 = vld [vmem:[#allocation4 + $0x1b0] ss:$2 sm:$0xff]  ;;  %v2191_v5 = vld [vmem:[#allocation4 + $0x1b1] ss:$2 sm:$0xff]  ;;  %v1957_v8 = vmax.f32 %v1883_v0, 0.0 }
 0x172   : > { %v2227_v9 = vmax.f32 %v2127_v4, %v2191_v5  ;;  %v1956_v51 = vmax.f32 %v1878_v2, 0.0  ;;  %v5191_v13 = vpop.f32.mrb[70].mxu1  ;;  %v2268_v4 = vld [vmem:[#allocation2 + $0x2f] sm:$0xff] }
 0x173   : > { %v1977_v14 = vmax.f32 %v1953_v6, %v1957_v8  ;;  %v1893_v16 = vadd.f32 %v5191_v13, %v6610_v22  ;;  %v1887_v17 = vpop.f32.mrb[71].mxu1 }
 0x174   : > { %2260 = vst.msk [vmem:[#allocation2 + $0x1d0] sm:$0xff] %vm694_vm4, %v2227_v9  ;;  %v1976_v18 = vmax.f32 %v1952_v11, %v1956_v51  ;;  %v1888_v19 = vadd.f32 %v6610_v22, %v1887_v17  ;;  %v5472_v9 = vpack.c.bf16 %v2737_v53, %v2736_v52  ;;  %v2739_v17 = vld [vmem:[%s7582_s3 + $0x28] sm:$0xff] }
 0x175   : > { %1994 = vst.msk [vmem:[#allocation4 + $0x1c8] sm:$0xff] %vm694_vm4, %v1977_v14  ;;  %v1959_v23 = vmax.f32 %v1893_v16, 0.0 }
 0x176   : > { %1993 = vst.msk [vmem:[#allocation4 + $0x1c0] sm:$0xff] %vm694_vm4, %v1976_v18  ;;  %v1958_v26 = vmax.f32 %v1888_v19, 0.0  ;;  %v5194_v25 = vpop.f32.mrb[72].mxu1 }
 0x177   : > { %v1979_v27 = vmax.f32 %v1955_v21, %v1959_v23  ;;  %v1897_v28 = vpop.f32.mrb[73].mxu1  ;;  %v2329_v29 = vld [vmem:[#allocation2 + $0x1c8] sm:$0xff]  ;;  %v1903_v32 = vadd.f32 %v5194_v25, %v6610_v22  ;;  %v2741_v25 = vld [vmem:[%s7582_s3 + $0x38] sm:$0xff] }
 0x178   : > { %v1978_v30 = vmax.f32 %v1954_v24, %v1958_v26  ;;  %2465 = vrot.lane.b32.xlu0 %v2329_v29, %s5714_s17  ;;  %v1898_v41 = vadd.f32 %v6610_v22, %v1897_v28  ;;  %v2740_v26 = vld [vmem:[%s7582_s3 + $0x30] sm:$0xff] }
 0x179   : > { %1996 = vst.msk [vmem:[#allocation4 + $0x1d8] sm:$0xff] %vm694_vm4, %v1979_v27  ;;  %v2414_v33 = vpop.permute.xlu0 %2413  ;;  %v1961_v56 = vmax.f32 %v1903_v32, 0.0 }
 0x17a   : > { %1995 = vst.msk [vmem:[#allocation4 + $0x1d0] sm:$0xff] %vm694_vm4, %v1978_v30  ;;  %v5197_v31 = vpop.f32.mrb[74].mxu1  ;;  %v2663_v42 = vsel %vm694_vm4, %v2267_v39, %v2414_v33  ;;  %v1960_v60 = vmax.f32 %v1898_v41, 0.0  ;;  %v5480_v30 = vpack.c.bf16 %v2741_v25, %v2740_v26 }
 0x17b   : > { %v1907_v34 = vpop.f32.mrb[75].mxu1  ;;  %v2330_v35 = vld [vmem:[#allocation2 + $0x1d0] sm:$0xff]  ;;  %v1913_v57 = vadd.f32 %v5197_v31, %v6610_v22  ;;  %v2742_v31 = vld [vmem:[%s7582_s3 + $0x40] sm:$0xff] }
 0x17c   : > { %v2365_v36 = vld [vmem:[#allocation2 + $0x1c9] sm:$0xff]  ;;  %2467 = vrot.lane.b32.xlu1 %v2330_v35, %s5714_s17  ;;  %v2366_v49 = vld [vmem:[#allocation2 + $0x1d1] sm:$0xff]  ;;  %v1908_v61 = vadd.f32 %v6610_v22, %v1907_v34 }
 0x17d   : > { %2609 = vrot.lane.b32.xlu0 %v2365_v36, %s5715_s26  ;;  %v2129_v37 = vld [vmem:[#allocation4 + $0x1c0] ss:$2 sm:$0xff]  ;;  %v2193_v38 = vld [vmem:[#allocation4 + $0x1c1] ss:$2 sm:$0xff]  ;;  %v2558_v44 = vpop.permute.xlu1 %2557  ;;  %v6700_v47 = vpop.permute.xlu0 %2421  ;;  %v1963_v11 = vmax.f32 %v1913_v57, 0.0  ;;  %v2743_v35 = vld [vmem:[%s7582_s3 + $0x48] sm:$0xff] }
 0x17e   : > { %v2228_v40 = vmax.f32 %v2129_v37, %v2193_v38  ;;  %v5200_v43 = vpop.f32.mrb[76].mxu1  ;;  %v6698_v46 = vsel %vm2697_vm5, %v2663_v42, %v2558_v44  ;;  %v1962_v13 = vmax.f32 %v1908_v61, 0.0  ;;  %v5484_v39 = vpack.c.bf16 %v2743_v35, %v2742_v31  ;;  %v2371_v31 = vld [vmem:[#allocation2 + $0x229] sm:$0xff]  ;;  %v2372_v35 = vld [vmem:[#allocation2 + $0x231] sm:$0xff] }
 0x17f   : > { %v1923_v45 = vadd.f32 %v5200_v43, %v6610_v22  ;;  %v1917_v48 = vpop.f32.mrb[77].mxu1  ;;  %5228 = vmatprep.mubr.msk.f32.mxu0 %vm2759_vm6, %v6698_v46  ;;  %v2745_v43 = vld [vmem:[%s7582_s3 + $0x58] sm:$0xff] }
 0x180   : > { %2261 = vst.msk [vmem:[#allocation2 + $0x1e8] sm:$0xff] %vm694_vm4, %v2228_v40  ;;  %v1918_v50 = vadd.f32 %v6610_v22, %v1917_v48  ;;  %2611 = vrot.lane.b32.xlu1 %v2366_v49, %s5715_s26  ;;  %v2744_v40 = vld [vmem:[%s7582_s3 + $0x50] sm:$0xff] }
 0x181   : > { %v2131_v54 = vld [vmem:[#allocation4 + $0x1d0] ss:$2 sm:$0xff]  ;;  %v2195_v55 = vld [vmem:[#allocation4 + $0x1d1] ss:$2 sm:$0xff]  ;;  %v1965_v58 = vmax.f32 %v1923_v45, 0.0  ;;  %v2560_v0 = vpop.permute.xlu1 %2559  ;;  %v2416_v3 = vpop.permute.xlu0 %2415  ;;  %v5488_v57 = vpack.c.bf16 %v2745_v43, %v2744_v40 }
 0x182   : > { %v2229_v59 = vmax.f32 %v2131_v54, %v2195_v55  ;;  %v1964_v62 = vmax.f32 %v1918_v50, 0.0  ;;  %v5203_v63 = vpop.f32.mrb[78].mxu1  ;;  %v2664_v7 = vsel %vm694_vm4, %v2268_v4, %v2416_v3  ;;  %v2269_v45 = vld [vmem:[#allocation2 + $0x47] sm:$0xff]  ;;  %v2270_v48 = vld [vmem:[#allocation2 + $0x4f] sm:$0xff] }
 0x183   : > { %v1981_v1 = vmax.f32 %v1961_v56, %v1965_v58  ;;  %v1933_v2 = vadd.f32 %v5203_v63, %v6610_v22  ;;  %v1927_v5 = vpop.f32.mrb[79].mxu1  ;;  %v6721_v51 = vsel %vm2697_vm5, %v2664_v7, %v2560_v0  ;;  %v2271_v54 = vld [vmem:[#allocation2 + $0x67] sm:$0xff]  ;;  %v2278_v40 = vld [vmem:[#allocation2 + $0xcf] sm:$0xff] }
 0x184   : > { %2262 = vst.msk [vmem:[#allocation2 + $0x1f0] sm:$0xff] %vm694_vm4, %v2229_v59  ;;  %v1980_v6 = vmax.f32 %v1960_v60, %v1964_v62  ;;  %v1928_v8 = vadd.f32 %v6610_v22, %v1927_v5  ;;  %5229 = vmatmul.mubr.msk.f32.vlgmr.msra.gmra.mrb[48].mxu0 %vm2759_vm6, %v6721_v51  ;;  %v2738_v22 = vld [vmem:[%s7582_s3 + $0x20] sm:$0xff]  ;;  %v2667_v58 = vsel %vm694_vm4, %v2271_v54, %v6700_v47  ;;  %v2272_v60 = vld [vmem:[#allocation2 + $0x6f] sm:$0xff] }
 0x185   : > { %1998 = vst.msk [vmem:[#allocation4 + $0x1e8] sm:$0xff] %vm694_vm4, %v1981_v1  ;;  %v1967_v12 = vmax.f32 %v1933_v2, 0.0  ;;  %v6726_v16 = vpop.permute.xlu1 %2423  ;;  %v2566_v19 = vpop.permute.xlu0 %2565  ;;  %5471 = vmatpush3.bf16.msra.mxu0 %v6643_v10  ;;  %v5476_v24 = vpack.c.bf16 %v2739_v17, %v2738_v22  ;;  %v4606_v47 = vld [vmem:[%s7582_s3 + $0xc0] sm:$0xff]  ;;  %v4607_v2 = vld [vmem:[%s7582_s3 + $0xc8] sm:$0xff] }
 0x186   : > { %1997 = vst.msk [vmem:[#allocation4 + $0x1e0] sm:$0xff] %vm694_vm4, %v1980_v6  ;;  %v1966_v14 = vmax.f32 %v1928_v8, 0.0  ;;  %5473 = vmatprep.subr.bf16.mxu0 %v5472_v9  ;;  %v6774_v59 = vsel %vm2697_vm5, %v2667_v58, %v2566_v19  ;;  %v2668_v0 = vsel %vm694_vm4, %v2272_v60, %v6726_v16  ;;  %v2273_v1 = vld [vmem:[#allocation2 + $0x87] sm:$0xff]  ;;  %v6793_v5 = vpack.c.bf16 %v4607_v2, %v4606_v47  ;;  %v2274_v6 = vld [vmem:[#allocation2 + $0x8f] sm:$0xff] }
 0x187   : > { %v1983_v18 = vmax.f32 %v1963_v11, %v1967_v12  ;;  %v2331_v21 = vld [vmem:[#allocation2 + $0x1e8] sm:$0xff]  ;;  %v2338_v19 = vld [vmem:[#allocation2 + $0x11] sm:$0xff] }
 0x188   : > { %v1982_v23 = vmax.f32 %v1962_v13, %v1966_v14  ;;  %2469 = vrot.lane.b32.xlu0 %v2331_v21, %s5714_s17  ;;  %v2337_v16 = vld [vmem:[#allocation2 + $0x9] sm:$0xff] }
 0x189   : > { %2000 = vst.msk [vmem:[#allocation4 + $0x1f8] sm:$0xff] %vm694_vm4, %v1983_v18  ;;  %v2568_v27 = vpop.permute.xlu1 %2567  ;;  %v2418_v28 = vpop.permute.xlu0 %2417  ;;  %5475 = vmatpush3.bf16.msra.mxu0 %v5472_v9  ;;  %v2335_v21 = vld [vmem:[#allocation2 + $0x228] sm:$0xff] }
 0x18a   : > { %1999 = vst.msk [vmem:[#allocation4 + $0x1f0] sm:$0xff] %vm694_vm4, %v1982_v23  ;;  %5477 = vmatprep.subr.bf16.mxu0 %v5476_v24  ;;  %v2665_v49 = vsel %vm694_vm4, %v2269_v45, %v2418_v28  ;;  %v6790_v3 = vsel %vm2697_vm5, %v2668_v0, %v2568_v27  ;;  %v2275_v23 = vld [vmem:[#allocation2 + $0xa7] sm:$0xff]  ;;  %v2280_v60 = vld [vmem:[#allocation2 + $0xef] sm:$0xff] }
 0x18b   : > { %v2332_v10 = vld [vmem:[#allocation2 + $0x1f0] sm:$0xff]  ;;  %v2279_v58 = vld [vmem:[#allocation2 + $0xe7] sm:$0xff] }
 0x18c   : > { %v2367_v29 = vld [vmem:[#allocation2 + $0x1e9] sm:$0xff]  ;;  %2471 = vrot.lane.b32.xlu1 %v2332_v10, %s5714_s17  ;;  %v2368_v32 = vld [vmem:[#allocation2 + $0x1f1] sm:$0xff] }
 0x18d   : > { %2613 = vrot.lane.b32.xlu0 %v2367_v29, %s5715_s26  ;;  %v2133_v33 = vld [vmem:[#allocation4 + $0x1e0] ss:$2 sm:$0xff]  ;;  %v2197_v34 = vld [vmem:[#allocation4 + $0x1e1] ss:$2 sm:$0xff]  ;;  %v2426_v38 = vpop.permute.xlu0 %2425  ;;  %5479 = vmatpush3.bf16.msra.mxu0 %v5476_v24 }
 0x18e   : > { %v2230_v36 = vmax.f32 %v2133_v33, %v2197_v34  ;;  %v2420_v37 = vpop.permute.xlu1 %2419  ;;  %5481 = vmatprep.subr.bf16.mxu0 %v5480_v30  ;;  %v2669_v4 = vsel %vm694_vm4, %v2273_v1, %v2426_v38  ;;  %v2276_v24 = vld [vmem:[#allocation2 + $0xaf] sm:$0xff] }
 0x18f   : > { %v2666_v50 = vsel %vm694_vm4, %v2270_v48, %v2420_v37 }
 0x190   : > { %2263 = vst.msk [vmem:[#allocation2 + $0x208] sm:$0xff] %vm694_vm4, %v2230_v36  ;;  %2615 = vrot.lane.b32.xlu1 %v2368_v32, %s5715_s26 }
 0x191   : > { %v2135_v41 = vld [vmem:[#allocation4 + $0x1f0] ss:$2 sm:$0xff]  ;;  %v2199_v42 = vld [vmem:[#allocation4 + $0x1f1] ss:$2 sm:$0xff]  ;;  %v2562_v53 = vpop.permute.xlu0 %2561  ;;  %5483 = vmatpush3.bf16.msra.mxu0 %v5480_v30  ;;  %v2336_v30 = vld [vmem:[#allocation2 + $0x230] sm:$0xff] }
 0x192   : > { %v2231_v44 = vmax.f32 %v2135_v41, %v2199_v42  ;;  %v2564_v52 = vpop.permute.xlu1 %2563  ;;  %v6767_v56 = vsel %vm2697_vm5, %v2665_v49, %v2562_v53  ;;  %5485 = vmatprep.subr.bf16.mxu0 %v5484_v39 }
 0x193   : > { %v6764_v55 = vsel %vm2697_vm5, %v2666_v50, %v2564_v52  ;;  %5231 = vmatprep.mubr.msk.f32.mxu0 %vm2759_vm6, %v6767_v56 }
 0x194   : > { %2264 = vst.msk [vmem:[#allocation2 + $0x210] sm:$0xff] %vm694_vm4, %v2231_v44  ;;  %5232 = vmatmul.mubr.msk.f32.gmra.mrb[50].mxu0 %vm2759_vm6, %v6764_v55 }
 0x195   : > { %v2570_v62 = vpop.permute.xlu0 %2569  ;;  %5234 = vmatprep.mubr.msk.f32.mxu0 %vm2759_vm6, %v6774_v59  ;;  %5487 = vmatpush3.bf16.msra.mxu0 %v5484_v39  ;;  %v2277_v39 = vld [vmem:[#allocation2 + $0xc7] sm:$0xff] }
 0x196   : > { %v2428_v61 = vpop.permute.xlu1 %2427  ;;  %5489 = vmatprep.subr.bf16.mxu0 %v5488_v57  ;;  %v6796_v7 = vsel %vm2697_vm5, %v2669_v4, %v2570_v62 }
 0x197   : > { %v2333_v63 = vld [vmem:[#allocation2 + $0x208] sm:$0xff]  ;;  %v2670_v8 = vsel %vm694_vm4, %v2274_v6, %v2428_v61 }
 0x198   : > { %2473 = vrot.lane.b32.xlu0 %v2333_v63, %s5714_s17  ;;  %5235 = vmatmul.mubr.msk.f32.gmra.mrb[52].mxu0 %vm2759_vm6, %v6790_v3 }
 0x199   : > { %5237 = vmatprep.mubr.msk.f32.mxu0 %vm2759_vm6, %v6796_v7  ;;  %5491 = vmatpush3.bf16.msra.mxu0 %v5488_v57 }
 0x19a   : > { %v2572_v9 = vpop.permute.xlu1 %2571  ;;  %v2430_v11 = vpop.permute.xlu0 %2429  ;;  %5493 = vmatprep.subr.bf16.mxu0 %v6793_v5 }
 0x19b   : > { %v2334_v12 = vld [vmem:[#allocation2 + $0x210] sm:$0xff]  ;;  %v6804_v14 = vsel %vm2697_vm5, %v2670_v8, %v2572_v9  ;;  %v2671_v26 = vsel %vm694_vm4, %v2275_v23, %v2430_v11 }
 0x19c   : > { %v2369_v13 = vld [vmem:[#allocation2 + $0x209] sm:$0xff]  ;;  %2475 = vrot.lane.b32.xlu1 %v2334_v12, %s5714_s17  ;;  %5238 = vmatmul.mubr.msk.f32.gmra.mrb[54].mxu0 %vm2759_vm6, %v6804_v14  ;;  %v2370_v18 = vld [vmem:[#allocation2 + $0x211] sm:$0xff] }
 0x19d   : > { %2617 = vrot.lane.b32.xlu0 %v2369_v13, %s5715_s26  ;;  %v2281_v12 = vld [vmem:[#allocation2 + $0x107] sm:$0xff]  ;;  %v2282_v13 = vld [vmem:[#allocation2 + $0x10f] sm:$0xff] }
 0x19e   : > { %v2432_v22 = vpop.permute.xlu1 %2431  ;;  %v6811_v17 = vpop.permute.xlu0 %2445 }
 0x19f   : > { %v2672_v25 = vsel %vm694_vm4, %v2276_v24, %v2432_v22 }
 0x1a0   : > { %2619 = vrot.lane.b32.xlu1 %v2370_v18, %s5715_s26 }
 0x1a1   : > { %2553 = vrot.lane.b32.xlu0 %v2337_v16, %s5715_s26 }
 0x1a2   : > { %v2576_v27 = vpop.permute.xlu1 %2575  ;;  %v2574_v28 = vpop.permute.xlu0 %2573 }
 0x1a3   : > { %v6818_v10 = vsel %vm2697_vm5, %v2672_v25, %v2576_v27  ;;  %v6821_v29 = vsel %vm2697_vm5, %v2671_v26, %v2574_v28  ;;  %v2284_v27 = vld [vmem:[#allocation2 + $0x12f] sm:$0xff] }
 0x1a4   : > { %2555 = vrot.lane.b32.xlu1 %v2338_v19, %s5715_s26  ;;  %5240 = vmatprep.mubr.msk.f32.mxu0 %vm2759_vm6, %v6821_v29 }
 0x1a5   : > { %2477 = vrot.lane.b32.xlu0 %v2335_v21, %s5714_s17  ;;  %5241 = vmatmul.mubr.msk.f32.gmra.mrb[56].mxu0 %vm2759_vm6, %v6818_v10  ;;  %v2283_v21 = vld [vmem:[#allocation2 + $0x127] sm:$0xff] }
 0x1a6   : > { %v2448_v33 = vpop.permute.xlu1 %2447  ;;  %v2679_v26 = vsel %vm694_vm4, %v2283_v21, %v6811_v17 }
 0x1a7   : > { %v2590_v34 = vpop.permute.xlu0 %2589 }
 0x1a8   : > { %2479 = vrot.lane.b32.xlu1 %v2336_v30, %s5714_s17  ;;  %v6869_v25 = vsel %vm2697_vm5, %v2679_v26, %v2590_v34 }
 0x1a9   : > { %2621 = vrot.lane.b32.xlu0 %v2371_v31, %s5715_s26  ;;  %v2680_v31 = vsel %vm694_vm4, %v2284_v27, %v2448_v33  ;;  %v2287_v33 = vld [vmem:[#allocation2 + $0x167] sm:$0xff] }
 0x1aa   : > { %v2592_v36 = vpop.permute.xlu1 %2591 }
 0x1ab   : > { %v2434_v37 = vpop.permute.xlu0 %2433  ;;  %v6877_v17 = vsel %vm2697_vm5, %v2680_v31, %v2592_v36 }
 0x1ac   : > { %2623 = vrot.lane.b32.xlu1 %v2372_v35, %s5715_s26  ;;  %v2673_v41 = vsel %vm694_vm4, %v2277_v39, %v2434_v37  ;;  %v2285_v35 = vld [vmem:[#allocation2 + $0x147] sm:$0xff] }
 0x1ae   : > { %v2436_v38 = vpop.permute.xlu1 %2435 }
 0x1af   : > { %v2450_v32 = vpop.permute.xlu0 %2449  ;;  %v2674_v42 = vsel %vm694_vm4, %v2278_v40, %v2436_v38  ;;  %v2286_v38 = vld [vmem:[#allocation2 + $0x14f] sm:$0xff] }
 0x1b0   : > { %v2681_v37 = vsel %vm694_vm4, %v2285_v35, %v2450_v32 }
 0x1b2   : > { %v2580_v43 = vpop.permute.xlu1 %2579 }
 0x1b3   : > { %v2578_v44 = vpop.permute.xlu0 %2577  ;;  %v6835_v45 = vsel %vm2697_vm5, %v2674_v42, %v2580_v43  ;;  %v2288_v43 = vld [vmem:[#allocation2 + $0x16f] sm:$0xff] }
 0x1b4   : > { %v6838_v48 = vsel %vm2697_vm5, %v2673_v41, %v2578_v44 }
 0x1b5   : > { %5243 = vmatprep.mubr.msk.f32.mxu0 %vm2759_vm6, %v6838_v48 }
 0x1b6   : > { %5244 = vmatmul.mubr.msk.f32.gmra.mrb[58].mxu0 %vm2759_vm6, %v6835_v45  ;;  %v2452_v49 = vpop.permute.xlu1 %2451 }
 0x1b7   : > { %v2594_v50 = vpop.permute.xlu0 %2593  ;;  %v2682_v40 = vsel %vm694_vm4, %v2286_v38, %v2452_v49  ;;  %v2289_v49 = vld [vmem:[#allocation2 + $0x187] sm:$0xff]  ;;  %v2296_v38 = vld [vmem:[#allocation2 + $0x1ef] sm:$0xff] }
 0x1b8   : > { %v6881_v34 = vsel %vm2697_vm5, %v2681_v37, %v2594_v50 }
 0x1ba   : > { %v2596_v52 = vpop.permute.xlu1 %2595 }
 0x1bb   : > { %v2438_v53 = vpop.permute.xlu0 %2437  ;;  %v6889_v41 = vsel %vm2697_vm5, %v2682_v40, %v2596_v52 }
 0x1bc   : > { %v2675_v61 = vsel %vm694_vm4, %v2279_v58, %v2438_v53 }
 0x1be   : > { %v2440_v54 = vpop.permute.xlu1 %2439 }
 0x1bf   : > { %v2454_v57 = vpop.permute.xlu0 %2453  ;;  %v2676_v62 = vsel %vm694_vm4, %v2280_v60, %v2440_v54 }
 0x1c0   : > { %v2683_v36 = vsel %vm694_vm4, %v2287_v33, %v2454_v57  ;;  %v2290_v57 = vld [vmem:[#allocation2 + $0x18f] sm:$0xff] }
 0x1c2   : > { %v2584_v63 = vpop.permute.xlu1 %2583 }
 0x1c3   : > { %v2582_v47 = vpop.permute.xlu0 %2581  ;;  %v6847_v0 = vsel %vm2697_vm5, %v2676_v62, %v2584_v63 }
 0x1c4   : > { %v6850_v1 = vsel %vm2697_vm5, %v2675_v61, %v2582_v47  ;;  %v2291_v61 = vld [vmem:[#allocation2 + $0x1a7] sm:$0xff] }
 0x1c5   : > { %5246 = vmatprep.mubr.msk.f32.mxu0 %vm2759_vm6, %v6850_v1 }
 0x1c6   : > { %5247 = vmatmul.mubr.msk.f32.gmra.mrb[60].mxu0 %vm2759_vm6, %v6847_v0  ;;  %v2456_v2 = vpop.permute.xlu1 %2455 }
 0x1c7   : > { %v2598_v4 = vpop.permute.xlu0 %2597  ;;  %v2684_v44 = vsel %vm694_vm4, %v2288_v43, %v2456_v2 }
 0x1c8   : > { %v6893_v42 = vsel %vm2697_vm5, %v2683_v36, %v2598_v4  ;;  %v2292_v4 = vld [vmem:[#allocation2 + $0x1af] sm:$0xff] }
 0x1ca   : > { %v2600_v6 = vpop.permute.xlu1 %2599 }
 0x1cb   : > { %v2442_v8 = vpop.permute.xlu0 %2441  ;;  %v6901_v52 = vsel %vm2697_vm5, %v2684_v44, %v2600_v6 }
 0x1cc   : > { %v2677_v16 = vsel %vm694_vm4, %v2281_v12, %v2442_v8 }
 0x1ce   : > { %v2444_v9 = vpop.permute.xlu1 %2443 }
 0x1cf   : > { %v2458_v11 = vpop.permute.xlu0 %2457  ;;  %v2678_v22 = vsel %vm694_vm4, %v2282_v13, %v2444_v9 }
 0x1d0   : > { %v2685_v53 = vsel %vm694_vm4, %v2289_v49, %v2458_v11  ;;  %v2293_v11 = vld [vmem:[#allocation2 + $0x1c7] sm:$0xff] }
 0x1d2   : > { %v2588_v18 = vpop.permute.xlu1 %2587 }
 0x1d3   : > { %v2586_v19 = vpop.permute.xlu0 %2585  ;;  %v6859_v23 = vsel %vm2697_vm5, %v2678_v22, %v2588_v18  ;;  %v2294_v18 = vld [vmem:[#allocation2 + $0x1cf] sm:$0xff] }
 0x1d4   : > { %v6862_v24 = vsel %vm2697_vm5, %v2677_v16, %v2586_v19 }
 0x1d5   : > { %5249 = vmatprep.mubr.msk.f32.mxu0 %vm2759_vm6, %v6862_v24 }
 0x1d6   : > { %5250 = vmatmul.mubr.msk.f32.gmra.mrb[62].mxu0 %vm2759_vm6, %v6859_v23  ;;  %v2460_v28 = vpop.permute.xlu1 %2459 }
 0x1d7   : > { %v2602_v30 = vpop.permute.xlu0 %2601  ;;  %5252 = vmatprep.mubr.msk.f32.mxu0 %vm2759_vm6, %v6869_v25  ;;  %v2686_v60 = vsel %vm694_vm4, %v2290_v57, %v2460_v28  ;;  %v2295_v28 = vld [vmem:[#allocation2 + $0x1e7] sm:$0xff]  ;;  %v2298_v57 = vld [vmem:[#allocation2 + $0x20f] sm:$0xff] }
 0x1d8   : > { %v6905_v54 = vsel %vm2697_vm5, %v2685_v53, %v2602_v30 }
 0x1da   : > { %5253 = vmatmul.mubr.msk.f32.gmra.mrb[64].mxu0 %vm2759_vm6, %v6877_v17  ;;  %v2604_v39 = vpop.permute.xlu1 %2603 }
 0x1db   : > { %5255 = vmatprep.mubr.msk.f32.mxu0 %vm2759_vm6, %v6881_v34  ;;  %v2462_v32 = vpop.permute.xlu0 %2461  ;;  %v6913_v62 = vsel %vm2697_vm5, %v2686_v60, %v2604_v39 }
 0x1dc   : > { %v2687_v63 = vsel %vm694_vm4, %v2291_v61, %v2462_v32  ;;  %v2297_v32 = vld [vmem:[#allocation2 + $0x207] sm:$0xff] }
 0x1de   : > { %5256 = vmatmul.mubr.msk.f32.gmra.mrb[66].mxu0 %vm2759_vm6, %v6889_v41  ;;  %v2464_v50 = vpop.permute.xlu1 %2463 }
 0x1df   : > { %5258 = vmatprep.mubr.msk.f32.mxu0 %vm2759_vm6, %v6893_v42  ;;  %v2606_v58 = vpop.permute.xlu0 %2605  ;;  %v2688_v6 = vsel %vm694_vm4, %v2292_v4, %v2464_v50  ;;  %v2265_v50 = vld [vmem:[#allocation2 + $0x7] sm:$0xff] }
 0x1e0   : > { %v6917_v47 = vsel %vm2697_vm5, %v2687_v63, %v2606_v58  ;;  %v2661_v58 = vsel %vm694_vm4, %v2265_v50, %v6682_v20  ;;  %v4668_v50 = vld [vmem:[%s7584_s5 + $0x148] sm:$0xff] }
 0x1e2   : > { %5259 = vmatmul.mubr.msk.f32.gmra.mrb[68].mxu0 %vm2759_vm6, %v6901_v52  ;;  %v2608_v2 = vpop.permute.xlu1 %2607 }
 0x1e3   : > { %5261 = vmatprep.mubr.msk.f32.mxu0 %vm2759_vm6, %v6905_v54  ;;  %v6925_v8 = vsel %vm2697_vm5, %v2688_v6, %v2608_v2  ;;  %v2266_v2 = vld [vmem:[#allocation2 + $0xf] sm:$0xff] }
 0x1e4   : > { %v2662_v20 = vsel %vm694_vm4, %v2266_v2, %v6687_v15 }
 0x1e6   : > { %5262 = vmatmul.mubr.msk.f32.gmra.mrb[70].mxu0 %vm2759_vm6, %v6913_v62 }
 0x1e7   : > { %5264 = vmatprep.mubr.msk.f32.mxu0 %vm2759_vm6, %v6917_v47 }
 0x1ea   : > { %5265 = vmatmul.mubr.msk.f32.gmra.mrb[72].mxu0 %vm2759_vm6, %v6925_v8  ;;  %v2466_v9 = vpop.permute.xlu0 %2465 }
 0x1eb   : > { %v2689_v12 = vsel %vm694_vm4, %v2293_v11, %v2466_v9  ;;  %v4608_v9 = vld [vmem:[%s7582_s3 + $0xd0] sm:$0xff]  ;;  %v4609_v11 = vld [vmem:[%s7582_s3 + $0xd8] sm:$0xff] }
 0x1ee   : > { %v2468_v13 = vpop.permute.xlu1 %2467 }
 0x1ef   : > { %v2610_v16 = vpop.permute.xlu0 %2609  ;;  %v2690_v19 = vsel %vm694_vm4, %v2294_v18, %v2468_v13  ;;  %v5496_v13 = vpack.c.bf16 %v4609_v11, %v4608_v9  ;;  %v4610_v18 = vld [vmem:[%s7582_s3 + $0xe0] sm:$0xff] }
 0x1f0   : > { %v6931_v22 = vsel %vm2697_vm5, %v2689_v12, %v2610_v16  ;;  %v7216_v11 = vld [vmem:[%s7583_s4] ss:$0 sm:$0xff] }
 0x1f1   : > { %5267 = vmatprep.mubr.msk.f32.mxu0 %vm2759_vm6, %v6931_v22 }
 0x1f2   : > { %v2612_v21 = vpop.permute.xlu1 %2611 }
 0x1f3   : > { %v6937_v26 = vsel %vm2697_vm5, %v2690_v19, %v2612_v21  ;;  %v4611_v19 = vld [vmem:[%s7582_s3 + $0xe8] sm:$0xff]  ;;  %v4612_v21 = vld [vmem:[%s7582_s3 + $0xf0] sm:$0xff] }
 0x1f4   : > { %5268 = vmatmul.mubr.msk.f32.gmra.mrb[74].mxu0 %vm2759_vm6, %v6937_v26  ;;  %v5500_v15 = vpack.c.bf16 %v4611_v19, %v4610_v18 }
 0x1fa   : > { %v2470_v27 = vpop.permute.xlu0 %2469 }
 0x1fb   : > { %v2691_v30 = vsel %vm694_vm4, %v2295_v28, %v2470_v27  ;;  %v4613_v27 = vld [vmem:[%s7582_s3 + $0xf8] sm:$0xff]  ;;  %v4615_v28 = vld [vmem:[%s7582_s3 + $0x108] sm:$0xff] }
 0x1fe   : > { %v2472_v31 = vpop.permute.xlu1 %2471 }
 0x1ff   : > { %v2614_v35 = vpop.permute.xlu0 %2613  ;;  %v2692_v39 = vsel %vm694_vm4, %v2296_v38, %v2472_v31  ;;  %v4617_v31 = vld [vmem:[%s7582_s3 + $0x118] sm:$0xff] }
 0x200   : > { %v6943_v37 = vsel %vm2697_vm5, %v2691_v30, %v2614_v35  ;;  %v4616_v30 = vld [vmem:[%s7582_s3 + $0x110] sm:$0xff]  ;;  %v4662_v38 = vld [vmem:[%s7584_s5 + $0x118] sm:$0xff] }
 0x201   : > { %5270 = vmatprep.mubr.msk.f32.mxu0 %vm2759_vm6, %v6943_v37  ;;  %v5512_v35 = vpack.c.bf16 %v4617_v31, %v4616_v30 }
 0x202   : > { %v2616_v40 = vpop.permute.xlu1 %2615 }
 0x203   : > { %v6949_v33 = vsel %vm2697_vm5, %v2692_v39, %v2616_v40  ;;  %v4663_v40 = vld [vmem:[%s7584_s5 + $0x120] sm:$0xff] }
 0x204   : > { %5271 = vmatmul.mubr.msk.f32.gmra.mrb[76].mxu0 %vm2759_vm6, %v6949_v33 }
 0x20a   : > { %v2474_v36 = vpop.permute.xlu0 %2473 }
 0x20b   : > { %v2693_v43 = vsel %vm694_vm4, %v2297_v32, %v2474_v36  ;;  %v4665_v32 = vld [vmem:[%s7584_s5 + $0x130] sm:$0xff] }
 0x20e   : > { %v2476_v44 = vpop.permute.xlu1 %2475 }
 0x20f   : > { %v2618_v49 = vpop.permute.xlu0 %2617  ;;  %v2694_v60 = vsel %vm694_vm4, %v2298_v57, %v2476_v44  ;;  %v4669_v57 = vld [vmem:[%s7584_s5 + $0x150] sm:$0xff] }
 0x210   : > { %v6955_v53 = vsel %vm2697_vm5, %v2693_v43, %v2618_v49  ;;  %v4666_v43 = vld [vmem:[%s7584_s5 + $0x138] sm:$0xff]  ;;  %v4667_v49 = vld [vmem:[%s7584_s5 + $0x140] sm:$0xff] }
 0x211   : > { %5273 = vmatprep.mubr.msk.f32.mxu0 %vm2759_vm6, %v6955_v53  ;;  %v5538_v44 = vpack.c.bf16 %v4666_v43, %v4665_v32 }
 0x212   : > { %v2620_v61 = vpop.permute.xlu1 %2619 }
 0x213   : > { %v2554_v63 = vpop.permute.xlu0 %2553  ;;  %v6963_v4 = vsel %vm2697_vm5, %v2694_v60, %v2620_v61  ;;  %v4671_v61 = vld [vmem:[%s7584_s5 + $0x160] sm:$0xff] }
 0x214   : > { %v2698_v6 = vsel %vm2697_vm5, %v2661_v58, %v2554_v63  ;;  %5274 = vmatmul.mubr.msk.f32.gmra.mrb[78].mxu0 %vm2759_vm6, %v6963_v4  ;;  %v4670_v58 = vld [vmem:[%s7584_s5 + $0x158] sm:$0xff]  ;;  %v4672_v63 = vld [vmem:[%s7584_s5 + $0x168] sm:$0xff] }
 0x215   : > { %5300 = vmatprep.mubr.msk.f32.mxu0 %vm2759_vm6, %v2698_v6  ;;  %v5544_v60 = vpack.c.bf16 %v4670_v58, %v4669_v57  ;;  %v5547_v2 = vpack.c.bf16 %v4672_v63, %v4671_v61  ;;  %v4674_v6 = vld [vmem:[%s7584_s5 + $0x178] sm:$0xff] }
 0x216   : > { %v2556_v12 = vpop.permute.xlu1 %2555 }
 0x217   : > { %v2699_v16 = vsel %vm2697_vm5, %v2662_v20, %v2556_v12 }
 0x218   : > { %5301 = vmatmul.mubr.msk.f32.vlgmr.msra.gmra.mrb[48].mxu0 %vm2759_vm6, %v2699_v16 }
 0x219   : > { %5495 = vmatpush3.bf16.msra.mxu0 %v6793_v5  ;;  %5303 = vmatprep.mubr.msk.f32.mxu0 %vm2759_vm6, %v6698_v46  ;;  %v5504_v5 = vpack.c.bf16 %v4613_v27, %v4612_v21  ;;  %v4614_v46 = vld [vmem:[%s7582_s3 + $0x100] sm:$0xff] }
 0x21a   : > { %5497 = vmatprep.subr.bf16.mxu0 %v5496_v13 }
 0x21c   : > { %5304 = vmatmul.mubr.msk.f32.gmra.mrb[50].mxu0 %vm2759_vm6, %v6721_v51  ;;  %v5508_v51 = vpack.c.bf16 %v4615_v28, %v4614_v46 }
 0x21d   : > { %5306 = vmatprep.mubr.msk.f32.mxu0 %vm2759_vm6, %v6767_v56  ;;  %5499 = vmatpush3.bf16.msra.mxu0 %v5496_v13 }
 0x21e   : > { %5501 = vmatprep.subr.bf16.mxu0 %v5500_v15 }
 0x220   : > { %5307 = vmatmul.mubr.msk.f32.gmra.mrb[52].mxu0 %vm2759_vm6, %v6764_v55 }
 0x221   : > { %5309 = vmatprep.mubr.msk.f32.mxu0 %vm2759_vm6, %v6774_v59  ;;  %5503 = vmatpush3.bf16.msra.mxu0 %v5500_v15 }
 0x222   : > { %5505 = vmatprep.subr.bf16.mxu0 %v5504_v5 }
 0x224   : > { %5310 = vmatmul.mubr.msk.f32.gmra.mrb[54].mxu0 %vm2759_vm6, %v6790_v3 }
 0x225   : > { %5312 = vmatprep.mubr.msk.f32.mxu0 %vm2759_vm6, %v6796_v7  ;;  %5507 = vmatpush3.bf16.msra.mxu0 %v5504_v5 }
 0x226   : > { %5509 = vmatprep.subr.bf16.mxu0 %v5508_v51 }
 0x228   : > { %5313 = vmatmul.mubr.msk.f32.gmra.mrb[56].mxu0 %vm2759_vm6, %v6804_v14 }
 0x229   : > { %5315 = vmatprep.mubr.msk.f32.mxu0 %vm2759_vm6, %v6821_v29  ;;  %5511 = vmatpush3.bf16.msra.mxu0 %v5508_v51 }
 0x22a   : > { %5513 = vmatprep.subr.bf16.mxu0 %v5512_v35 }
 0x22c   : > { %5316 = vmatmul.mubr.msk.f32.gmra.mrb[58].mxu0 %vm2759_vm6, %v6818_v10 }
 0x22d   : > { %5318 = vmatprep.mubr.msk.f32.mxu0 %vm2759_vm6, %v6838_v48  ;;  %5515 = vmatpush3.bf16.msra.mxu0 %v5512_v35 }
 0x230   : > { %5319 = vmatmul.mubr.msk.f32.gmra.mrb[60].mxu0 %vm2759_vm6, %v6835_v45 }
 0x231   : > { %5321 = vmatprep.mubr.msk.f32.mxu0 %vm2759_vm6, %v6850_v1 }
 0x234   : > { %5322 = vmatmul.mubr.msk.f32.gmra.mrb[62].mxu0 %vm2759_vm6, %v6847_v0 }
 0x235   : > { %5324 = vmatprep.mubr.msk.f32.mxu0 %vm2759_vm6, %v6862_v24 }
 0x238   : > { %5325 = vmatmul.mubr.msk.f32.gmra.mrb[64].mxu0 %vm2759_vm6, %v6859_v23 }
 0x239   : > { %5327 = vmatprep.mubr.msk.f32.mxu0 %vm2759_vm6, %v6869_v25 }
 0x23c   : > { %5328 = vmatmul.mubr.msk.f32.gmra.mrb[66].mxu0 %vm2759_vm6, %v6877_v17 }
 0x23d   : > { %5330 = vmatprep.mubr.msk.f32.mxu0 %vm2759_vm6, %v6881_v34 }
 0x240   : > { %5331 = vmatmul.mubr.msk.f32.gmra.mrb[68].mxu0 %vm2759_vm6, %v6889_v41 }
 0x241   : > { %5333 = vmatprep.mubr.msk.f32.mxu0 %vm2759_vm6, %v6893_v42 }
 0x244   : > { %5334 = vmatmul.mubr.msk.f32.gmra.mrb[70].mxu0 %vm2759_vm6, %v6901_v52 }
 0x245   : > { %5336 = vmatprep.mubr.msk.f32.mxu0 %vm2759_vm6, %v6905_v54 }
 0x248   : > { %5337 = vmatmul.mubr.msk.f32.gmra.mrb[72].mxu0 %vm2759_vm6, %v6913_v62 }
 0x249   : > { %5339 = vmatprep.mubr.msk.f32.mxu0 %vm2759_vm6, %v6917_v47 }
 0x24c   : > { %5340 = vmatmul.mubr.msk.f32.gmra.mrb[74].mxu0 %vm2759_vm6, %v6925_v8 }
 0x24d   : > { %5342 = vmatprep.mubr.msk.f32.mxu0 %vm2759_vm6, %v6931_v22 }
 0x250   : > { %5343 = vmatmul.mubr.msk.f32.gmra.mrb[76].mxu0 %vm2759_vm6, %v6937_v26 }
 0x251   : > { %5345 = vmatprep.mubr.msk.f32.mxu0 %vm2759_vm6, %v6943_v37 }
 0x254   : > { %5346 = vmatmul.mubr.msk.f32.gmra.mrb[78].mxu0 %vm2759_vm6, %v6949_v33 }
 0x255   : > { %5372 = vmatprep.mubr.msk.f32.mxu0 %vm2759_vm6, %v6767_v56  ;;  %v2299_v56 = vld [vmem:[#allocation2 + $0x227] sm:$0xff] }
 0x258   : > { %5373 = vmatmul.mubr.msk.f32.vlgmr.msra.gmra.mrb[48].mxu0 %vm2759_vm6, %v6764_v55  ;;  %v2478_v55 = vpop.permute.xlu0 %2477 }
 0x259   : > { %5375 = vmatprep.mubr.msk.f32.mxu0 %vm2759_vm6, %v6774_v59  ;;  %v2480_v59 = vpop.permute.xlu1 %2479 }
 0x25c   : > { %5376 = vmatmul.mubr.msk.f32.gmra.mrb[50].mxu0 %vm2759_vm6, %v6790_v3  ;;  %v2695_v3 = vsel %vm694_vm4, %v2299_v56, %v2478_v55 }
 0x25d   : > { %5378 = vmatprep.mubr.msk.f32.mxu0 %vm2759_vm6, %v6796_v7  ;;  %v2622_v7 = vpop.permute.xlu0 %2621 }
 0x260   : > { %5379 = vmatmul.mubr.msk.f32.gmra.mrb[52].mxu0 %vm2759_vm6, %v6804_v14  ;;  %v2300_v14 = vld [vmem:[#allocation2 + $0x22f] sm:$0xff] }
 0x261   : > { %5381 = vmatprep.mubr.msk.f32.mxu0 %vm2759_vm6, %v6821_v29  ;;  %v2696_v29 = vsel %vm694_vm4, %v2300_v14, %v2480_v59 }
 0x264   : > { %5382 = vmatmul.mubr.msk.f32.gmra.mrb[54].mxu0 %vm2759_vm6, %v6818_v10  ;;  %v2732_v10 = vsel %vm2697_vm5, %v2695_v3, %v2622_v7 }
 0x265   : > { %5384 = vmatprep.mubr.msk.f32.mxu0 %vm2759_vm6, %v6838_v48 }
 0x268   : > { %5385 = vmatmul.mubr.msk.f32.gmra.mrb[56].mxu0 %vm2759_vm6, %v6835_v45  ;;  %v2624_v45 = vpop.permute.xlu1 %2623 }
 0x269   : > { %5387 = vmatprep.mubr.msk.f32.mxu0 %vm2759_vm6, %v6850_v1  ;;  %v2733_v48 = vsel %vm2697_vm5, %v2696_v29, %v2624_v45  ;;  %v4652_v1 = vld [vmem:[%s7584_s5 + $0xc8] sm:$0xff] }
 0x26c   : > { %5388 = vmatmul.mubr.msk.f32.gmra.mrb[58].mxu0 %vm2759_vm6, %v6847_v0  ;;  %v4651_v0 = vld [vmem:[%s7584_s5 + $0xc0] sm:$0xff] }
 0x26d   : > { %5390 = vmatprep.mubr.msk.f32.mxu0 %vm2759_vm6, %v6862_v24  ;;  %v5517_v24 = vpack.c.bf16 %v4652_v1, %v4651_v0 }
 0x270   : > { %5391 = vmatmul.mubr.msk.f32.gmra.mrb[60].mxu0 %vm2759_vm6, %v6859_v23  ;;  %v5716_v23 = vmov 0.0|0.0  }
 0x271   : > { %5393 = vmatprep.mubr.msk.f32.mxu0 %vm2759_vm6, %v6869_v25  ;;  %5516 = vmatprep.subr.bf16.mxu1 %v5716_v23  ;;  %v4653_v25 = vld [vmem:[%s7584_s5 + $0xd0] sm:$0xff] }
 0x272   : > { %5518 = vmatpush1.bf16.msra.mxu1 %v5517_v24 }
 0x273   : > { %5519 = vmatprep.subr.bf16.mxu1 %v5716_v23 }
 0x274   : > { %5394 = vmatmul.mubr.msk.f32.gmra.mrb[62].mxu0 %vm2759_vm6, %v6877_v17  ;;  %v4654_v17 = vld [vmem:[%s7584_s5 + $0xd8] sm:$0xff] }
 0x275   : > { %5396 = vmatprep.mubr.msk.f32.mxu0 %vm2759_vm6, %v6881_v34  ;;  %v5520_v34 = vpack.c.bf16 %v4654_v17, %v4653_v25 }
 0x277   : > { %5521 = vmatpush1.bf16.msra.mxu1 %v5520_v34 }
 0x278   : > { %5397 = vmatmul.mubr.msk.f32.gmra.mrb[64].mxu0 %vm2759_vm6, %v6889_v41  ;;  %v4655_v41 = vld [vmem:[%s7584_s5 + $0xe0] sm:$0xff]  ;;  %5522 = vmatprep.subr.bf16.mxu1 %v5716_v23 }
 0x279   : > { %5399 = vmatprep.mubr.msk.f32.mxu0 %vm2759_vm6, %v6893_v42  ;;  %v4656_v42 = vld [vmem:[%s7584_s5 + $0xe8] sm:$0xff] }
 0x27c   : > { %5400 = vmatmul.mubr.msk.f32.gmra.mrb[66].mxu0 %vm2759_vm6, %v6901_v52  ;;  %v5523_v52 = vpack.c.bf16 %v4656_v42, %v4655_v41 }
 0x27d   : > { %5402 = vmatprep.mubr.msk.f32.mxu0 %vm2759_vm6, %v6905_v54  ;;  %v4657_v54 = vld [vmem:[%s7584_s5 + $0xf0] sm:$0xff] }
 0x27e   : > { %5524 = vmatpush1.bf16.msra.mxu1 %v5523_v52 }
 0x27f   : > { %5525 = vmatprep.subr.bf16.mxu1 %v5716_v23 }
 0x280   : > { %5403 = vmatmul.mubr.msk.f32.gmra.mrb[68].mxu0 %vm2759_vm6, %v6913_v62  ;;  %v4658_v62 = vld [vmem:[%s7584_s5 + $0xf8] sm:$0xff] }
 0x281   : > { %5405 = vmatprep.mubr.msk.f32.mxu0 %vm2759_vm6, %v6917_v47  ;;  %v5526_v47 = vpack.c.bf16 %v4658_v62, %v4657_v54 }
 0x283   : > { %5527 = vmatpush1.bf16.msra.mxu1 %v5526_v47 }
 0x284   : > { %5406 = vmatmul.mubr.msk.f32.gmra.mrb[70].mxu0 %vm2759_vm6, %v6925_v8  ;;  %v4659_v8 = vld [vmem:[%s7584_s5 + $0x100] sm:$0xff]  ;;  %5528 = vmatprep.subr.bf16.mxu1 %v5716_v23 }
 0x285   : > { %5408 = vmatprep.mubr.msk.f32.mxu0 %vm2759_vm6, %v6931_v22  ;;  %v4660_v22 = vld [vmem:[%s7584_s5 + $0x108] sm:$0xff] }
 0x288   : > { %5409 = vmatmul.mubr.msk.f32.gmra.mrb[72].mxu0 %vm2759_vm6, %v6937_v26  ;;  %v5529_v26 = vpack.c.bf16 %v4660_v22, %v4659_v8 }
 0x289   : > { %5411 = vmatprep.mubr.msk.f32.mxu0 %vm2759_vm6, %v6943_v37  ;;  %v4661_v37 = vld [vmem:[%s7584_s5 + $0x110] sm:$0xff] }
 0x28a   : > { %5530 = vmatpush1.bf16.msra.mxu1 %v5529_v26  ;;  %v5532_v39 = vpack.c.bf16 %v4662_v38, %v4661_v37 }
 0x28b   : > { %5531 = vmatprep.subr.bf16.mxu1 %v5716_v23 }
 0x28c   : > { %5412 = vmatmul.mubr.msk.f32.gmra.mrb[74].mxu0 %vm2759_vm6, %v6949_v33  ;;  %v4664_v33 = vld [vmem:[%s7584_s5 + $0x128] sm:$0xff] }
 0x28d   : > { %5414 = vmatprep.mubr.msk.f32.mxu0 %vm2759_vm6, %v6955_v53  ;;  %v5535_v36 = vpack.c.bf16 %v4664_v33, %v4663_v40  ;;  %v5541_v53 = vpack.c.bf16 %v4668_v50, %v4667_v49 }
 0x28e   : > { %5533 = vmatpush1.bf16.msra.mxu1 %v5532_v39 }
 0x28f   : > { %5534 = vmatprep.subr.bf16.mxu1 %v5716_v23 }
 0x290   : > { %5415 = vmatmul.mubr.msk.f32.gmra.mrb[76].mxu0 %vm2759_vm6, %v6963_v4  ;;  %v4673_v4 = vld [vmem:[%s7584_s5 + $0x170] sm:$0xff] }
 0x291   : > { %5417 = vmatprep.mubr.msk.f32.mxu0 %vm2759_vm6, %v2732_v10  ;;  %v5550_v12 = vpack.c.bf16 %v4674_v6, %v4673_v4 }
 0x292   : > { %5536 = vmatpush1.bf16.msra.mxu1 %v5535_v36 }
 0x293   : > { %5537 = vmatprep.subr.bf16.mxu1 %v5716_v23 }
 0x294   : > { %5418 = vmatmul.mubr.msk.f32.gmra.mrb[78].mxu0 %vm2759_vm6, %v2733_v48 }
 0x296   : > { %5539 = vmatpush1.bf16.msra.mxu1 %v5538_v44 }
 0x297   : > { %5540 = vmatprep.subr.bf16.mxu1 %v5716_v23 }
 0x29a   : > { %5542 = vmatpush1.bf16.msra.mxu1 %v5541_v53 }
 0x29b   : > { %5543 = vmatprep.subr.bf16.mxu1 %v5716_v23 }
 0x29e   : > { %5545 = vmatpush1.bf16.msra.mxu1 %v5544_v60 }
 0x29f   : > { %5546 = vmatprep.subr.bf16.mxu1 %v5716_v23 }
 0x2a2   : > { %5548 = vmatpush1.bf16.msra.mxu1 %v5547_v2 }
 0x2a3   : > { %5549 = vmatprep.subr.bf16.mxu1 %v5716_v23 }
 0x2a6   : > { %5551 = vmatpush1.bf16.msra.mxu1 %v5550_v12 }
 0x2a7   : > { %5552 = vmatprep.subr.bf16.mxu1 %v5716_v23 }
 0x32b   : > { %v5374_v9 = vpop.f32.mrb[48].mxu0 }
 0x32c   : > { %v3397_v20 = vpop.f32.mrb[49].mxu0  ;;  %v3596_v13 = vadd.f32 %v5374_v9, %v7216_v11 }
 0x32d   : > { %v3595_v16 = vadd.f32 %v7216_v11, %v3397_v20 }
 0x32e   : > { %v3628_v27 = vmax.f32 %v3596_v13, 0.0 }
 0x32f   : > { %v5377_v18 = vpop.f32.mrb[50].mxu0  ;;  %v3627_v46 = vmax.f32 %v3595_v16, 0.0 }
 0x330   : > { %v3598_v19 = vadd.f32 %v5377_v18, %v7216_v11  ;;  %v3407_v15 = vpop.f32.mrb[51].mxu0 }
 0x331   : > { %v3597_v21 = vadd.f32 %v7216_v11, %v3407_v15 }
 0x332   : > { %v3630_v5 = vmax.f32 %v3598_v19, 0.0 }
 0x333   : > { %v3629_v28 = vmax.f32 %v3597_v21, 0.0  ;;  %v5380_v51 = vpop.f32.mrb[52].mxu0 }
 0x334   : > { %v3660_v30 = vmax.f32 %v3628_v27, %v3630_v5  ;;  %v3417_v31 = vpop.f32.mrb[53].mxu0  ;;  %v3600_v55 = vadd.f32 %v5380_v51, %v7216_v11 }
 0x335   : > { %v3659_v35 = vmax.f32 %v3627_v46, %v3629_v28  ;;  %v3599_v56 = vadd.f32 %v7216_v11, %v3417_v31 }
 0x336   : > { %3676 = vst.msk [vmem:[#allocation5 + $0x8] sm:$0xff] %vm2697_vm5, %v3660_v30  ;;  %v3632_v10 = vmax.f32 %v3600_v55, 0.0 }
 0x337   : > { %3675 = vst.msk [vmem:[#allocation5] sm:$0xff] %vm2697_vm5, %v3659_v35  ;;  %v5383_v59 = vpop.f32.mrb[54].mxu0  ;;  %v3631_v45 = vmax.f32 %v3599_v56, 0.0 }
 0x338   : > { %v3602_v3 = vadd.f32 %v5383_v59, %v7216_v11  ;;  %v3427_v7 = vpop.f32.mrb[55].mxu0 }
 0x339   : > { %v3601_v14 = vadd.f32 %v7216_v11, %v3427_v7 }
 0x33a   : > { %v3634_v29 = vmax.f32 %v3602_v3, 0.0 }
 0x33b   : > { %v3633_v48 = vmax.f32 %v3601_v14, 0.0  ;;  %v5386_v0 = vpop.f32.mrb[56].mxu0 }
 0x33c   : > { %v3662_v1 = vmax.f32 %v3632_v10, %v3634_v29  ;;  %v3437_v24 = vpop.f32.mrb[57].mxu0  ;;  %v3604_v41 = vadd.f32 %v5386_v0, %v7216_v11 }
 0x33d   : > { %v3661_v25 = vmax.f32 %v3631_v45, %v3633_v48  ;;  %v3603_v52 = vadd.f32 %v7216_v11, %v3437_v24 }
 0x33e   : > { %v3721_v17 = vld [vmem:[#allocation5] ss:$2 sm:$0xff]  ;;  %v3737_v34 = vld [vmem:[#allocation5 + $0x1] ss:$2 sm:$0xff]  ;;  %3678 = vst.msk [vmem:[#allocation5 + $0x18] sm:$0xff] %vm2697_vm5, %v3662_v1  ;;  %v3636_v22 = vmax.f32 %v3604_v41, 0.0 }
 0x33f   : > { %v3752_v42 = vmax.f32 %v3721_v17, %v3737_v34  ;;  %3677 = vst.msk [vmem:[#allocation5 + $0x10] sm:$0xff] %vm2697_vm5, %v3661_v25  ;;  %v5389_v54 = vpop.f32.mrb[58].mxu0  ;;  %v3635_v37 = vmax.f32 %v3603_v52, 0.0 }
 0x340   : > { %v3606_v62 = vadd.f32 %v5389_v54, %v7216_v11  ;;  %v3447_v47 = vpop.f32.mrb[59].mxu0 }
 0x341   : > { %3761 = vst.msk [vmem:[#allocation3 + $0x20] sm:$0xff] %vm2697_vm5, %v3752_v42  ;;  %v3605_v8 = vadd.f32 %v7216_v11, %v3447_v47 }
 0x342   : > { %v3638_v26 = vmax.f32 %v3606_v62, 0.0 }
 0x343   : > { %v3637_v38 = vmax.f32 %v3605_v8, 0.0  ;;  %v5392_v39 = vpop.f32.mrb[60].mxu0 }
 0x344   : > { %v3664_v40 = vmax.f32 %v3636_v22, %v3638_v26  ;;  %v3457_v33 = vpop.f32.mrb[61].mxu0  ;;  %v3608_v44 = vadd.f32 %v5392_v39, %v7216_v11 }
 0x345   : > { %v3663_v36 = vmax.f32 %v3635_v37, %v3637_v38  ;;  %v3607_v50 = vadd.f32 %v7216_v11, %v3457_v33 }
 0x346   : > { %v3723_v32 = vld [vmem:[#allocation5 + $0x10] ss:$2 sm:$0xff]  ;;  %v3739_v43 = vld [vmem:[#allocation5 + $0x11] ss:$2 sm:$0xff]  ;;  %3680 = vst.msk [vmem:[#allocation5 + $0x28] sm:$0xff] %vm2697_vm5, %v3664_v40  ;;  %v3640_v2 = vmax.f32 %v3608_v44, 0.0 }
 0x347   : > { %v3753_v49 = vmax.f32 %v3723_v32, %v3739_v43  ;;  %3679 = vst.msk [vmem:[#allocation5 + $0x20] sm:$0xff] %vm2697_vm5, %v3663_v36  ;;  %v5395_v53 = vpop.f32.mrb[62].mxu0  ;;  %v3639_v6 = vmax.f32 %v3607_v50, 0.0 }
 0x348   : > { %v3610_v57 = vadd.f32 %v5395_v53, %v7216_v11  ;;  %v3467_v58 = vpop.f32.mrb[63].mxu0  ;;  %v7242_v60 = vld [vmem:[#allocation3 + $0x21] sm:$0xff] }
 0x349   : > { %v3780_v61 = vld [vmem:[#allocation3 + $0x20] sm:$0xff]  ;;  %3762 = vst.msk [vmem:[#allocation3 + $0x38] sm:$0xff] %vm2697_vm5, %v3753_v49  ;;  %v3609_v63 = vadd.f32 %v7216_v11, %v3467_v58  ;;  %4675 = vmatprep.mubr.msk.f32.mxu1 %vm2697_vm5, %v7242_v60 }
 0x34a   : > { %3811 = vrot.lane.b32.xlu0 %v3780_v61, %s5715_s26  ;;  %v3642_v4 = vmax.f32 %v3610_v57, 0.0 }
 0x34b   : > { %v3641_v9 = vmax.f32 %v3609_v63, 0.0  ;;  %v5398_v20 = vpop.f32.mrb[64].mxu0 }
 0x34c   : > { %v3666_v12 = vmax.f32 %v3640_v2, %v3642_v4  ;;  %v3477_v13 = vpop.f32.mrb[65].mxu0  ;;  %v3612_v15 = vadd.f32 %v5398_v20, %v7216_v11 }
 0x34d   : > { %v3665_v16 = vmax.f32 %v3639_v6, %v3641_v9  ;;  %v3611_v27 = vadd.f32 %v7216_v11, %v3477_v13 }
 0x34e   : > { %v3725_v18 = vld [vmem:[#allocation5 + $0x20] ss:$2 sm:$0xff]  ;;  %v3741_v19 = vld [vmem:[#allocation5 + $0x21] ss:$2 sm:$0xff]  ;;  %3682 = vst.msk [vmem:[#allocation5 + $0x38] sm:$0xff] %vm2697_vm5, %v3666_v12  ;;  %v3644_v31 = vmax.f32 %v3612_v15, 0.0 }
 0x34f   : > { %v3754_v21 = vmax.f32 %v3725_v18, %v3741_v19  ;;  %3681 = vst.msk [vmem:[#allocation5 + $0x30] sm:$0xff] %vm2697_vm5, %v3665_v16  ;;  %v5401_v5 = vpop.f32.mrb[66].mxu0  ;;  %v3643_v55 = vmax.f32 %v3611_v27, 0.0 }
 0x350   : > { %v3614_v46 = vadd.f32 %v5401_v5, %v7216_v11  ;;  %v3487_v28 = vpop.f32.mrb[67].mxu0  ;;  %v3781_v51 = vld [vmem:[#allocation3 + $0x38] sm:$0xff] }
 0x351   : > { %3763 = vst.msk [vmem:[#allocation3 + $0x50] sm:$0xff] %vm2697_vm5, %v3754_v21  ;;  %v3613_v30 = vadd.f32 %v7216_v11, %v3487_v28  ;;  %3813 = vrot.lane.b32.xlu1 %v3781_v51, %s5715_s26 }
 0x352   : > { %v3646_v35 = vmax.f32 %v3614_v46, 0.0 }
 0x353   : > { %v3645_v56 = vmax.f32 %v3613_v30, 0.0  ;;  %v5404_v59 = vpop.f32.mrb[68].mxu0 }
 0x354   : > { %v3668_v3 = vmax.f32 %v3644_v31, %v3646_v35  ;;  %v3497_v7 = vpop.f32.mrb[69].mxu0  ;;  %v3616_v45 = vadd.f32 %v5404_v59, %v7216_v11 }
 0x355   : > { %v3667_v14 = vmax.f32 %v3643_v55, %v3645_v56  ;;  %v3615_v0 = vadd.f32 %v7216_v11, %v3497_v7  ;;  %v3779_v7 = vld [vmem:[#allocation3 + $0x8] sm:$0xff] }
 0x356   : > { %v3727_v10 = vld [vmem:[#allocation5 + $0x30] ss:$2 sm:$0xff]  ;;  %v3743_v29 = vld [vmem:[#allocation5 + $0x31] ss:$2 sm:$0xff]  ;;  %3684 = vst.msk [vmem:[#allocation5 + $0x48] sm:$0xff] %vm2697_vm5, %v3668_v3  ;;  %v3648_v41 = vmax.f32 %v3616_v45, 0.0 }
 0x357   : > { %v3755_v48 = vmax.f32 %v3727_v10, %v3743_v29  ;;  %3683 = vst.msk [vmem:[#allocation5 + $0x40] sm:$0xff] %vm2697_vm5, %v3667_v14  ;;  %v5407_v1 = vpop.f32.mrb[70].mxu0  ;;  %v3647_v52 = vmax.f32 %v3615_v0, 0.0  ;;  %v3788_v10 = vld [vmem:[#allocation3 + $0xe0] sm:$0xff]  ;;  %v3850_v45 = vld [vmem:[%s7584_s5 + $0x8] sm:$0xff] }
 0x358   : > { %v3618_v24 = vadd.f32 %v5407_v1, %v7216_v11  ;;  %v3507_v25 = vpop.f32.mrb[71].mxu0  ;;  %v3782_v17 = vld [vmem:[#allocation3 + $0x50] sm:$0xff]  ;;  %v3849_v29 = vld [vmem:[%s7584_s5] sm:$0xff] }
 0x359   : > { %3764 = vst.msk [vmem:[#allocation3 + $0x68] sm:$0xff] %vm2697_vm5, %v3755_v48  ;;  %v3617_v34 = vadd.f32 %v7216_v11, %v3507_v25  ;;  %3815 = vrot.lane.b32.xlu0 %v3782_v17, %s5715_s26  ;;  %v5553_v48 = vpack.c.bf16 %v3850_v45, %v3849_v29  ;;  %v3770_v1 = vld [vmem:[#allocation3 + $0x1f] sm:$0xff] }
 0x35a   : > { %v3650_v42 = vmax.f32 %v3618_v24, 0.0  ;;  %v3851_v24 = vld [vmem:[%s7584_s5 + $0x10] sm:$0xff]  ;;  %v3852_v25 = vld [vmem:[%s7584_s5 + $0x18] sm:$0xff] }
 0x35b   : > { %v3649_v54 = vmax.f32 %v3617_v34, 0.0  ;;  %v5410_v62 = vpop.f32.mrb[72].mxu0  ;;  %v7306_v34 = vld [vmem:[#allocation3 + $0x39] sm:$0xff] }
 0x35c   : > { %v3670_v47 = vmax.f32 %v3648_v41, %v3650_v42  ;;  %v3517_v8 = vpop.f32.mrb[73].mxu0  ;;  %v3620_v38 = vadd.f32 %v5410_v62, %v7216_v11  ;;  %v5556_v41 = vpack.c.bf16 %v3852_v25, %v3851_v24  ;;  %v3853_v42 = vld [vmem:[%s7584_s5 + $0x20] sm:$0xff] }
 0x35d   : > { %v3669_v22 = vmax.f32 %v3647_v52, %v3649_v54  ;;  %v3619_v40 = vadd.f32 %v7216_v11, %v3517_v8  ;;  %v3854_v52 = vld [vmem:[%s7584_s5 + $0x28] sm:$0xff]  ;;  %v3855_v8 = vld [vmem:[%s7584_s5 + $0x30] sm:$0xff] }
 0x35e   : > { %v3729_v26 = vld [vmem:[#allocation5 + $0x40] ss:$2 sm:$0xff]  ;;  %v3745_v37 = vld [vmem:[#allocation5 + $0x41] ss:$2 sm:$0xff]  ;;  %3686 = vst.msk [vmem:[#allocation5 + $0x58] sm:$0xff] %vm2697_vm5, %v3670_v47  ;;  %v3652_v49 = vmax.f32 %v3620_v38, 0.0  ;;  %v5559_v54 = vpack.c.bf16 %v3854_v52, %v3853_v42 }
 0x35f   : > { %v3756_v39 = vmax.f32 %v3729_v26, %v3745_v37  ;;  %3685 = vst.msk [vmem:[#allocation5 + $0x50] sm:$0xff] %vm2697_vm5, %v3669_v22  ;;  %v5413_v33 = vpop.f32.mrb[74].mxu0  ;;  %v3651_v53 = vmax.f32 %v3619_v40, 0.0  ;;  %v3771_v47 = vld [vmem:[#allocation3 + $0x37] sm:$0xff]  ;;  %v3858_v40 = vld [vmem:[%s7584_s5 + $0x48] sm:$0xff] }
 0x360   : > { %v3622_v36 = vadd.f32 %v5413_v33, %v7216_v11  ;;  %v3527_v32 = vpop.f32.mrb[75].mxu0  ;;  %v3783_v43 = vld [vmem:[#allocation3 + $0x68] sm:$0xff]  ;;  %v3856_v22 = vld [vmem:[%s7584_s5 + $0x38] sm:$0xff] }
 0x361   : > { %3765 = vst.msk [vmem:[#allocation3 + $0x80] sm:$0xff] %vm2697_vm5, %v3756_v39  ;;  %v3621_v44 = vadd.f32 %v7216_v11, %v3527_v32  ;;  %3817 = vrot.lane.b32.xlu1 %v3783_v43, %s5715_s26  ;;  %v7328_v37 = vld [vmem:[#allocation3 + $0x51] sm:$0xff]  ;;  %v5562_v38 = vpack.c.bf16 %v3856_v22, %v3855_v8  ;;  %v3857_v39 = vld [vmem:[%s7584_s5 + $0x40] sm:$0xff]  ;;  %v4692_v42 = vld [vmem:[%s7584_s5 + $0x188] sm:$0xff] }
 0x362   : > { %v3654_v50 = vmax.f32 %v3622_v36, 0.0  ;;  %v5565_v33 = vpack.c.bf16 %v3858_v40, %v3857_v39  ;;  %v3772_v32 = vld [vmem:[#allocation3 + $0x4f] sm:$0xff]  ;;  %v4694_v8 = vld [vmem:[%s7584_s5 + $0x198] sm:$0xff] }
 0x363   : > { %v3653_v57 = vmax.f32 %v3621_v44, 0.0  ;;  %v5416_v58 = vpop.f32.mrb[76].mxu0  ;;  %v3859_v43 = vld [vmem:[%s7584_s5 + $0x50] sm:$0xff]  ;;  %v3860_v44 = vld [vmem:[%s7584_s5 + $0x58] sm:$0xff]  ;;  %v4696_v39 = vld [vmem:[%s7584_s5 + $0x1a8] sm:$0xff] }
 0x364   : > { %v3672_v61 = vmax.f32 %v3652_v49, %v3654_v50  ;;  %v3537_v63 = vpop.f32.mrb[77].mxu0  ;;  %v3624_v9 = vadd.f32 %v5416_v58, %v7216_v11  ;;  %v7350_v50 = vld [vmem:[#allocation3 + $0x69] sm:$0xff] }
 0x365   : > { %v3671_v2 = vmax.f32 %v3651_v53, %v3653_v57  ;;  %v3623_v12 = vadd.f32 %v7216_v11, %v3537_v63  ;;  %v5568_v53 = vpack.c.bf16 %v3860_v44, %v3859_v43  ;;  %v3861_v57 = vld [vmem:[%s7584_s5 + $0x60] sm:$0xff]  ;;  %v3862_v58 = vld [vmem:[%s7584_s5 + $0x68] sm:$0xff]  ;;  %v4701_v44 = vld [vmem:[%s7584_s5 + $0x1d0] sm:$0xff] }
 0x366   : > { %v3731_v4 = vld [vmem:[#allocation5 + $0x50] ss:$2 sm:$0xff]  ;;  %v3747_v6 = vld [vmem:[#allocation5 + $0x51] ss:$2 sm:$0xff]  ;;  %3688 = vst.msk [vmem:[#allocation5 + $0x68] sm:$0xff] %vm2697_vm5, %v3672_v61  ;;  %v3656_v21 = vmax.f32 %v3624_v9, 0.0  ;;  %v5571_v61 = vpack.c.bf16 %v3862_v58, %v3861_v57 }
 0x367   : > { %v3757_v20 = vmax.f32 %v3731_v4, %v3747_v6  ;;  %3687 = vst.msk [vmem:[#allocation5 + $0x60] sm:$0xff] %vm2697_vm5, %v3671_v2  ;;  %v5419_v13 = vpop.f32.mrb[78].mxu0  ;;  %v3655_v5 = vmax.f32 %v3623_v12, 0.0  ;;  %v3773_v2 = vld [vmem:[#allocation3 + $0x67] sm:$0xff]  ;;  %v3863_v4 = vld [vmem:[%s7584_s5 + $0x70] sm:$0xff]  ;;  %v3864_v6 = vld [vmem:[%s7584_s5 + $0x78] sm:$0xff] }
 0x368   : > { %v3626_v16 = vadd.f32 %v5419_v13, %v7216_v11  ;;  %v3547_v18 = vpop.f32.mrb[79].mxu0  ;;  %v3784_v19 = vld [vmem:[#allocation3 + $0x80] sm:$0xff]  ;;  %v5574_v12 = vpack.c.bf16 %v3864_v6, %v3863_v4  ;;  %v4706_v4 = vld [vmem:[%s7584_s5 + $0x1f8] sm:$0xff] }
 0x369   : > { %3766 = vst.msk [vmem:[#allocation3 + $0x98] sm:$0xff] %vm2697_vm5, %v3757_v20  ;;  %v3625_v15 = vadd.f32 %v7216_v11, %v3547_v18  ;;  %3819 = vrot.lane.b32.xlu0 %v3784_v19, %s5715_s26  ;;  %v7372_v20 = vld [vmem:[#allocation3 + $0x81] sm:$0xff] }
 0x36a   : > { %v3658_v27 = vmax.f32 %v3626_v16, 0.0  ;;  %v3865_v13 = vld [vmem:[%s7584_s5 + $0x80] sm:$0xff]  ;;  %v3866_v16 = vld [vmem:[%s7584_s5 + $0x88] sm:$0xff] }
 0x36b   : > { %v3657_v46 = vmax.f32 %v3625_v15, 0.0  ;;  %v5577_v18 = vpack.c.bf16 %v3866_v16, %v3865_v13  ;;  %v3774_v15 = vld [vmem:[#allocation3 + $0x7f] sm:$0xff]  ;;  %v4708_v13 = vld [vmem:[%s7584_s5 + $0x208] sm:$0xff] }
 0x36c   : > { %v3674_v28 = vmax.f32 %v3656_v21, %v3658_v27  ;;  %v3867_v21 = vld [vmem:[%s7584_s5 + $0x90] sm:$0xff]  ;;  %v3868_v27 = vld [vmem:[%s7584_s5 + $0x98] sm:$0xff]  ;;  %v4703_v58 = vld [vmem:[%s7584_s5 + $0x1e0] sm:$0xff] }
 0x36d   : > { %v3673_v51 = vmax.f32 %v3655_v5, %v3657_v46 }
 0x36e   : > { %v3733_v30 = vld [vmem:[#allocation5 + $0x60] ss:$2 sm:$0xff]  ;;  %v3749_v31 = vld [vmem:[#allocation5 + $0x61] ss:$2 sm:$0xff]  ;;  %3690 = vst.msk [vmem:[#allocation5 + $0x78] sm:$0xff] %vm2697_vm5, %v3674_v28  ;;  %v5580_v28 = vpack.c.bf16 %v3868_v27, %v3867_v21  ;;  %v4711_v21 = vld [vmem:[%s7584_s5 + $0x220] sm:$0xff] }
 0x36f   : > { %v3758_v35 = vmax.f32 %v3733_v30, %v3749_v31  ;;  %3689 = vst.msk [vmem:[#allocation5 + $0x70] sm:$0xff] %vm2697_vm5, %v3673_v51  ;;  %v3869_v51 = vld [vmem:[%s7584_s5 + $0xa0] sm:$0xff]  ;;  %v3870_v30 = vld [vmem:[%s7584_s5 + $0xa8] sm:$0xff] }
 0x370   : > { %v3785_v55 = vld [vmem:[#allocation3 + $0x98] sm:$0xff]  ;;  %v5583_v31 = vpack.c.bf16 %v3870_v30, %v3869_v51 }
 0x371   : > { %3767 = vst.msk [vmem:[#allocation3 + $0xb0] sm:$0xff] %vm2697_vm5, %v3758_v35  ;;  %3821 = vrot.lane.b32.xlu1 %v3785_v55, %s5715_s26  ;;  %v7394_v46 = vld [vmem:[#allocation3 + $0x99] sm:$0xff] }
 0x372   : > { %v3775_v55 = vld [vmem:[#allocation3 + $0x97] sm:$0xff] }
 0x373   : > { %v4714_v51 = vld [vmem:[%s7584_s5 + $0x238] sm:$0xff] }
 0x376   : > { %v3735_v11 = vld [vmem:[#allocation5 + $0x70] ss:$2 sm:$0xff]  ;;  %v3751_v56 = vld [vmem:[#allocation5 + $0x71] ss:$2 sm:$0xff] }
 0x377   : > { %v3759_v59 = vmax.f32 %v3735_v11, %v3751_v56  ;;  %v3871_v11 = vld [vmem:[%s7584_s5 + $0xb0] sm:$0xff]  ;;  %v3872_v56 = vld [vmem:[%s7584_s5 + $0xb8] sm:$0xff] }
 0x378   : > { %v3786_v3 = vld [vmem:[#allocation3 + $0xb0] sm:$0xff] }
 0x379   : > { %3768 = vst.msk [vmem:[#allocation3 + $0xc8] sm:$0xff] %vm2697_vm5, %v3759_v59  ;;  %3823 = vrot.lane.b32.xlu0 %v3786_v3, %s5715_s26  ;;  %v7416_v3 = vld [vmem:[#allocation3 + $0xb1] sm:$0xff] }
 0x37d   : > { %3809 = vrot.lane.b32.xlu0 %v3779_v7, %s5715_s26  ;;  %v5586_v7 = vpack.c.bf16 %v3872_v56, %v3871_v11 }
 0x380   : > { %v3787_v14 = vld [vmem:[#allocation3 + $0xc8] sm:$0xff] }
 0x381   : > { %3825 = vrot.lane.b32.xlu1 %v3787_v14, %s5715_s26  ;;  %v7426_v45 = vld [vmem:[#allocation3 + $0xc9] sm:$0xff] }
 0x382   : > { %v3777_v24 = vld [vmem:[#allocation3 + $0xc7] sm:$0xff] }
 0x385   : > { %3827 = vrot.lane.b32.xlu1 %v3788_v10, %s5715_s26  ;;  %v3776_v10 = vld [vmem:[#allocation3 + $0xaf] sm:$0xff] }
 0x3bc   : > { %v3812_v0 = vpop.permute.xlu0 %3811 }
 0x3bd   : > { %v7303_v17 = vsel %vm2697_vm5, %v3770_v1, %v3812_v0  ;;  %v3789_v0 = vld [vmem:[#allocation3 + $0x9] sm:$0xff] }
 0x3be   : > { %3987 = vmatmul.mubr.f32.vlgmr.msra.gmra.mrb[80].mxu1 %v7303_v17 }
 0x3bf   : > { %4676 = vmatprep.mubr.msk.f32.mxu1 %vm2697_vm5, %v7306_v34  ;;  %5554 = vmatpush1.bf16.msra.mxu1 %v5553_v48  ;;  %v3769_v48 = vld [vmem:[#allocation3 + $0x7] sm:$0xff] }
 0x3c0   : > { %5555 = vmatprep.subr.bf16.mxu1 %v5716_v23 }
 0x3c3   : > { %5557 = vmatpush1.bf16.msra.mxu1 %v5556_v41  ;;  %v3814_v62 = vpop.permute.xlu1 %3813  ;;  %v4691_v41 = vld [vmem:[%s7584_s5 + $0x180] sm:$0xff] }
 0x3c4   : > { %5558 = vmatprep.subr.bf16.mxu1 %v5716_v23  ;;  %v7325_v26 = vsel %vm2697_vm5, %v3771_v47, %v3814_v62  ;;  %v5589_v62 = vpack.c.bf16 %v4692_v42, %v4691_v41  ;;  %v4693_v47 = vld [vmem:[%s7584_s5 + $0x190] sm:$0xff] }
 0x3c5   : > { %3992 = vmatmul.mubr.f32.gmra.mrb[82].mxu1 %v7325_v26  ;;  %v5592_v22 = vpack.c.bf16 %v4694_v8, %v4693_v47 }
 0x3c6   : > { %4677 = vmatprep.mubr.msk.f32.mxu1 %vm2697_vm5, %v7328_v37 }
 0x3c7   : > { %5560 = vmatpush1.bf16.msra.mxu1 %v5559_v54 }
 0x3c8   : > { %5561 = vmatprep.subr.bf16.mxu1 %v5716_v23 }
 0x3cb   : > { %5563 = vmatpush1.bf16.msra.mxu1 %v5562_v38  ;;  %v3816_v36 = vpop.permute.xlu0 %3815  ;;  %v4695_v38 = vld [vmem:[%s7584_s5 + $0x1a0] sm:$0xff] }
 0x3cc   : > { %5564 = vmatprep.subr.bf16.mxu1 %v5716_v23  ;;  %v7347_v49 = vsel %vm2697_vm5, %v3772_v32, %v3816_v36  ;;  %v5595_v40 = vpack.c.bf16 %v4696_v39, %v4695_v38  ;;  %v4699_v36 = vld [vmem:[%s7584_s5 + $0x1c0] sm:$0xff]  ;;  %v4700_v32 = vld [vmem:[%s7584_s5 + $0x1c8] sm:$0xff] }
 0x3cd   : > { %3997 = vmatmul.mubr.f32.gmra.mrb[84].mxu1 %v7347_v49  ;;  %v5601_v43 = vpack.c.bf16 %v4700_v32, %v4699_v36 }
 0x3ce   : > { %4678 = vmatprep.mubr.msk.f32.mxu1 %vm2697_vm5, %v7350_v50 }
 0x3cf   : > { %5566 = vmatpush1.bf16.msra.mxu1 %v5565_v33  ;;  %v4698_v33 = vld [vmem:[%s7584_s5 + $0x1b8] sm:$0xff] }
 0x3d0   : > { %5567 = vmatprep.subr.bf16.mxu1 %v5716_v23 }
 0x3d3   : > { %5569 = vmatpush1.bf16.msra.mxu1 %v5568_v53  ;;  %v3818_v63 = vpop.permute.xlu1 %3817  ;;  %v4702_v53 = vld [vmem:[%s7584_s5 + $0x1d8] sm:$0xff] }
 0x3d4   : > { %5570 = vmatprep.subr.bf16.mxu1 %v5716_v23  ;;  %v7369_v9 = vsel %vm2697_vm5, %v3773_v2, %v3818_v63  ;;  %v5604_v57 = vpack.c.bf16 %v4702_v53, %v4701_v44  ;;  %v4705_v2 = vld [vmem:[%s7584_s5 + $0x1f0] sm:$0xff] }
 0x3d5   : > { %4002 = vmatmul.mubr.f32.gmra.mrb[86].mxu1 %v7369_v9  ;;  %v5610_v6 = vpack.c.bf16 %v4706_v4, %v4705_v2 }
 0x3d6   : > { %4679 = vmatprep.mubr.msk.f32.mxu1 %vm2697_vm5, %v7372_v20 }
 0x3d7   : > { %5572 = vmatpush1.bf16.msra.mxu1 %v5571_v61  ;;  %v4704_v61 = vld [vmem:[%s7584_s5 + $0x1e8] sm:$0xff] }
 0x3d8   : > { %5573 = vmatprep.subr.bf16.mxu1 %v5716_v23  ;;  %v5607_v63 = vpack.c.bf16 %v4704_v61, %v4703_v58  ;;  %v4723_v61 = vld [vmem:[%s7585_s6] ss:$0 sm:$0xff] }
 0x3db   : > { %5575 = vmatpush1.bf16.msra.mxu1 %v5574_v12  ;;  %v3820_v19 = vpop.permute.xlu0 %3819  ;;  %v4707_v12 = vld [vmem:[%s7584_s5 + $0x200] sm:$0xff] }
 0x3dc   : > { %5576 = vmatprep.subr.bf16.mxu1 %v5716_v23  ;;  %v7391_v5 = vsel %vm2697_vm5, %v3774_v15, %v3820_v19  ;;  %v5613_v16 = vpack.c.bf16 %v4708_v13, %v4707_v12  ;;  %v4710_v19 = vld [vmem:[%s7584_s5 + $0x218] sm:$0xff] }
 0x3dd   : > { %4007 = vmatmul.mubr.f32.gmra.mrb[88].mxu1 %v7391_v5 }
 0x3de   : > { %4680 = vmatprep.mubr.msk.f32.mxu1 %vm2697_vm5, %v7394_v46 }
 0x3df   : > { %5578 = vmatpush1.bf16.msra.mxu1 %v5577_v18  ;;  %v4709_v18 = vld [vmem:[%s7584_s5 + $0x210] sm:$0xff] }
 0x3e0   : > { %5579 = vmatprep.subr.bf16.mxu1 %v5716_v23  ;;  %v5616_v15 = vpack.c.bf16 %v4710_v19, %v4709_v18 }
 0x3e3   : > { %5581 = vmatpush1.bf16.msra.mxu1 %v5580_v28  ;;  %v3822_v35 = vpop.permute.xlu1 %3821  ;;  %v4713_v28 = vld [vmem:[%s7584_s5 + $0x230] sm:$0xff] }
 0x3e4   : > { %5582 = vmatprep.subr.bf16.mxu1 %v5716_v23  ;;  %v7413_v59 = vsel %vm2697_vm5, %v3775_v55, %v3822_v35  ;;  %v5622_v30 = vpack.c.bf16 %v4714_v51, %v4713_v28 }
 0x3e5   : > { %4012 = vmatmul.mubr.f32.gmra.mrb[90].mxu1 %v7413_v59 }
 0x3e6   : > { %4681 = vmatprep.mubr.msk.f32.mxu1 %vm2697_vm5, %v7416_v3 }
 0x3e7   : > { %5584 = vmatpush1.bf16.msra.mxu1 %v5583_v31 }
 0x3e8   : > { %5585 = vmatprep.subr.bf16.mxu1 %v5716_v23 }
 0x3eb   : > { %5587 = vmatpush1.bf16.msra.mxu1 %v5586_v7  ;;  %v3824_v14 = vpop.permute.xlu0 %3823 }
 0x3ec   : > { %5588 = vmatprep.subr.bf16.mxu1 %v5716_v23  ;;  %v7423_v29 = vsel %vm2697_vm5, %v3776_v10, %v3824_v14 }
 0x3ed   : > { %4017 = vmatmul.mubr.f32.gmra.mrb[92].mxu1 %v7423_v29 }
 0x3ee   : > { %4682 = vmatprep.mubr.msk.f32.mxu1 %vm2697_vm5, %v7426_v45 }
 0x3ef   : > { %v3810_v25 = vpop.permute.xlu0 %3809 }
 0x3f0   : > { %v3839_v54 = vsel %vm2697_vm5, %v3769_v48, %v3810_v25 }
 0x3f3   : > { %v3826_v1 = vpop.permute.xlu1 %3825 }
 0x3f4   : > { %v7437_v52 = vsel %vm2697_vm5, %v3777_v24, %v3826_v1 }
 0x3f5   : > { %4022 = vmatmul.mubr.f32.gmra.mrb[94].mxu1 %v7437_v52 }
 0x3f6   : > { %4683 = vmatprep.mubr.msk.f32.mxu1 %vm2697_vm5, %v3789_v0 }
 0x3f9   : > { %4095 = vmatmul.mubr.f32.vlgmr.msra.gmra.mrb[96].mxu1 %v3839_v54 }
 0x3fa   : > { %5590 = vmatpush1.bf16.msra.mxu1 %v5589_v62  ;;  %4684 = vmatprep.mubr.msk.f32.mxu1 %vm2697_vm5, %v7242_v60  ;;  %v4697_v60 = vld [vmem:[%s7584_s5 + $0x1b0] sm:$0xff] }
 0x3fb   : > { %5591 = vmatprep.subr.bf16.mxu1 %v5716_v23 }
 0x3fd   : > { %4100 = vmatmul.mubr.f32.gmra.mrb[98].mxu1 %v7303_v17  ;;  %v5598_v17 = vpack.c.bf16 %v4698_v33, %v4697_v60 }
 0x3fe   : > { %5593 = vmatpush1.bf16.msra.mxu1 %v5592_v22  ;;  %4685 = vmatprep.mubr.msk.f32.mxu1 %vm2697_vm5, %v7306_v34 }
 0x3ff   : > { %5594 = vmatprep.subr.bf16.mxu1 %v5716_v23 }
 0x401   : > { %4105 = vmatmul.mubr.f32.gmra.mrb[100].mxu1 %v7325_v26 }
 0x402   : > { %5596 = vmatpush1.bf16.msra.mxu1 %v5595_v40  ;;  %4686 = vmatprep.mubr.msk.f32.mxu1 %vm2697_vm5, %v7328_v37 }
 0x403   : > { %5597 = vmatprep.subr.bf16.mxu1 %v5716_v23 }
 0x405   : > { %4110 = vmatmul.mubr.f32.gmra.mrb[102].mxu1 %v7347_v49 }
 0x406   : > { %5599 = vmatpush1.bf16.msra.mxu1 %v5598_v17  ;;  %4687 = vmatprep.mubr.msk.f32.mxu1 %vm2697_vm5, %v7350_v50 }
 0x407   : > { %5600 = vmatprep.subr.bf16.mxu1 %v5716_v23 }
 0x409   : > { %4115 = vmatmul.mubr.f32.gmra.mrb[104].mxu1 %v7369_v9 }
 0x40a   : > { %5602 = vmatpush1.bf16.msra.mxu1 %v5601_v43  ;;  %4688 = vmatprep.mubr.msk.f32.mxu1 %vm2697_vm5, %v7372_v20 }
 0x40b   : > { %5603 = vmatprep.subr.bf16.mxu1 %v5716_v23 }
 0x40d   : > { %4120 = vmatmul.mubr.f32.gmra.mrb[106].mxu1 %v7391_v5 }
 0x40e   : > { %5605 = vmatpush1.bf16.msra.mxu1 %v5604_v57  ;;  %4689 = vmatprep.mubr.msk.f32.mxu1 %vm2697_vm5, %v7394_v46 }
 0x40f   : > { %5606 = vmatprep.subr.bf16.mxu1 %v5716_v23 }
 0x411   : > { %4125 = vmatmul.mubr.f32.gmra.mrb[108].mxu1 %v7413_v59 }
 0x412   : > { %5608 = vmatpush1.bf16.msra.mxu1 %v5607_v63  ;;  %4690 = vmatprep.mubr.msk.f32.mxu1 %vm2697_vm5, %v7416_v3 }
 0x413   : > { %5609 = vmatprep.subr.bf16.mxu1 %v5716_v23 }
 0x415   : > { %4130 = vmatmul.mubr.f32.gmra.mrb[110].mxu1 %v7423_v29 }
 0x416   : > { %5611 = vmatpush1.bf16.msra.mxu1 %v5610_v6  ;;  %4715 = vmatprep.mubr.msk.f32.mxu1 %vm2697_vm5, %v7306_v34  ;;  %v4712_v34 = vld [vmem:[%s7584_s5 + $0x228] sm:$0xff] }
 0x417   : > { %5612 = vmatprep.subr.bf16.mxu1 %v5716_v23  ;;  %v5619_v27 = vpack.c.bf16 %v4712_v34, %v4711_v21 }
 0x41a   : > { %5614 = vmatpush1.bf16.msra.mxu1 %v5613_v16 }
 0x41b   : > { %5615 = vmatprep.subr.bf16.mxu1 %v5716_v23 }
 0x41e   : > { %5617 = vmatpush1.bf16.msra.mxu1 %v5616_v15 }
 0x41f   : > { %5618 = vmatprep.subr.bf16.mxu1 %v5716_v23 }
 0x422   : > { %5620 = vmatpush1.bf16.msra.mxu1 %v5619_v27 }
 0x423   : > { %5621 = vmatprep.subr.bf16.mxu1 %v5716_v23  ;;  %v3828_v23 = vpop.permute.xlu1 %3827 }
 0x426   : > { %5623 = vmatpush1.bf16.msra.mxu1 %v5622_v30 }
 0x429   : > { %4228 = vmatmul.mubr.f32.vlgmr.msra.gmra.mrb[112].mxu1 %v7325_v26  ;;  %v3798_v26 = vld [vmem:[#allocation3 + $0xe1] sm:$0xff] }
 0x42a   : > { %4716 = vmatprep.mubr.msk.f32.mxu1 %vm2697_vm5, %v7328_v37  ;;  %v3778_v37 = vld [vmem:[#allocation3 + $0xdf] sm:$0xff] }
 0x42d   : > { %4233 = vmatmul.mubr.f32.gmra.mrb[114].mxu1 %v7347_v49  ;;  %v3848_v49 = vsel %vm2697_vm5, %v3778_v37, %v3828_v23 }
 0x42e   : > { %4717 = vmatprep.mubr.msk.f32.mxu1 %vm2697_vm5, %v7350_v50 }
 0x431   : > { %4238 = vmatmul.mubr.f32.gmra.mrb[116].mxu1 %v7369_v9 }
 0x432   : > { %4718 = vmatprep.mubr.msk.f32.mxu1 %vm2697_vm5, %v7372_v20 }
 0x435   : > { %4243 = vmatmul.mubr.f32.gmra.mrb[118].mxu1 %v7391_v5 }
 0x436   : > { %4719 = vmatprep.mubr.msk.f32.mxu1 %vm2697_vm5, %v7394_v46 }
 0x439   : > { %4248 = vmatmul.mubr.f32.gmra.mrb[120].mxu1 %v7413_v59 }
 0x43a   : > { %4720 = vmatprep.mubr.msk.f32.mxu1 %vm2697_vm5, %v7416_v3 }
 0x43d   : > { %4253 = vmatmul.mubr.f32.gmra.mrb[122].mxu1 %v7423_v29 }
 0x43e   : > { %4721 = vmatprep.mubr.msk.f32.mxu1 %vm2697_vm5, %v7426_v45 }
 0x441   : > { %4258 = vmatmul.mubr.f32.gmra.mrb[124].mxu1 %v7437_v52 }
 0x442   : > { %4722 = vmatprep.mubr.msk.f32.mxu1 %vm2697_vm5, %v3798_v26 }
 0x445   : > { %4263 = vmatmul.mubr.f32.gmra.mrb[126].mxu1 %v3848_v49 }
 0x491   : > { %v3988_v50 = vpop.f32.mrb[80].mxu1 }
 0x492   : > { %v3990_v9 = vpop.f32.mrb[81].mxu1 }
 0x498   : > { %v3993_v20 = vpop.f32.mrb[82].mxu1 }
 0x499   : > { %v3995_v5 = vpop.f32.mrb[83].mxu1 }
 0x4a0   : > { %v3998_v46 = vpop.f32.mrb[84].mxu1 }
 0x4a1   : > { %v4000_v31 = vpop.f32.mrb[85].mxu1 }
 0x4a8   : > { %v4003_v35 = vpop.f32.mrb[86].mxu1 }
 0x4a9   : > { %v4005_v55 = vpop.f32.mrb[87].mxu1 }
 0x4b0   : > { %v4008_v11 = vpop.f32.mrb[88].mxu1 }
 0x4b1   : > { %v4010_v56 = vpop.f32.mrb[89].mxu1 }
 0x4b8   : > { %v4013_v59 = vpop.f32.mrb[90].mxu1 }
 0x4b9   : > { %v4015_v3 = vpop.f32.mrb[91].mxu1 }
 0x4c0   : > { %v4018_v7 = vpop.f32.mrb[92].mxu1 }
 0x4c1   : > { %v4020_v14 = vpop.f32.mrb[93].mxu1 }
 0x4c8   : > { %v4023_v10 = vpop.f32.mrb[94].mxu1 }
 0x4c9   : > { %v4025_v29 = vpop.f32.mrb[95].mxu1 }
 0x4cc   : > { %v4096_v45 = vpop.f32.mrb[96].mxu1 }
 0x4cd   : > { %v4097_v48 = vadd.f32 %v4096_v45, %v3988_v50  ;;  %v4098_v0 = vpop.f32.mrb[97].mxu1 }
 0x4d0   : > { %v4101_v1 = vpop.f32.mrb[98].mxu1 }
 0x4d1   : > { %v4102_v24 = vadd.f32 %v4101_v1, %v3993_v20  ;;  %v4103_v25 = vpop.f32.mrb[99].mxu1 }
 0x4d4   : > { %v4106_v41 = vpop.f32.mrb[100].mxu1 }
 0x4d5   : > { %v4107_v42 = vadd.f32 %v4106_v41, %v3998_v46  ;;  %v4108_v52 = vpop.f32.mrb[101].mxu1 }
 0x4d8   : > { %v4111_v54 = vpop.f32.mrb[102].mxu1 }
 0x4d9   : > { %v4112_v62 = vadd.f32 %v4111_v54, %v4003_v35  ;;  %v4113_v47 = vpop.f32.mrb[103].mxu1 }
 0x4dc   : > { %v4116_v8 = vpop.f32.mrb[104].mxu1 }
 0x4dd   : > { %v4117_v22 = vadd.f32 %v4116_v8, %v4008_v11  ;;  %v4118_v38 = vpop.f32.mrb[105].mxu1 }
 0x4e0   : > { %v4121_v39 = vpop.f32.mrb[106].mxu1 }
 0x4e1   : > { %v4122_v40 = vadd.f32 %v4121_v39, %v4013_v59  ;;  %v4123_v60 = vpop.f32.mrb[107].mxu1 }
 0x4e4   : > { %v4126_v33 = vpop.f32.mrb[108].mxu1 }
 0x4e5   : > { %v4127_v17 = vadd.f32 %v4126_v33, %v4018_v7  ;;  %v4128_v36 = vpop.f32.mrb[109].mxu1 }
 0x4e8   : > { %v4131_v32 = vpop.f32.mrb[110].mxu1 }
 0x4e9   : > { %v4132_v43 = vadd.f32 %v4131_v32, %v4023_v10  ;;  %v4133_v44 = vpop.f32.mrb[111].mxu1 }
 0x4fc   : > { %v4229_v53 = vpop.f32.mrb[112].mxu1 }
 0x4fd   : > { %v4268_v57 = vadd.f32 %v4229_v53, %v4097_v48  ;;  %v4231_v58 = vpop.f32.mrb[113].mxu1 }
 0x4ff   : > { %v4283_v2 = vadd.f32 %v4723_v61, %v4268_v57 }
 0x500   : > { %v4234_v63 = vpop.f32.mrb[114].mxu1 }
 0x501   : > { %v4269_v4 = vadd.f32 %v4234_v63, %v4102_v24  ;;  %v4236_v6 = vpop.f32.mrb[115].mxu1  ;;  %v4291_v16 = vmax.f32 %v4283_v2, 0.0 }
 0x503   : > { %v4284_v12 = vadd.f32 %v4723_v61, %v4269_v4 }
 0x504   : > { %v4239_v13 = vpop.f32.mrb[116].mxu1 }
 0x505   : > { %v4292_v18 = vmax.f32 %v4284_v12, 0.0  ;;  %v4270_v19 = vadd.f32 %v4239_v13, %v4107_v42  ;;  %v4241_v15 = vpop.f32.mrb[117].mxu1 }
 0x507   : > { %v4299_v21 = vmax.f32 %v4291_v16, %v4292_v18  ;;  %v4285_v27 = vadd.f32 %v4723_v61, %v4270_v19 }
 0x508   : > { %v4244_v34 = vpop.f32.mrb[118].mxu1 }
 0x509   : > { %4303 = vst [vmem:[#allocation6] sm:$0xff] %v4299_v21  ;;  %v4271_v28 = vadd.f32 %v4244_v34, %v4112_v62  ;;  %v4246_v51 = vpop.f32.mrb[119].mxu1  ;;  %v4293_v26 = vmax.f32 %v4285_v27, 0.0 }
 0x50b   : > { %v4286_v30 = vadd.f32 %v4723_v61, %v4271_v28 }
 0x50c   : > { %v4249_v23 = vpop.f32.mrb[120].mxu1 }
 0x50d   : > { %v4294_v37 = vmax.f32 %v4286_v30, 0.0  ;;  %v4272_v49 = vadd.f32 %v4249_v23, %v4117_v22  ;;  %v4251_v50 = vpop.f32.mrb[121].mxu1 }
 0x50f   : > { %v4300_v9 = vmax.f32 %v4293_v26, %v4294_v37  ;;  %v4287_v35 = vadd.f32 %v4723_v61, %v4272_v49 }
 0x510   : > { %v4307_v20 = vld [vmem:[#allocation6] ss:$2 sm:$0xf]  ;;  %v4315_v5 = vld [vmem:[#allocation6 + $0x1] ss:$2 sm:$0xf] }
 0x511   : > { %v4322_v46 = vmax.f32 %v4307_v20, %v4315_v5  ;;  %4304 = vst [vmem:[#allocation6 + $0x8] sm:$0xff] %v4300_v9  ;;  %v4254_v31 = vpop.f32.mrb[122].mxu1  ;;  %v4295_v14 = vmax.f32 %v4287_v35, 0.0 }
 0x512   : > { %v4273_v55 = vadd.f32 %v4254_v31, %v4122_v40  ;;  %v4256_v11 = vpop.f32.mrb[123].mxu1 }
 0x513   : > { %4326 = vst [vmem:[%s7570_s23] sm:$0xf] %v4322_v46 }
 0x514   : > { %v4288_v56 = vadd.f32 %v4723_v61, %v4273_v55  ;;  %v4259_v59 = vpop.f32.mrb[124].mxu1 }
 0x515   : > { %v4274_v3 = vadd.f32 %v4259_v59, %v4127_v17  ;;  %v4261_v7 = vpop.f32.mrb[125].mxu1 }
 0x516   : > { %v4296_v10 = vmax.f32 %v4288_v56, 0.0 }
 0x517   : > { %v4289_v24 = vadd.f32 %v4723_v61, %v4274_v3 }
 0x518   : > { %v4309_v29 = vld [vmem:[#allocation6 + $0x8] ss:$2 sm:$0xf]  ;;  %v4317_v45 = vld [vmem:[#allocation6 + $0x9] ss:$2 sm:$0xf]  ;;  %v4301_v48 = vmax.f32 %v4295_v14, %v4296_v10 }
 0x519   : > { %v4323_v0 = vmax.f32 %v4309_v29, %v4317_v45  ;;  %v4264_v1 = vpop.f32.mrb[126].mxu1  ;;  %v4297_v52 = vmax.f32 %v4289_v24, 0.0 }
 0x51a   : > { %4305 = vst [vmem:[#allocation6 + $0x10] sm:$0xff] %v4301_v48  ;;  %v4275_v25 = vadd.f32 %v4264_v1, %v4132_v43  ;;  %v4266_v41 = vpop.f32.mrb[127].mxu1 }
 0x51b   : > { %4327 = vst [vmem:[%s7570_s23 + $0x4] sm:$0xf] %v4323_v0 }
 0x51c   : > { %v4290_v42 = vadd.f32 %v4723_v61, %v4275_v25 }
 0x51e   : > { %v4298_v54 = vmax.f32 %v4290_v42, 0.0 }
 0x520   : > { %v4302_v62 = vmax.f32 %v4297_v52, %v4298_v54 }
 0x521   : > { %v4311_v47 = vld [vmem:[#allocation6 + $0x10] ss:$2 sm:$0xf]  ;;  %v4319_v8 = vld [vmem:[#allocation6 + $0x11] ss:$2 sm:$0xf] }
 0x522   : > { %v4324_v22 = vmax.f32 %v4311_v47, %v4319_v8  ;;  %4306 = vst [vmem:[#allocation6 + $0x18] sm:$0xff] %v4302_v62 }
 0x524   : > { %4328 = vst [vmem:[%s7570_s23 + $0x8] sm:$0xf] %v4324_v22 }
 0x529   : > { %v4313_v38 = vld [vmem:[#allocation6 + $0x18] ss:$2 sm:$0xf]  ;;  %v4321_v39 = vld [vmem:[#allocation6 + $0x19] ss:$2 sm:$0xf] }
 0x52a   : > { %v4325_v40 = vmax.f32 %v4313_v38, %v4321_v39 }
 0x52c   : > { %4329 = vst [vmem:[%s7570_s23 + $0xc] sm:$0xf] %v4325_v40 }
 0x52d PF: > { %s17_s24 = sadd.s32 1, %s5710_s24  }
 0x52e   : > { %p14_p4 = scmp.ge.s32.totalorder %s17_s24, 4  }
 0x530   :  { %16 = sbr.rel (!%p14_p4) target bundleno = 1 (0x1), region = 172 }

</bundles_post_ra>
